<compile_context>
chip_gen: v7x
topology: tpu7x:2x2x1
jax: 0.10.0
libtpu: 0.0.40
codegen_flags: <defaults>
</compile_context>

<pallas_src>
import math
import functools

import numpy as np
import jax
import jax.numpy as jnp
from jax.experimental import pallas as pl
from jax.experimental.pallas import tpu as pltpu

# ----------------- model configuration (small, deterministic) -----------------
B, A   = 2, 4            # batch, num_agents
S      = 8               # per_graph_size (tokens per node)
F_IN   = 8               # input_channels (raw edge feature dim)
T_DIM  = 16              # time_channels
H      = 32              # mixer hidden_channels
O      = 32              # mixer out_channels == dim_in_time
NODE_D = 16              # dim_in_node
H2     = 32              # edge predictor hidden_channels
L      = 2               # mixer num_layers
TOK_E  = int(0.5 * S)    # token expansion factor 0.5 -> 4
CH_E   = 4 * H           # channel expansion factor 4 -> 128
D_EP   = O + NODE_D      # edge predictor input dim
EPS    = 1e-5
TAU    = 1.0

BA    = B * A
BAS   = BA * S
NPAIR = B * A * A

# ---- packed bias / LayerNorm / small-vector table (rows of (VEC_ROWS, 128)) ---
(R_TIME_W, R_FE_B, R_LN_G, R_LN_B, R_HEAD_B, R_EP_BSD, R_EP_WO, R_EP_BO) = range(8)
N_GLOBAL_ROWS = 8
(RO_TOK_G, RO_TOK_B, RO_CH_G, RO_CH_B, RO_CH_B0, RO_CH_B1) = range(6)
ROWS_PER_LAYER = 6
VEC_ROWS  = N_GLOBAL_ROWS + L * ROWS_PER_LAYER        # 20
VEC_LANES = 128

# ---- compile-time-constant selection / mask matrices (hoisted out of kernel) --
_r = np.arange(NPAIR)
_POOL    = (np.arange(BAS)[None, :] // S == np.arange(BA)[:, None]).astype(np.float32) / S
_SRC_SEL = (np.arange(BA)[None, :] == (_r // A)[:, None]).astype(np.float32)
_DST_SEL = (np.arange(BA)[None, :] == ((_r // (A * A)) * A + _r % A)[:, None]).astype(np.float32)
_OFFDIAG = (((_r // A) % A) != (_r % A)).astype(np.float32)[:, None]


# ----------------------------- in-kernel helpers ------------------------------
def _gelu(x):
    # tanh-approx GELU (perf feedback). torch default is exact erf GELU; the
    # deviation is ~1e-3 and downstream of a sigmoid + hard round.
    c = 0.7978845608028654
    return 0.5 * x * (1.0 + jnp.tanh(c * (x + 0.044715 * x * x * x)))


def _layernorm(x, g, b):
    mu = jnp.mean(x, axis=-1, keepdims=True)
    var = jnp.mean(jnp.square(x - mu), axis=-1, keepdims=True)
    return (x - mu) * jax.lax.rsqrt(var + EPS) * g + b


def _sigmoid(x):
    return 1.0 / (1.0 + jnp.exp(-x))


# -------------------------------- fused kernel --------------------------------
def fused_kernel(ef_ref, ts_ref, mk_ref, nf_ref, u_ref,
                 vecs_ref, fe_we_ref, fe_wt_ref,
                 tok_w0_ref, tok_w1_ref, tok_b0_ref, tok_b1_ref,
                 ch_w0_ref, ch_w1_ref, head_w_ref, ep_w_ref,
                 pool_ref, src_sel_ref, dst_sel_ref, offdiag_ref,
                 out_ref, *, inv_tau):
    f32 = jnp.float32

    def vrow(r, n):                       # (1, n) slice of the packed vector table
        return vecs_ref[r:r + 1, :n]

    # ---- TimeEncode (frozen) + FeatEncode, no concat: two MXU dots ----
    tfeat = jnp.cos(ts_ref[...] * vrow(R_TIME_W, T_DIM)) * mk_ref[...]      # (BAS, T_DIM)
    x = (jnp.dot(ef_ref[...], fe_we_ref[...], preferred_element_type=f32)
         + jnp.dot(tfeat, fe_wt_ref[...], preferred_element_type=f32)
         + vrow(R_FE_B, H))                                                 # (BAS, H)

    # ---- mixer blocks, all BA samples batched (static unroll) ----
    # TODO(synk): dropout = identity (inference mode); no in-kernel dropout.
    for l in range(L):
        base = N_GLOBAL_ROWS + ROWS_PER_LAYER * l
        # token mixing via block-diagonal kron(I_BA, W) weights (stays a 2-D dot)
        y = _layernorm(x, vrow(base + RO_TOK_G, H), vrow(base + RO_TOK_B, H))
        g = _gelu(jnp.dot(tok_w0_ref[l], y,
                          preferred_element_type=f32) + tok_b0_ref[l])      # (BA*TOK_E, H)
        x = x + jnp.dot(tok_w1_ref[l], g,
                        preferred_element_type=f32) + tok_b1_ref[l]         # (BAS, H)
        # channel mixing
        y = _layernorm(x, vrow(base + RO_CH_G, H), vrow(base + RO_CH_B, H))
        g = _gelu(jnp.dot(y, ch_w0_ref[l],
                          preferred_element_type=f32) + vrow(base + RO_CH_B0, CH_E))
        x = x + jnp.dot(g, ch_w1_ref[l],
                        preferred_element_type=f32) + vrow(base + RO_CH_B1, H)

    # ---- final LayerNorm + token-mean pooling (precomputed matrix) + mlp_head ----
    x = _layernorm(x, vrow(R_LN_G, H), vrow(R_LN_B, H))
    feat = jnp.dot(pool_ref[...], x, preferred_element_type=f32)            # (BA, H)
    feat = jnp.dot(feat, head_w_ref[...],
                   preferred_element_type=f32) + vrow(R_HEAD_B, O)          # (BA, O)

    # ---- EdgePredictor_per_node ----
    # [feat | node_feats] @ [Wsrc | Wdst] done as two dots (no in-kernel concat)
    sd = (jnp.dot(feat, ep_w_ref[:O, :], preferred_element_type=f32)
          + jnp.dot(nf_ref[...], ep_w_ref[O:, :], preferred_element_type=f32)
          + vrow(R_EP_BSD, 2 * H2))                                         # (BA, 2*H2)
    hs = sd[:, :H2]
    hd = sd[:, H2:2 * H2]
    # pairwise (b, i, j) combinations via precomputed 0/1 selection matmuls
    pair = jnp.maximum(jnp.dot(src_sel_ref[...], hs, preferred_element_type=f32)
                       + jnp.dot(dst_sel_ref[...], hd, preferred_element_type=f32),
                       0.0)                                                 # (NPAIR, H2)
    # out_fc as VPU multiply + lane reduce (avoids an N=1 MXU push)
    logit = jnp.sum(pair * vrow(R_EP_WO, H2), axis=-1, keepdims=True) + vrow(R_EP_BO, 1)
    # NOTE: reference builds RelaxedBernoulli with logits=sigmoid(out_fc(.)), so
    # the "double squash" below is the intended semantics.
    probs = _sigmoid(logit)                                                 # (NPAIR, 1)

    # ---- RelaxedBernoulli rsample + straight-through round + diag mask ----
    # TODO(synk): uniform draw comes from jax.random in the wrapper; in-kernel
    #             HW PRNG (pltpu.prng_seed) has no interpret/CPU lowering.
    u = u_ref[...]                                                          # (NPAIR, 1)
    noise = jnp.log(u) - jnp.log(1.0 - u)                                   # logistic noise
    soft = _sigmoid((probs + noise) * inv_tau)
    hard = jnp.where(soft > 0.5, f32(1.0), f32(0.0))                        # ST round (fwd value)
    out_ref[...] = hard * offdiag_ref[...]


# --------------------------------- wrappers -------------------------------------
def _inst_spec(shape):
    nd = len(shape)
    return pl.BlockSpec((None,) + tuple(shape), lambda g, _n=nd: (g,) + (0,) * _n)


def _wgt_spec(shape):
    nd = len(shape)
    return pl.BlockSpec(tuple(shape), lambda g, _n=nd: (0,) * _n)


@functools.partial(jax.jit, static_argnames=("tau",))
def mixer_per_node_forward_batched(model_inputs, node_feats, params, key, tau=TAU):
    """model_inputs/node_feats carry a leading instance axis G (parallel grid)."""
    edge_feats, edge_ts, non_act_edge_mask = model_inputs
    G = edge_feats.shape[0]
    ef = edge_feats.reshape(G, BAS, F_IN).astype(jnp.float32)
    ts = edge_ts.reshape(G, BAS, 1).astype(jnp.float32)
    mk = non_act_edge_mask.reshape(G, BAS, 1).astype(jnp.float32)
    nf = node_feats.reshape(G, BA, NODE_D).astype(jnp.float32)
    u = jax.random.uniform(key, (G, NPAIR, 1), jnp.float32, 1e-6, 1.0 - 1e-6)

    per_inst = [ef, ts, mk, nf, u]
    weights = [params["vecs"], params["fe_we"], params["fe_wt"],
               params["tok_w0"], params["tok_w1"], params["tok_b0"], params["tok_b1"],
               params["ch_w0"], params["ch_w1"], params["head_w"], params["ep_w"],
               jnp.asarray(_POOL), jnp.asarray(_SRC_SEL),
               jnp.asarray(_DST_SEL), jnp.asarray(_OFFDIAG)]

    out = pl.pallas_call(
        functools.partial(fused_kernel, inv_tau=1.0 / tau),
        out_shape=jax.ShapeDtypeStruct((G, NPAIR, 1), jnp.float32),
        grid=(G,),
        in_specs=([_inst_spec(t.shape[1:]) for t in per_inst]
                  + [_wgt_spec(w.shape) for w in weights]),
        out_specs=pl.BlockSpec((None, NPAIR, 1), lambda g: (g, 0, 0)),
        compiler_params=pltpu.CompilerParams(dimension_semantics=("parallel",)),
    )(*per_inst, *weights)
    return out.reshape(G, B, A, A)


def mixer_per_node_forward(model_inputs, node_feats, params, key, tau=TAU):
    edge_feats, edge_ts, non_act_edge_mask = model_inputs
    mi = (edge_feats[None], edge_ts[None], non_act_edge_mask[None])
    out = mixer_per_node_forward_batched(mi, node_feats[None], params, key, tau=tau)
    return out[0]


# ------------------------------ parameter init ---------------------------------
def _linear(key, fan_in, fan_out):
    kw, kb = jax.random.split(key)
    bound = 1.0 / math.sqrt(fan_in)
    w = jax.random.uniform(kw, (fan_out, fan_in), jnp.float32, -bound, bound)  # torch layout
    b = jax.random.uniform(kb, (fan_out,), jnp.float32, -bound, bound)
    return w, b


def _pad_row(v):
    v = jnp.asarray(v, jnp.float32).reshape(-1)
    return jnp.pad(v, (0, VEC_LANES - v.shape[0]))


def init_params(key):
    keys = jax.random.split(key, 16)
    ki = iter(keys)

    rows = [jnp.zeros((VEC_LANES,), jnp.float32) for _ in range(VEC_ROWS)]

    def set_row(idx, v):
        rows[idx] = _pad_row(v)

    # TimeEncode (frozen): weight = 1 / 10**linspace(0, 9, T_DIM), bias = 0
    set_row(R_TIME_W, (1.0 / 10.0 ** jnp.linspace(0.0, 9.0, T_DIM)).astype(jnp.float32))

    # FeatEncode: Linear(F_IN + T_DIM, H), input ordered [edge_feats | time_feats]
    fe_w_full, fe_b = _linear(next(ki), F_IN + T_DIM, H)     # torch (H, 24)
    fe_we = fe_w_full[:, :F_IN].T                            # (F_IN, H)
    fe_wt = fe_w_full[:, F_IN:].T                            # (T_DIM, H)
    set_row(R_FE_B, fe_b)

    eye_ba = jnp.eye(BA, dtype=jnp.float32)
    tok_w0, tok_w1, tok_b0, tok_b1, ch_w0, ch_w1 = [], [], [], [], [], []
    for l in range(L):
        base = N_GLOBAL_ROWS + ROWS_PER_LAYER * l
        set_row(base + RO_TOK_G, jnp.ones((H,), jnp.float32))
        set_row(base + RO_TOK_B, jnp.zeros((H,), jnp.float32))
        w0, b0 = _linear(next(ki), S, TOK_E)                 # torch (TOK_E, S)
        w1, b1 = _linear(next(ki), TOK_E, S)                 # torch (S, TOK_E)
        tok_w0.append(jnp.kron(eye_ba, w0))                  # (BA*TOK_E, BA*S)
        tok_w1.append(jnp.kron(eye_ba, w1))                  # (BA*S, BA*TOK_E)
        tok_b0.append(jnp.tile(b0, BA).reshape(BA * TOK_E, 1))
        tok_b1.append(jnp.tile(b1, BA).reshape(BA * S, 1))

        set_row(base + RO_CH_G, jnp.ones((H,), jnp.float32))
        set_row(base + RO_CH_B, jnp.zeros((H,), jnp.float32))
        cw0, cb0 = _linear(next(ki), H, CH_E)                # (CH_E, H)
        cw1, cb1 = _linear(next(ki), CH_E, H)                # (H, CH_E)
        ch_w0.append(cw0.T)                                  # (H, CH_E)
        ch_w1.append(cw1.T)                                  # (CH_E, H)
        set_row(base + RO_CH_B0, cb0)
        set_row(base + RO_CH_B1, cb1)

    set_row(R_LN_G, jnp.ones((H,), jnp.float32))
    set_row(R_LN_B, jnp.zeros((H,), jnp.float32))
    hw, hb = _linear(next(ki), H, O)                         # (O, H)
    set_row(R_HEAD_B, hb)

    # EdgePredictor_per_node: src_fc / dst_fc packed into one slab; out_fc as rows
    ws, bs = _linear(next(ki), D_EP, H2)                     # (H2, D_EP)
    wd, bd = _linear(next(ki), D_EP, H2)
    wo, bo = _linear(next(ki), H2, 1)                        # (1, H2), (1,)
    ep_w = jnp.concatenate([ws.T, wd.T], axis=1)             # (D_EP, 2*H2)
    set_row(R_EP_BSD, jnp.concatenate([bs, bd]))
    set_row(R_EP_WO, wo[0])
    set_row(R_EP_BO, bo)

    return dict(
        vecs=jnp.stack(rows),                                # (VEC_ROWS, 128)
        fe_we=fe_we, fe_wt=fe_wt,
        tok_w0=jnp.stack(tok_w0), tok_w1=jnp.stack(tok_w1),
        tok_b0=jnp.stack(tok_b0), tok_b1=jnp.stack(tok_b1),
        ch_w0=jnp.stack(ch_w0), ch_w1=jnp.stack(ch_w1),
        head_w=hw.T,                                         # (H, O)
        ep_w=ep_w,                                           # (48, 64)
    )


# ----------------------------------- main ---------------------------------------
if __name__ == "__main__":
    root = jax.random.PRNGKey(0)
    k_param, k_ef, k_ts, k_mask, k_node, k_sample = jax.random.split(root, 6)

    params = init_params(k_param)

    edge_feats = jax.random.normal(k_ef, (B, A, S, F_IN), jnp.float32)
    edge_ts = jax.random.uniform(k_ts, (B, A, S, 1), jnp.float32, 0.0, 100.0)
    non_act_edge_mask = (jax.random.uniform(k_mask, (B, A, S, 1)) > 0.2).astype(jnp.float32)
    node_feats = jax.random.normal(k_node, (B, A, NODE_D), jnp.float32)

    adjs = mixer_per_node_forward((edge_feats, edge_ts, non_act_edge_mask),
                                  node_feats, params, k_sample, tau=TAU)
    adjs = jax.block_until_ready(adjs)
    assert adjs.shape == (B, A, A)
    assert bool(jnp.all(jnp.diagonal(adjs, axis1=1, axis2=2) == 0.0))
    assert bool(jnp.all((adjs == 0.0) | (adjs == 1.0)))
    print("KERNEL_OK")
</pallas_src>

<mosaic_0001>
module attributes {stable_mosaic.version = 11 : i64} {
  func.func @fused_kernel(%arg0: i32, %arg1: memref<1x64x8xf32, #tpu.memory_space<vmem>>, %arg2: memref<1x64x1xf32, #tpu.memory_space<vmem>>, %arg3: memref<1x64x1xf32, #tpu.memory_space<vmem>>, %arg4: memref<1x8x16xf32, #tpu.memory_space<vmem>>, %arg5: memref<1x32x1xf32, #tpu.memory_space<vmem>>, %arg6: memref<20x128xf32, #tpu.memory_space<vmem>>, %arg7: memref<8x32xf32, #tpu.memory_space<vmem>>, %arg8: memref<16x32xf32, #tpu.memory_space<vmem>>, %arg9: memref<2x32x64xf32, #tpu.memory_space<vmem>>, %arg10: memref<2x64x32xf32, #tpu.memory_space<vmem>>, %arg11: memref<2x32x1xf32, #tpu.memory_space<vmem>>, %arg12: memref<2x64x1xf32, #tpu.memory_space<vmem>>, %arg13: memref<2x32x128xf32, #tpu.memory_space<vmem>>, %arg14: memref<2x128x32xf32, #tpu.memory_space<vmem>>, %arg15: memref<32x32xf32, #tpu.memory_space<vmem>>, %arg16: memref<48x64xf32, #tpu.memory_space<vmem>>, %arg17: memref<8x64xf32, #tpu.memory_space<vmem>>, %arg18: memref<32x8xf32, #tpu.memory_space<vmem>>, %arg19: memref<32x8xf32, #tpu.memory_space<vmem>>, %arg20: memref<32x1xf32, #tpu.memory_space<vmem>>, %arg21: memref<1x32x1xf32, #tpu.memory_space<vmem>>) attributes {dimension_semantics = [#tpu.dimension_semantics<parallel>], iteration_bounds = array<i64: 1>, scalar_prefetch = 0 : i64, scratch_operands = 0 : i64, tpu.core_type = #tpu.core_type<tc>, window_params = [{transform_indices = @transform_0, window_bounds = array<i64: 1, 64, 8>}, {transform_indices = @transform_1, window_bounds = array<i64: 1, 64, 1>}, {transform_indices = @transform_2, window_bounds = array<i64: 1, 64, 1>}, {transform_indices = @transform_3, window_bounds = array<i64: 1, 8, 16>}, {transform_indices = @transform_4, window_bounds = array<i64: 1, 32, 1>}, {pipeline_mode = #tpu.pipeline_mode<synchronous>, transform_indices = @transform_5, window_bounds = array<i64: 20, 128>}, {pipeline_mode = #tpu.pipeline_mode<synchronous>, transform_indices = @transform_6, window_bounds = array<i64: 8, 32>}, {pipeline_mode = #tpu.pipeline_mode<synchronous>, transform_indices = @transform_7, window_bounds = array<i64: 16, 32>}, {pipeline_mode = #tpu.pipeline_mode<synchronous>, transform_indices = @transform_8, window_bounds = array<i64: 2, 32, 64>}, {pipeline_mode = #tpu.pipeline_mode<synchronous>, transform_indices = @transform_9, window_bounds = array<i64: 2, 64, 32>}, {pipeline_mode = #tpu.pipeline_mode<synchronous>, transform_indices = @transform_10, window_bounds = array<i64: 2, 32, 1>}, {pipeline_mode = #tpu.pipeline_mode<synchronous>, transform_indices = @transform_11, window_bounds = array<i64: 2, 64, 1>}, {pipeline_mode = #tpu.pipeline_mode<synchronous>, transform_indices = @transform_12, window_bounds = array<i64: 2, 32, 128>}, {pipeline_mode = #tpu.pipeline_mode<synchronous>, transform_indices = @transform_13, window_bounds = array<i64: 2, 128, 32>}, {pipeline_mode = #tpu.pipeline_mode<synchronous>, transform_indices = @transform_14, window_bounds = array<i64: 32, 32>}, {pipeline_mode = #tpu.pipeline_mode<synchronous>, transform_indices = @transform_15, window_bounds = array<i64: 48, 64>}, {pipeline_mode = #tpu.pipeline_mode<synchronous>, transform_indices = @transform_16, window_bounds = array<i64: 8, 64>}, {pipeline_mode = #tpu.pipeline_mode<synchronous>, transform_indices = @transform_17, window_bounds = array<i64: 32, 8>}, {pipeline_mode = #tpu.pipeline_mode<synchronous>, transform_indices = @transform_18, window_bounds = array<i64: 32, 8>}, {pipeline_mode = #tpu.pipeline_mode<synchronous>, transform_indices = @transform_19, window_bounds = array<i64: 32, 1>}, {transform_indices = @transform_20, window_bounds = array<i64: 1, 32, 1>}]} {
    %c0 = arith.constant 0 : index
    %c0_0 = arith.constant 0 : index
    %c0_1 = arith.constant 0 : index
    %0 = vector.load %arg2[%c0, %c0_0, %c0_1] : memref<1x64x1xf32, #tpu.memory_space<vmem>>, vector<1x64x1xf32>
    %1 = vector.shape_cast %0 : vector<1x64x1xf32> to vector<64x1xf32>
    %c0_2 = arith.constant 0 : index
    %c0_3 = arith.constant 0 : index
    %2 = vector.load %arg6[%c0_2, %c0_3] : memref<20x128xf32, #tpu.memory_space<vmem>>, vector<1x16xf32>
    %3 = vector.broadcast %1 : vector<64x1xf32> to vector<64x16xf32>
    %4 = vector.broadcast %2 : vector<1x16xf32> to vector<64x16xf32>
    %5 = arith.mulf %3, %4 : vector<64x16xf32>
    %6 = math.cos %5 : vector<64x16xf32>
    %c0_4 = arith.constant 0 : index
    %c0_5 = arith.constant 0 : index
    %c0_6 = arith.constant 0 : index
    %7 = vector.load %arg3[%c0_4, %c0_5, %c0_6] : memref<1x64x1xf32, #tpu.memory_space<vmem>>, vector<1x64x1xf32>
    %8 = vector.shape_cast %7 : vector<1x64x1xf32> to vector<64x1xf32>
    %9 = vector.broadcast %8 : vector<64x1xf32> to vector<64x16xf32>
    %10 = arith.mulf %6, %9 : vector<64x16xf32>
    %c0_7 = arith.constant 0 : index
    %c0_8 = arith.constant 0 : index
    %c0_9 = arith.constant 0 : index
    %11 = vector.load %arg1[%c0_7, %c0_8, %c0_9] : memref<1x64x8xf32, #tpu.memory_space<vmem>>, vector<1x64x8xf32>
    %12 = vector.shape_cast %11 : vector<1x64x8xf32> to vector<64x8xf32>
    %c0_10 = arith.constant 0 : index
    %c0_11 = arith.constant 0 : index
    %13 = vector.load %arg7[%c0_10, %c0_11] : memref<8x32xf32, #tpu.memory_space<vmem>>, vector<8x32xf32>
    %cst = arith.constant dense<0.000000e+00> : vector<64x32xf32>
    %14 = tpu.matmul %12, %13, %cst {dimension_numbers = #tpu.dot_dimension_numbers<[1], [0], [0], [1], [0, 0, 1, 1], [], []>} : vector<64x8xf32>, vector<8x32xf32>, vector<64x32xf32> -> vector<64x32xf32>
    %c0_12 = arith.constant 0 : index
    %c0_13 = arith.constant 0 : index
    %15 = vector.load %arg8[%c0_12, %c0_13] : memref<16x32xf32, #tpu.memory_space<vmem>>, vector<16x32xf32>
    %cst_14 = arith.constant dense<0.000000e+00> : vector<64x32xf32>
    %16 = tpu.matmul %10, %15, %cst_14 {dimension_numbers = #tpu.dot_dimension_numbers<[1], [0], [0], [1], [0, 0, 1, 1], [], []>} : vector<64x16xf32>, vector<16x32xf32>, vector<64x32xf32> -> vector<64x32xf32>
    %17 = arith.addf %14, %16 : vector<64x32xf32>
    %c1 = arith.constant 1 : index
    %c0_15 = arith.constant 0 : index
    %18 = vector.load %arg6[%c1, %c0_15] : memref<20x128xf32, #tpu.memory_space<vmem>>, vector<1x32xf32>
    %19 = vector.broadcast %18 : vector<1x32xf32> to vector<64x32xf32>
    %20 = arith.addf %17, %19 : vector<64x32xf32>
    %c8 = arith.constant 8 : index
    %c0_16 = arith.constant 0 : index
    %21 = vector.load %arg6[%c8, %c0_16] : memref<20x128xf32, #tpu.memory_space<vmem>>, vector<1x32xf32>
    %c9 = arith.constant 9 : index
    %c0_17 = arith.constant 0 : index
    %22 = vector.load %arg6[%c9, %c0_17] : memref<20x128xf32, #tpu.memory_space<vmem>>, vector<1x32xf32>
    %cst_18 = arith.constant dense<0.000000e+00> : vector<64xf32>
    %23 = vector.multi_reduction <add>, %20, %cst_18 [1] : vector<64x32xf32> to vector<64xf32>
    %24 = vector.shape_cast %23 : vector<64xf32> to vector<64x1xf32>
    %cst_19 = arith.constant 3.200000e+01 : f32
    %25 = vector.broadcast %cst_19 : f32 to vector<64x1xf32>
    %26 = arith.divf %24, %25 : vector<64x1xf32>
    %27 = vector.broadcast %26 : vector<64x1xf32> to vector<64x32xf32>
    %28 = arith.subf %20, %27 : vector<64x32xf32>
    %29 = arith.mulf %28, %28 : vector<64x32xf32>
    %cst_20 = arith.constant dense<0.000000e+00> : vector<64xf32>
    %30 = vector.multi_reduction <add>, %29, %cst_20 [1] : vector<64x32xf32> to vector<64xf32>
    %31 = vector.shape_cast %30 : vector<64xf32> to vector<64x1xf32>
    %cst_21 = arith.constant 3.200000e+01 : f32
    %32 = vector.broadcast %cst_21 : f32 to vector<64x1xf32>
    %33 = arith.divf %31, %32 : vector<64x1xf32>
    %34 = vector.broadcast %26 : vector<64x1xf32> to vector<64x32xf32>
    %35 = arith.subf %20, %34 : vector<64x32xf32>
    %cst_22 = arith.constant 9.99999974E-6 : f32
    %36 = vector.broadcast %cst_22 : f32 to vector<64x1xf32>
    %37 = arith.addf %33, %36 : vector<64x1xf32>
    %38 = math.rsqrt %37 : vector<64x1xf32>
    %39 = vector.broadcast %38 : vector<64x1xf32> to vector<64x32xf32>
    %40 = arith.mulf %35, %39 : vector<64x32xf32>
    %41 = vector.broadcast %21 : vector<1x32xf32> to vector<64x32xf32>
    %42 = arith.mulf %40, %41 : vector<64x32xf32>
    %43 = vector.broadcast %22 : vector<1x32xf32> to vector<64x32xf32>
    %44 = arith.addf %42, %43 : vector<64x32xf32>
    %c0_23 = arith.constant 0 : index
    %c0_24 = arith.constant 0 : index
    %c0_25 = arith.constant 0 : index
    %45 = vector.load %arg9[%c0_23, %c0_24, %c0_25] : memref<2x32x64xf32, #tpu.memory_space<vmem>>, vector<1x32x64xf32>
    %46 = vector.shape_cast %45 : vector<1x32x64xf32> to vector<32x64xf32>
    %cst_26 = arith.constant dense<0.000000e+00> : vector<32x32xf32>
    %47 = tpu.matmul %46, %44, %cst_26 {dimension_numbers = #tpu.dot_dimension_numbers<[1], [0], [0], [1], [0, 0, 1, 1], [], []>} : vector<32x64xf32>, vector<64x32xf32>, vector<32x32xf32> -> vector<32x32xf32>
    %c0_27 = arith.constant 0 : index
    %c0_28 = arith.constant 0 : index
    %c0_29 = arith.constant 0 : index
    %48 = vector.load %arg11[%c0_27, %c0_28, %c0_29] : memref<2x32x1xf32, #tpu.memory_space<vmem>>, vector<1x32x1xf32>
    %49 = vector.shape_cast %48 : vector<1x32x1xf32> to vector<32x1xf32>
    %50 = vector.broadcast %49 : vector<32x1xf32> to vector<32x32xf32>
    %51 = arith.addf %47, %50 : vector<32x32xf32>
    %cst_30 = arith.constant 5.000000e-01 : f32
    %52 = vector.broadcast %cst_30 : f32 to vector<32x32xf32>
    %53 = arith.mulf %52, %51 : vector<32x32xf32>
    %cst_31 = arith.constant 4.471500e-02 : f32
    %54 = vector.broadcast %cst_31 : f32 to vector<32x32xf32>
    %55 = arith.mulf %54, %51 : vector<32x32xf32>
    %56 = arith.mulf %55, %51 : vector<32x32xf32>
    %57 = arith.mulf %56, %51 : vector<32x32xf32>
    %58 = arith.addf %51, %57 : vector<32x32xf32>
    %cst_32 = arith.constant 0.797884583 : f32
    %59 = vector.broadcast %cst_32 : f32 to vector<32x32xf32>
    %60 = arith.mulf %59, %58 : vector<32x32xf32>
    %61 = math.tanh %60 : vector<32x32xf32>
    %cst_33 = arith.constant 1.000000e+00 : f32
    %62 = vector.broadcast %cst_33 : f32 to vector<32x32xf32>
    %63 = arith.addf %62, %61 : vector<32x32xf32>
    %64 = arith.mulf %53, %63 : vector<32x32xf32>
    %c0_34 = arith.constant 0 : index
    %c0_35 = arith.constant 0 : index
    %c0_36 = arith.constant 0 : index
    %65 = vector.load %arg10[%c0_34, %c0_35, %c0_36] : memref<2x64x32xf32, #tpu.memory_space<vmem>>, vector<1x64x32xf32>
    %66 = vector.shape_cast %65 : vector<1x64x32xf32> to vector<64x32xf32>
    %cst_37 = arith.constant dense<0.000000e+00> : vector<64x32xf32>
    %67 = tpu.matmul %66, %64, %cst_37 {dimension_numbers = #tpu.dot_dimension_numbers<[1], [0], [0], [1], [0, 0, 1, 1], [], []>} : vector<64x32xf32>, vector<32x32xf32>, vector<64x32xf32> -> vector<64x32xf32>
    %68 = arith.addf %20, %67 : vector<64x32xf32>
    %c0_38 = arith.constant 0 : index
    %c0_39 = arith.constant 0 : index
    %c0_40 = arith.constant 0 : index
    %69 = vector.load %arg12[%c0_38, %c0_39, %c0_40] : memref<2x64x1xf32, #tpu.memory_space<vmem>>, vector<1x64x1xf32>
    %70 = vector.shape_cast %69 : vector<1x64x1xf32> to vector<64x1xf32>
    %71 = vector.broadcast %70 : vector<64x1xf32> to vector<64x32xf32>
    %72 = arith.addf %68, %71 : vector<64x32xf32>
    %c10 = arith.constant 10 : index
    %c0_41 = arith.constant 0 : index
    %73 = vector.load %arg6[%c10, %c0_41] : memref<20x128xf32, #tpu.memory_space<vmem>>, vector<1x32xf32>
    %c11 = arith.constant 11 : index
    %c0_42 = arith.constant 0 : index
    %74 = vector.load %arg6[%c11, %c0_42] : memref<20x128xf32, #tpu.memory_space<vmem>>, vector<1x32xf32>
    %cst_43 = arith.constant dense<0.000000e+00> : vector<64xf32>
    %75 = vector.multi_reduction <add>, %72, %cst_43 [1] : vector<64x32xf32> to vector<64xf32>
    %76 = vector.shape_cast %75 : vector<64xf32> to vector<64x1xf32>
    %cst_44 = arith.constant 3.200000e+01 : f32
    %77 = vector.broadcast %cst_44 : f32 to vector<64x1xf32>
    %78 = arith.divf %76, %77 : vector<64x1xf32>
    %79 = vector.broadcast %78 : vector<64x1xf32> to vector<64x32xf32>
    %80 = arith.subf %72, %79 : vector<64x32xf32>
    %81 = arith.mulf %80, %80 : vector<64x32xf32>
    %cst_45 = arith.constant dense<0.000000e+00> : vector<64xf32>
    %82 = vector.multi_reduction <add>, %81, %cst_45 [1] : vector<64x32xf32> to vector<64xf32>
    %83 = vector.shape_cast %82 : vector<64xf32> to vector<64x1xf32>
    %cst_46 = arith.constant 3.200000e+01 : f32
    %84 = vector.broadcast %cst_46 : f32 to vector<64x1xf32>
    %85 = arith.divf %83, %84 : vector<64x1xf32>
    %86 = vector.broadcast %78 : vector<64x1xf32> to vector<64x32xf32>
    %87 = arith.subf %72, %86 : vector<64x32xf32>
    %cst_47 = arith.constant 9.99999974E-6 : f32
    %88 = vector.broadcast %cst_47 : f32 to vector<64x1xf32>
    %89 = arith.addf %85, %88 : vector<64x1xf32>
    %90 = math.rsqrt %89 : vector<64x1xf32>
    %91 = vector.broadcast %90 : vector<64x1xf32> to vector<64x32xf32>
    %92 = arith.mulf %87, %91 : vector<64x32xf32>
    %93 = vector.broadcast %73 : vector<1x32xf32> to vector<64x32xf32>
    %94 = arith.mulf %92, %93 : vector<64x32xf32>
    %95 = vector.broadcast %74 : vector<1x32xf32> to vector<64x32xf32>
    %96 = arith.addf %94, %95 : vector<64x32xf32>
    %c0_48 = arith.constant 0 : index
    %c0_49 = arith.constant 0 : index
    %c0_50 = arith.constant 0 : index
    %97 = vector.load %arg13[%c0_48, %c0_49, %c0_50] : memref<2x32x128xf32, #tpu.memory_space<vmem>>, vector<1x32x128xf32>
    %98 = vector.shape_cast %97 : vector<1x32x128xf32> to vector<32x128xf32>
    %cst_51 = arith.constant dense<0.000000e+00> : vector<64x128xf32>
    %99 = tpu.matmul %96, %98, %cst_51 {dimension_numbers = #tpu.dot_dimension_numbers<[1], [0], [0], [1], [0, 0, 1, 1], [], []>} : vector<64x32xf32>, vector<32x128xf32>, vector<64x128xf32> -> vector<64x128xf32>
    %c12 = arith.constant 12 : index
    %c0_52 = arith.constant 0 : index
    %100 = vector.load %arg6[%c12, %c0_52] : memref<20x128xf32, #tpu.memory_space<vmem>>, vector<1x128xf32>
    %101 = vector.broadcast %100 : vector<1x128xf32> to vector<64x128xf32>
    %102 = arith.addf %99, %101 : vector<64x128xf32>
    %cst_53 = arith.constant 5.000000e-01 : f32
    %103 = vector.broadcast %cst_53 : f32 to vector<64x128xf32>
    %104 = arith.mulf %103, %102 : vector<64x128xf32>
    %cst_54 = arith.constant 4.471500e-02 : f32
    %105 = vector.broadcast %cst_54 : f32 to vector<64x128xf32>
    %106 = arith.mulf %105, %102 : vector<64x128xf32>
    %107 = arith.mulf %106, %102 : vector<64x128xf32>
    %108 = arith.mulf %107, %102 : vector<64x128xf32>
    %109 = arith.addf %102, %108 : vector<64x128xf32>
    %cst_55 = arith.constant 0.797884583 : f32
    %110 = vector.broadcast %cst_55 : f32 to vector<64x128xf32>
    %111 = arith.mulf %110, %109 : vector<64x128xf32>
    %112 = math.tanh %111 : vector<64x128xf32>
    %cst_56 = arith.constant 1.000000e+00 : f32
    %113 = vector.broadcast %cst_56 : f32 to vector<64x128xf32>
    %114 = arith.addf %113, %112 : vector<64x128xf32>
    %115 = arith.mulf %104, %114 : vector<64x128xf32>
    %c0_57 = arith.constant 0 : index
    %c0_58 = arith.constant 0 : index
    %c0_59 = arith.constant 0 : index
    %116 = vector.load %arg14[%c0_57, %c0_58, %c0_59] : memref<2x128x32xf32, #tpu.memory_space<vmem>>, vector<1x128x32xf32>
    %117 = vector.shape_cast %116 : vector<1x128x32xf32> to vector<128x32xf32>
    %cst_60 = arith.constant dense<0.000000e+00> : vector<64x32xf32>
    %118 = tpu.matmul %115, %117, %cst_60 {dimension_numbers = #tpu.dot_dimension_numbers<[1], [0], [0], [1], [0, 0, 1, 1], [], []>} : vector<64x128xf32>, vector<128x32xf32>, vector<64x32xf32> -> vector<64x32xf32>
    %119 = arith.addf %72, %118 : vector<64x32xf32>
    %c13 = arith.constant 13 : index
    %c0_61 = arith.constant 0 : index
    %120 = vector.load %arg6[%c13, %c0_61] : memref<20x128xf32, #tpu.memory_space<vmem>>, vector<1x32xf32>
    %121 = vector.broadcast %120 : vector<1x32xf32> to vector<64x32xf32>
    %122 = arith.addf %119, %121 : vector<64x32xf32>
    %c14 = arith.constant 14 : index
    %c0_62 = arith.constant 0 : index
    %123 = vector.load %arg6[%c14, %c0_62] : memref<20x128xf32, #tpu.memory_space<vmem>>, vector<1x32xf32>
    %c15 = arith.constant 15 : index
    %c0_63 = arith.constant 0 : index
    %124 = vector.load %arg6[%c15, %c0_63] : memref<20x128xf32, #tpu.memory_space<vmem>>, vector<1x32xf32>
    %cst_64 = arith.constant dense<0.000000e+00> : vector<64xf32>
    %125 = vector.multi_reduction <add>, %122, %cst_64 [1] : vector<64x32xf32> to vector<64xf32>
    %126 = vector.shape_cast %125 : vector<64xf32> to vector<64x1xf32>
    %cst_65 = arith.constant 3.200000e+01 : f32
    %127 = vector.broadcast %cst_65 : f32 to vector<64x1xf32>
    %128 = arith.divf %126, %127 : vector<64x1xf32>
    %129 = vector.broadcast %128 : vector<64x1xf32> to vector<64x32xf32>
    %130 = arith.subf %122, %129 : vector<64x32xf32>
    %131 = arith.mulf %130, %130 : vector<64x32xf32>
    %cst_66 = arith.constant dense<0.000000e+00> : vector<64xf32>
    %132 = vector.multi_reduction <add>, %131, %cst_66 [1] : vector<64x32xf32> to vector<64xf32>
    %133 = vector.shape_cast %132 : vector<64xf32> to vector<64x1xf32>
    %cst_67 = arith.constant 3.200000e+01 : f32
    %134 = vector.broadcast %cst_67 : f32 to vector<64x1xf32>
    %135 = arith.divf %133, %134 : vector<64x1xf32>
    %136 = vector.broadcast %128 : vector<64x1xf32> to vector<64x32xf32>
    %137 = arith.subf %122, %136 : vector<64x32xf32>
    %cst_68 = arith.constant 9.99999974E-6 : f32
    %138 = vector.broadcast %cst_68 : f32 to vector<64x1xf32>
    %139 = arith.addf %135, %138 : vector<64x1xf32>
    %140 = math.rsqrt %139 : vector<64x1xf32>
    %141 = vector.broadcast %140 : vector<64x1xf32> to vector<64x32xf32>
    %142 = arith.mulf %137, %141 : vector<64x32xf32>
    %143 = vector.broadcast %123 : vector<1x32xf32> to vector<64x32xf32>
    %144 = arith.mulf %142, %143 : vector<64x32xf32>
    %145 = vector.broadcast %124 : vector<1x32xf32> to vector<64x32xf32>
    %146 = arith.addf %144, %145 : vector<64x32xf32>
    %c1_69 = arith.constant 1 : index
    %c0_70 = arith.constant 0 : index
    %c0_71 = arith.constant 0 : index
    %147 = vector.load %arg9[%c1_69, %c0_70, %c0_71] : memref<2x32x64xf32, #tpu.memory_space<vmem>>, vector<1x32x64xf32>
    %148 = vector.shape_cast %147 : vector<1x32x64xf32> to vector<32x64xf32>
    %cst_72 = arith.constant dense<0.000000e+00> : vector<32x32xf32>
    %149 = tpu.matmul %148, %146, %cst_72 {dimension_numbers = #tpu.dot_dimension_numbers<[1], [0], [0], [1], [0, 0, 1, 1], [], []>} : vector<32x64xf32>, vector<64x32xf32>, vector<32x32xf32> -> vector<32x32xf32>
    %c1_73 = arith.constant 1 : index
    %c0_74 = arith.constant 0 : index
    %c0_75 = arith.constant 0 : index
    %150 = vector.load %arg11[%c1_73, %c0_74, %c0_75] : memref<2x32x1xf32, #tpu.memory_space<vmem>>, vector<1x32x1xf32>
    %151 = vector.shape_cast %150 : vector<1x32x1xf32> to vector<32x1xf32>
    %152 = vector.broadcast %151 : vector<32x1xf32> to vector<32x32xf32>
    %153 = arith.addf %149, %152 : vector<32x32xf32>
    %cst_76 = arith.constant 5.000000e-01 : f32
    %154 = vector.broadcast %cst_76 : f32 to vector<32x32xf32>
    %155 = arith.mulf %154, %153 : vector<32x32xf32>
    %cst_77 = arith.constant 4.471500e-02 : f32
    %156 = vector.broadcast %cst_77 : f32 to vector<32x32xf32>
    %157 = arith.mulf %156, %153 : vector<32x32xf32>
    %158 = arith.mulf %157, %153 : vector<32x32xf32>
    %159 = arith.mulf %158, %153 : vector<32x32xf32>
    %160 = arith.addf %153, %159 : vector<32x32xf32>
    %cst_78 = arith.constant 0.797884583 : f32
    %161 = vector.broadcast %cst_78 : f32 to vector<32x32xf32>
    %162 = arith.mulf %161, %160 : vector<32x32xf32>
    %163 = math.tanh %162 : vector<32x32xf32>
    %cst_79 = arith.constant 1.000000e+00 : f32
    %164 = vector.broadcast %cst_79 : f32 to vector<32x32xf32>
    %165 = arith.addf %164, %163 : vector<32x32xf32>
    %166 = arith.mulf %155, %165 : vector<32x32xf32>
    %c1_80 = arith.constant 1 : index
    %c0_81 = arith.constant 0 : index
    %c0_82 = arith.constant 0 : index
    %167 = vector.load %arg10[%c1_80, %c0_81, %c0_82] : memref<2x64x32xf32, #tpu.memory_space<vmem>>, vector<1x64x32xf32>
    %168 = vector.shape_cast %167 : vector<1x64x32xf32> to vector<64x32xf32>
    %cst_83 = arith.constant dense<0.000000e+00> : vector<64x32xf32>
    %169 = tpu.matmul %168, %166, %cst_83 {dimension_numbers = #tpu.dot_dimension_numbers<[1], [0], [0], [1], [0, 0, 1, 1], [], []>} : vector<64x32xf32>, vector<32x32xf32>, vector<64x32xf32> -> vector<64x32xf32>
    %170 = arith.addf %122, %169 : vector<64x32xf32>
    %c1_84 = arith.constant 1 : index
    %c0_85 = arith.constant 0 : index
    %c0_86 = arith.constant 0 : index
    %171 = vector.load %arg12[%c1_84, %c0_85, %c0_86] : memref<2x64x1xf32, #tpu.memory_space<vmem>>, vector<1x64x1xf32>
    %172 = vector.shape_cast %171 : vector<1x64x1xf32> to vector<64x1xf32>
    %173 = vector.broadcast %172 : vector<64x1xf32> to vector<64x32xf32>
    %174 = arith.addf %170, %173 : vector<64x32xf32>
    %c16 = arith.constant 16 : index
    %c0_87 = arith.constant 0 : index
    %175 = vector.load %arg6[%c16, %c0_87] : memref<20x128xf32, #tpu.memory_space<vmem>>, vector<1x32xf32>
    %c17 = arith.constant 17 : index
    %c0_88 = arith.constant 0 : index
    %176 = vector.load %arg6[%c17, %c0_88] : memref<20x128xf32, #tpu.memory_space<vmem>>, vector<1x32xf32>
    %cst_89 = arith.constant dense<0.000000e+00> : vector<64xf32>
    %177 = vector.multi_reduction <add>, %174, %cst_89 [1] : vector<64x32xf32> to vector<64xf32>
    %178 = vector.shape_cast %177 : vector<64xf32> to vector<64x1xf32>
    %cst_90 = arith.constant 3.200000e+01 : f32
    %179 = vector.broadcast %cst_90 : f32 to vector<64x1xf32>
    %180 = arith.divf %178, %179 : vector<64x1xf32>
    %181 = vector.broadcast %180 : vector<64x1xf32> to vector<64x32xf32>
    %182 = arith.subf %174, %181 : vector<64x32xf32>
    %183 = arith.mulf %182, %182 : vector<64x32xf32>
    %cst_91 = arith.constant dense<0.000000e+00> : vector<64xf32>
    %184 = vector.multi_reduction <add>, %183, %cst_91 [1] : vector<64x32xf32> to vector<64xf32>
    %185 = vector.shape_cast %184 : vector<64xf32> to vector<64x1xf32>
    %cst_92 = arith.constant 3.200000e+01 : f32
    %186 = vector.broadcast %cst_92 : f32 to vector<64x1xf32>
    %187 = arith.divf %185, %186 : vector<64x1xf32>
    %188 = vector.broadcast %180 : vector<64x1xf32> to vector<64x32xf32>
    %189 = arith.subf %174, %188 : vector<64x32xf32>
    %cst_93 = arith.constant 9.99999974E-6 : f32
    %190 = vector.broadcast %cst_93 : f32 to vector<64x1xf32>
    %191 = arith.addf %187, %190 : vector<64x1xf32>
    %192 = math.rsqrt %191 : vector<64x1xf32>
    %193 = vector.broadcast %192 : vector<64x1xf32> to vector<64x32xf32>
    %194 = arith.mulf %189, %193 : vector<64x32xf32>
    %195 = vector.broadcast %175 : vector<1x32xf32> to vector<64x32xf32>
    %196 = arith.mulf %194, %195 : vector<64x32xf32>
    %197 = vector.broadcast %176 : vector<1x32xf32> to vector<64x32xf32>
    %198 = arith.addf %196, %197 : vector<64x32xf32>
    %c1_94 = arith.constant 1 : index
    %c0_95 = arith.constant 0 : index
    %c0_96 = arith.constant 0 : index
    %199 = vector.load %arg13[%c1_94, %c0_95, %c0_96] : memref<2x32x128xf32, #tpu.memory_space<vmem>>, vector<1x32x128xf32>
    %200 = vector.shape_cast %199 : vector<1x32x128xf32> to vector<32x128xf32>
    %cst_97 = arith.constant dense<0.000000e+00> : vector<64x128xf32>
    %201 = tpu.matmul %198, %200, %cst_97 {dimension_numbers = #tpu.dot_dimension_numbers<[1], [0], [0], [1], [0, 0, 1, 1], [], []>} : vector<64x32xf32>, vector<32x128xf32>, vector<64x128xf32> -> vector<64x128xf32>
    %c18 = arith.constant 18 : index
    %c0_98 = arith.constant 0 : index
    %202 = vector.load %arg6[%c18, %c0_98] : memref<20x128xf32, #tpu.memory_space<vmem>>, vector<1x128xf32>
    %203 = vector.broadcast %202 : vector<1x128xf32> to vector<64x128xf32>
    %204 = arith.addf %201, %203 : vector<64x128xf32>
    %cst_99 = arith.constant 5.000000e-01 : f32
    %205 = vector.broadcast %cst_99 : f32 to vector<64x128xf32>
    %206 = arith.mulf %205, %204 : vector<64x128xf32>
    %cst_100 = arith.constant 4.471500e-02 : f32
    %207 = vector.broadcast %cst_100 : f32 to vector<64x128xf32>
    %208 = arith.mulf %207, %204 : vector<64x128xf32>
    %209 = arith.mulf %208, %204 : vector<64x128xf32>
    %210 = arith.mulf %209, %204 : vector<64x128xf32>
    %211 = arith.addf %204, %210 : vector<64x128xf32>
    %cst_101 = arith.constant 0.797884583 : f32
    %212 = vector.broadcast %cst_101 : f32 to vector<64x128xf32>
    %213 = arith.mulf %212, %211 : vector<64x128xf32>
    %214 = math.tanh %213 : vector<64x128xf32>
    %cst_102 = arith.constant 1.000000e+00 : f32
    %215 = vector.broadcast %cst_102 : f32 to vector<64x128xf32>
    %216 = arith.addf %215, %214 : vector<64x128xf32>
    %217 = arith.mulf %206, %216 : vector<64x128xf32>
    %c1_103 = arith.constant 1 : index
    %c0_104 = arith.constant 0 : index
    %c0_105 = arith.constant 0 : index
    %218 = vector.load %arg14[%c1_103, %c0_104, %c0_105] : memref<2x128x32xf32, #tpu.memory_space<vmem>>, vector<1x128x32xf32>
    %219 = vector.shape_cast %218 : vector<1x128x32xf32> to vector<128x32xf32>
    %cst_106 = arith.constant dense<0.000000e+00> : vector<64x32xf32>
    %220 = tpu.matmul %217, %219, %cst_106 {dimension_numbers = #tpu.dot_dimension_numbers<[1], [0], [0], [1], [0, 0, 1, 1], [], []>} : vector<64x128xf32>, vector<128x32xf32>, vector<64x32xf32> -> vector<64x32xf32>
    %221 = arith.addf %174, %220 : vector<64x32xf32>
    %c19 = arith.constant 19 : index
    %c0_107 = arith.constant 0 : index
    %222 = vector.load %arg6[%c19, %c0_107] : memref<20x128xf32, #tpu.memory_space<vmem>>, vector<1x32xf32>
    %223 = vector.broadcast %222 : vector<1x32xf32> to vector<64x32xf32>
    %224 = arith.addf %221, %223 : vector<64x32xf32>
    %c2 = arith.constant 2 : index
    %c0_108 = arith.constant 0 : index
    %225 = vector.load %arg6[%c2, %c0_108] : memref<20x128xf32, #tpu.memory_space<vmem>>, vector<1x32xf32>
    %c3 = arith.constant 3 : index
    %c0_109 = arith.constant 0 : index
    %226 = vector.load %arg6[%c3, %c0_109] : memref<20x128xf32, #tpu.memory_space<vmem>>, vector<1x32xf32>
    %cst_110 = arith.constant dense<0.000000e+00> : vector<64xf32>
    %227 = vector.multi_reduction <add>, %224, %cst_110 [1] : vector<64x32xf32> to vector<64xf32>
    %228 = vector.shape_cast %227 : vector<64xf32> to vector<64x1xf32>
    %cst_111 = arith.constant 3.200000e+01 : f32
    %229 = vector.broadcast %cst_111 : f32 to vector<64x1xf32>
    %230 = arith.divf %228, %229 : vector<64x1xf32>
    %231 = vector.broadcast %230 : vector<64x1xf32> to vector<64x32xf32>
    %232 = arith.subf %224, %231 : vector<64x32xf32>
    %233 = arith.mulf %232, %232 : vector<64x32xf32>
    %cst_112 = arith.constant dense<0.000000e+00> : vector<64xf32>
    %234 = vector.multi_reduction <add>, %233, %cst_112 [1] : vector<64x32xf32> to vector<64xf32>
    %235 = vector.shape_cast %234 : vector<64xf32> to vector<64x1xf32>
    %cst_113 = arith.constant 3.200000e+01 : f32
    %236 = vector.broadcast %cst_113 : f32 to vector<64x1xf32>
    %237 = arith.divf %235, %236 : vector<64x1xf32>
    %238 = vector.broadcast %230 : vector<64x1xf32> to vector<64x32xf32>
    %239 = arith.subf %224, %238 : vector<64x32xf32>
    %cst_114 = arith.constant 9.99999974E-6 : f32
    %240 = vector.broadcast %cst_114 : f32 to vector<64x1xf32>
    %241 = arith.addf %237, %240 : vector<64x1xf32>
    %242 = math.rsqrt %241 : vector<64x1xf32>
    %243 = vector.broadcast %242 : vector<64x1xf32> to vector<64x32xf32>
    %244 = arith.mulf %239, %243 : vector<64x32xf32>
    %245 = vector.broadcast %225 : vector<1x32xf32> to vector<64x32xf32>
    %246 = arith.mulf %244, %245 : vector<64x32xf32>
    %247 = vector.broadcast %226 : vector<1x32xf32> to vector<64x32xf32>
    %248 = arith.addf %246, %247 : vector<64x32xf32>
    %c0_115 = arith.constant 0 : index
    %c0_116 = arith.constant 0 : index
    %249 = vector.load %arg17[%c0_115, %c0_116] : memref<8x64xf32, #tpu.memory_space<vmem>>, vector<8x64xf32>
    %cst_117 = arith.constant dense<0.000000e+00> : vector<8x32xf32>
    %250 = tpu.matmul %249, %248, %cst_117 {dimension_numbers = #tpu.dot_dimension_numbers<[1], [0], [0], [1], [0, 0, 1, 1], [], []>} : vector<8x64xf32>, vector<64x32xf32>, vector<8x32xf32> -> vector<8x32xf32>
    %c0_118 = arith.constant 0 : index
    %c0_119 = arith.constant 0 : index
    %251 = vector.load %arg15[%c0_118, %c0_119] : memref<32x32xf32, #tpu.memory_space<vmem>>, vector<32x32xf32>
    %cst_120 = arith.constant dense<0.000000e+00> : vector<8x32xf32>
    %252 = tpu.matmul %250, %251, %cst_120 {dimension_numbers = #tpu.dot_dimension_numbers<[1], [0], [0], [1], [0, 0, 1, 1], [], []>} : vector<8x32xf32>, vector<32x32xf32>, vector<8x32xf32> -> vector<8x32xf32>
    %c4 = arith.constant 4 : index
    %c0_121 = arith.constant 0 : index
    %253 = vector.load %arg6[%c4, %c0_121] : memref<20x128xf32, #tpu.memory_space<vmem>>, vector<1x32xf32>
    %254 = vector.broadcast %253 : vector<1x32xf32> to vector<8x32xf32>
    %255 = arith.addf %252, %254 : vector<8x32xf32>
    %c0_122 = arith.constant 0 : index
    %c0_123 = arith.constant 0 : index
    %256 = vector.load %arg16[%c0_122, %c0_123] : memref<48x64xf32, #tpu.memory_space<vmem>>, vector<32x64xf32>
    %cst_124 = arith.constant dense<0.000000e+00> : vector<8x64xf32>
    %257 = tpu.matmul %255, %256, %cst_124 {dimension_numbers = #tpu.dot_dimension_numbers<[1], [0], [0], [1], [0, 0, 1, 1], [], []>} : vector<8x32xf32>, vector<32x64xf32>, vector<8x64xf32> -> vector<8x64xf32>
    %c0_125 = arith.constant 0 : index
    %c0_126 = arith.constant 0 : index
    %c0_127 = arith.constant 0 : index
    %258 = vector.load %arg4[%c0_125, %c0_126, %c0_127] : memref<1x8x16xf32, #tpu.memory_space<vmem>>, vector<1x8x16xf32>
    %259 = vector.shape_cast %258 : vector<1x8x16xf32> to vector<8x16xf32>
    %c32 = arith.constant 32 : index
    %c0_128 = arith.constant 0 : index
    %260 = vector.load %arg16[%c32, %c0_128] : memref<48x64xf32, #tpu.memory_space<vmem>>, vector<16x64xf32>
    %cst_129 = arith.constant dense<0.000000e+00> : vector<8x64xf32>
    %261 = tpu.matmul %259, %260, %cst_129 {dimension_numbers = #tpu.dot_dimension_numbers<[1], [0], [0], [1], [0, 0, 1, 1], [], []>} : vector<8x16xf32>, vector<16x64xf32>, vector<8x64xf32> -> vector<8x64xf32>
    %262 = arith.addf %257, %261 : vector<8x64xf32>
    %c5 = arith.constant 5 : index
    %c0_130 = arith.constant 0 : index
    %263 = vector.load %arg6[%c5, %c0_130] : memref<20x128xf32, #tpu.memory_space<vmem>>, vector<1x64xf32>
    %264 = vector.broadcast %263 : vector<1x64xf32> to vector<8x64xf32>
    %265 = arith.addf %262, %264 : vector<8x64xf32>
    %266 = vector.extract_strided_slice %265 {offsets = [0, 0], sizes = [8, 32], strides = [1, 1]} : vector<8x64xf32> to vector<8x32xf32>
    %267 = vector.extract_strided_slice %265 {offsets = [0, 32], sizes = [8, 32], strides = [1, 1]} : vector<8x64xf32> to vector<8x32xf32>
    %c0_131 = arith.constant 0 : index
    %c0_132 = arith.constant 0 : index
    %268 = vector.load %arg18[%c0_131, %c0_132] : memref<32x8xf32, #tpu.memory_space<vmem>>, vector<32x8xf32>
    %cst_133 = arith.constant dense<0.000000e+00> : vector<32x32xf32>
    %269 = tpu.matmul %268, %266, %cst_133 {dimension_numbers = #tpu.dot_dimension_numbers<[1], [0], [0], [1], [0, 0, 1, 1], [], []>} : vector<32x8xf32>, vector<8x32xf32>, vector<32x32xf32> -> vector<32x32xf32>
    %c0_134 = arith.constant 0 : index
    %c0_135 = arith.constant 0 : index
    %270 = vector.load %arg19[%c0_134, %c0_135] : memref<32x8xf32, #tpu.memory_space<vmem>>, vector<32x8xf32>
    %cst_136 = arith.constant dense<0.000000e+00> : vector<32x32xf32>
    %271 = tpu.matmul %270, %267, %cst_136 {dimension_numbers = #tpu.dot_dimension_numbers<[1], [0], [0], [1], [0, 0, 1, 1], [], []>} : vector<32x8xf32>, vector<8x32xf32>, vector<32x32xf32> -> vector<32x32xf32>
    %272 = arith.addf %269, %271 : vector<32x32xf32>
    %cst_137 = arith.constant 0.000000e+00 : f32
    %273 = vector.broadcast %cst_137 : f32 to vector<32x32xf32>
    %274 = arith.maximumf %272, %273 : vector<32x32xf32>
    %c6 = arith.constant 6 : index
    %c0_138 = arith.constant 0 : index
    %275 = vector.load %arg6[%c6, %c0_138] : memref<20x128xf32, #tpu.memory_space<vmem>>, vector<1x32xf32>
    %276 = vector.broadcast %275 : vector<1x32xf32> to vector<32x32xf32>
    %277 = arith.mulf %274, %276 : vector<32x32xf32>
    %cst_139 = arith.constant dense<0.000000e+00> : vector<32xf32>
    %278 = vector.multi_reduction <add>, %277, %cst_139 [1] : vector<32x32xf32> to vector<32xf32>
    %279 = vector.shape_cast %278 : vector<32xf32> to vector<32x1xf32>
    %c7 = arith.constant 7 : index
    %c0_140 = arith.constant 0 : index
    %280 = vector.load %arg6[%c7, %c0_140] : memref<20x128xf32, #tpu.memory_space<vmem>>, vector<1x1xf32>
    %281 = vector.broadcast %280 : vector<1x1xf32> to vector<32x1xf32>
    %282 = arith.addf %279, %281 : vector<32x1xf32>
    %cst_141 = arith.constant 0.000000e+00 : f32
    %283 = vector.broadcast %cst_141 : f32 to vector<32x1xf32>
    %284 = arith.subf %283, %282 : vector<32x1xf32>
    %285 = math.exp %284 : vector<32x1xf32>
    %cst_142 = arith.constant 1.000000e+00 : f32
    %286 = vector.broadcast %cst_142 : f32 to vector<32x1xf32>
    %287 = arith.addf %286, %285 : vector<32x1xf32>
    %cst_143 = arith.constant 1.000000e+00 : f32
    %288 = vector.broadcast %cst_143 : f32 to vector<32x1xf32>
    %289 = arith.divf %288, %287 : vector<32x1xf32>
    %c0_144 = arith.constant 0 : index
    %c0_145 = arith.constant 0 : index
    %c0_146 = arith.constant 0 : index
    %290 = vector.load %arg5[%c0_144, %c0_145, %c0_146] : memref<1x32x1xf32, #tpu.memory_space<vmem>>, vector<1x32x1xf32>
    %291 = vector.shape_cast %290 : vector<1x32x1xf32> to vector<32x1xf32>
    %292 = math.log %291 : vector<32x1xf32>
    %cst_147 = arith.constant 1.000000e+00 : f32
    %293 = vector.broadcast %cst_147 : f32 to vector<32x1xf32>
    %294 = arith.subf %293, %291 : vector<32x1xf32>
    %295 = math.log %294 : vector<32x1xf32>
    %296 = arith.subf %292, %295 : vector<32x1xf32>
    %297 = arith.addf %289, %296 : vector<32x1xf32>
    %cst_148 = arith.constant 1.000000e+00 : f32
    %298 = vector.broadcast %cst_148 : f32 to vector<32x1xf32>
    %299 = arith.mulf %297, %298 : vector<32x1xf32>
    %cst_149 = arith.constant 0.000000e+00 : f32
    %300 = vector.broadcast %cst_149 : f32 to vector<32x1xf32>
    %301 = arith.subf %300, %299 : vector<32x1xf32>
    %302 = math.exp %301 : vector<32x1xf32>
    %cst_150 = arith.constant 1.000000e+00 : f32
    %303 = vector.broadcast %cst_150 : f32 to vector<32x1xf32>
    %304 = arith.addf %303, %302 : vector<32x1xf32>
    %cst_151 = arith.constant 1.000000e+00 : f32
    %305 = vector.broadcast %cst_151 : f32 to vector<32x1xf32>
    %306 = arith.divf %305, %304 : vector<32x1xf32>
    %cst_152 = arith.constant 5.000000e-01 : f32
    %307 = vector.broadcast %cst_152 : f32 to vector<32x1xf32>
    %308 = arith.cmpf ogt, %306, %307 : vector<32x1xf32>
    %cst_153 = arith.constant 1.000000e+00 : f32
    %cst_154 = arith.constant 0.000000e+00 : f32
    %309 = vector.broadcast %cst_153 : f32 to vector<32x1xf32>
    %310 = vector.broadcast %cst_154 : f32 to vector<32x1xf32>
    %311 = arith.select %308, %309, %310 : vector<32x1xi1>, vector<32x1xf32>
    %c0_155 = arith.constant 0 : index
    %c0_156 = arith.constant 0 : index
    %312 = vector.load %arg20[%c0_155, %c0_156] : memref<32x1xf32, #tpu.memory_space<vmem>>, vector<32x1xf32>
    %313 = arith.mulf %311, %312 : vector<32x1xf32>
    %c0_157 = arith.constant 0 : index
    %c0_158 = arith.constant 0 : index
    %c0_159 = arith.constant 0 : index
    %314 = vector.load %arg21[%c0_157, %c0_158, %c0_159] : memref<1x32x1xf32, #tpu.memory_space<vmem>>, vector<1x32x1xf32>
    %315 = vector.shape_cast %314 : vector<1x32x1xf32> to vector<32x1xf32>
    %316 = vector.shape_cast %313 : vector<32x1xf32> to vector<1x32x1xf32>
    tpu.vector_store %arg21[%c0_157, %c0_158, %c0_159], %316 {strides = array<i32>} : memref<1x32x1xf32, #tpu.memory_space<vmem>>, vector<1x32x1xf32>,
    return
  }
  func.func @transform_0(%arg0: i32) -> (i32, i32, i32) {
    %c0_i32 = arith.constant 0 : i32
    %c0_i32_0 = arith.constant 0 : i32
    %c0_i32_1 = arith.constant 0 : i32
    return %arg0, %c0_i32, %c0_i32_0 : i32, i32, i32
  }
  func.func @transform_1(%arg0: i32) -> (i32, i32, i32) {
    %c0_i32 = arith.constant 0 : i32
    %c0_i32_0 = arith.constant 0 : i32
    %c0_i32_1 = arith.constant 0 : i32
    return %arg0, %c0_i32, %c0_i32_0 : i32, i32, i32
  }
  func.func @transform_2(%arg0: i32) -> (i32, i32, i32) {
    %c0_i32 = arith.constant 0 : i32
    %c0_i32_0 = arith.constant 0 : i32
    %c0_i32_1 = arith.constant 0 : i32
    return %arg0, %c0_i32, %c0_i32_0 : i32, i32, i32
  }
  func.func @transform_3(%arg0: i32) -> (i32, i32, i32) {
    %c0_i32 = arith.constant 0 : i32
    %c0_i32_0 = arith.constant 0 : i32
    %c0_i32_1 = arith.constant 0 : i32
    return %arg0, %c0_i32, %c0_i32_0 : i32, i32, i32
  }
  func.func @transform_4(%arg0: i32) -> (i32, i32, i32) {
    %c0_i32 = arith.constant 0 : i32
    %c0_i32_0 = arith.constant 0 : i32
    %c0_i32_1 = arith.constant 0 : i32
    return %arg0, %c0_i32, %c0_i32_0 : i32, i32, i32
  }
  func.func @transform_5(%arg0: i32) -> (i32, i32) {
    %c0_i32 = arith.constant 0 : i32
    %c0_i32_0 = arith.constant 0 : i32
    %c0_i32_1 = arith.constant 0 : i32
    return %c0_i32, %c0_i32_0 : i32, i32
  }
  func.func @transform_6(%arg0: i32) -> (i32, i32) {
    %c0_i32 = arith.constant 0 : i32
    %c0_i32_0 = arith.constant 0 : i32
    %c0_i32_1 = arith.constant 0 : i32
    return %c0_i32, %c0_i32_0 : i32, i32
  }
  func.func @transform_7(%arg0: i32) -> (i32, i32) {
    %c0_i32 = arith.constant 0 : i32
    %c0_i32_0 = arith.constant 0 : i32
    %c0_i32_1 = arith.constant 0 : i32
    return %c0_i32, %c0_i32_0 : i32, i32
  }
  func.func @transform_8(%arg0: i32) -> (i32, i32, i32) {
    %c0_i32 = arith.constant 0 : i32
    %c0_i32_0 = arith.constant 0 : i32
    %c0_i32_1 = arith.constant 0 : i32
    %c0_i32_2 = arith.constant 0 : i32
    return %c0_i32, %c0_i32_0, %c0_i32_1 : i32, i32, i32
  }
  func.func @transform_9(%arg0: i32) -> (i32, i32, i32) {
    %c0_i32 = arith.constant 0 : i32
    %c0_i32_0 = arith.constant 0 : i32
    %c0_i32_1 = arith.constant 0 : i32
    %c0_i32_2 = arith.constant 0 : i32
    return %c0_i32, %c0_i32_0, %c0_i32_1 : i32, i32, i32
  }
  func.func @transform_10(%arg0: i32) -> (i32, i32, i32) {
    %c0_i32 = arith.constant 0 : i32
    %c0_i32_0 = arith.constant 0 : i32
    %c0_i32_1 = arith.constant 0 : i32
    %c0_i32_2 = arith.constant 0 : i32
    return %c0_i32, %c0_i32_0, %c0_i32_1 : i32, i32, i32
  }
  func.func @transform_11(%arg0: i32) -> (i32, i32, i32) {
    %c0_i32 = arith.constant 0 : i32
    %c0_i32_0 = arith.constant 0 : i32
    %c0_i32_1 = arith.constant 0 : i32
    %c0_i32_2 = arith.constant 0 : i32
    return %c0_i32, %c0_i32_0, %c0_i32_1 : i32, i32, i32
  }
  func.func @transform_12(%arg0: i32) -> (i32, i32, i32) {
    %c0_i32 = arith.constant 0 : i32
    %c0_i32_0 = arith.constant 0 : i32
    %c0_i32_1 = arith.constant 0 : i32
    %c0_i32_2 = arith.constant 0 : i32
    return %c0_i32, %c0_i32_0, %c0_i32_1 : i32, i32, i32
  }
  func.func @transform_13(%arg0: i32) -> (i32, i32, i32) {
    %c0_i32 = arith.constant 0 : i32
    %c0_i32_0 = arith.constant 0 : i32
    %c0_i32_1 = arith.constant 0 : i32
    %c0_i32_2 = arith.constant 0 : i32
    return %c0_i32, %c0_i32_0, %c0_i32_1 : i32, i32, i32
  }
  func.func @transform_14(%arg0: i32) -> (i32, i32) {
    %c0_i32 = arith.constant 0 : i32
    %c0_i32_0 = arith.constant 0 : i32
    %c0_i32_1 = arith.constant 0 : i32
    return %c0_i32, %c0_i32_0 : i32, i32
  }
  func.func @transform_15(%arg0: i32) -> (i32, i32) {
    %c0_i32 = arith.constant 0 : i32
    %c0_i32_0 = arith.constant 0 : i32
    %c0_i32_1 = arith.constant 0 : i32
    return %c0_i32, %c0_i32_0 : i32, i32
  }
  func.func @transform_16(%arg0: i32) -> (i32, i32) {
    %c0_i32 = arith.constant 0 : i32
    %c0_i32_0 = arith.constant 0 : i32
    %c0_i32_1 = arith.constant 0 : i32
    return %c0_i32, %c0_i32_0 : i32, i32
  }
  func.func @transform_17(%arg0: i32) -> (i32, i32) {
    %c0_i32 = arith.constant 0 : i32
    %c0_i32_0 = arith.constant 0 : i32
    %c0_i32_1 = arith.constant 0 : i32
    return %c0_i32, %c0_i32_0 : i32, i32
  }
  func.func @transform_18(%arg0: i32) -> (i32, i32) {
    %c0_i32 = arith.constant 0 : i32
    %c0_i32_0 = arith.constant 0 : i32
    %c0_i32_1 = arith.constant 0 : i32
    return %c0_i32, %c0_i32_0 : i32, i32
  }
  func.func @transform_19(%arg0: i32) -> (i32, i32) {
    %c0_i32 = arith.constant 0 : i32
    %c0_i32_0 = arith.constant 0 : i32
    %c0_i32_1 = arith.constant 0 : i32
    return %c0_i32, %c0_i32_0 : i32, i32
  }
  func.func @transform_20(%arg0: i32) -> (i32, i32, i32) {
    %c0_i32 = arith.constant 0 : i32
    %c0_i32_0 = arith.constant 0 : i32
    %c0_i32_1 = arith.constant 0 : i32
    return %arg0, %c0_i32, %c0_i32_0 : i32, i32, i32
  }
}

</mosaic_0001>

<bundles_post_ra>
// kernel: mixer_per_node_forward_batched.1
= control target key start
LH: loop header
LB: loop body
LE: loop exit
PB: predicated region body
PF: predicated region fallthrough
CT: control target
= control target key end

     0   :  { %v5104_v0 = vmov 0   ;;  %s7392_s1 = inlined_call_operand.vmem [shape: f32[1,64,1], index: 1, kind: input, shape index: {}]   ;;  %s7393_s2 = inlined_call_operand.vmem [shape: f32[1,64,1], index: 2, kind: input, shape index: {}]   ;;  %s7394_s5 = inlined_call_operand.vmem [shape: f32[20,128], index: 5, kind: input, shape index: {}]   ;;  %s7395_s7 = inlined_call_operand.vmem [shape: f32[16,32], index: 7, kind: input, shape index: {}]   ;;  %s7396_s6 = inlined_call_operand.vmem [shape: f32[8,32], index: 6, kind: input, shape index: {}]   ;;  %s7397_s0 = inlined_call_operand.vmem [shape: f32[1,64,8], index: 0, kind: input, shape index: {}]   ;;  %s7398_s10 = inlined_call_operand.vmem [shape: f32[2,32,1], index: 10, kind: input, shape index: {}]   ;;  %s7399_s11 = inlined_call_operand.vmem [shape: f32[2,64,1], index: 11, kind: input, shape index: {}]   ;;  %s7400_s8 = inlined_call_operand.vmem [shape: f32[2,32,64], index: 8, kind: input, shape index: {}]   ;;  %s7401_s9 = inlined_call_operand.vmem [shape: f32[2,64,32], index: 9, kind: input, shape index: {}]   ;;  %s7402_s12 = inlined_call_operand.vmem [shape: f32[2,32,128], index: 12, kind: input, shape index: {}]   ;;  %s7403_s13 = inlined_call_operand.vmem [shape: f32[2,128,32], index: 13, kind: input, shape index: {}]   ;;  %s7404_s14 = inlined_call_operand.vmem [shape: f32[32,32], index: 14, kind: input, shape index: {}]   ;;  %s7405_s16 = inlined_call_operand.vmem [shape: f32[8,64], index: 16, kind: input, shape index: {}]   ;;  %s7406_s15 = inlined_call_operand.vmem [shape: f32[48,64], index: 15, kind: input, shape index: {}]   ;;  %s7407_s3 = inlined_call_operand.vmem [shape: f32[1,8,16], index: 3, kind: input, shape index: {}]   ;;  %s7408_s18 = inlined_call_operand.vmem [shape: f32[32,8], index: 18, kind: input, shape index: {}]   ;;  %s7409_s17 = inlined_call_operand.vmem [shape: f32[32,8], index: 17, kind: input, shape index: {}]   ;;  %s7410_s4 = inlined_call_operand.vmem [shape: f32[1,32,1], index: 4, kind: input, shape index: {}]   ;;  %s7411_s19 = inlined_call_operand.vmem [shape: f32[32,1], index: 19, kind: input, shape index: {}]   ;;  %s7412_s20 = inlined_call_operand.vmem [shape: f32[1,32,1], index: 20, kind: output, shape index: {}]  }
   0x1   :  { %7451 = sst [smem:[#allocation12_spill]] %s7392_s1  ;;  %4895 = vset.pattern.permute.xlu1 %v5104_v0  ;;  %4894 = vset.pattern.permute.xlu0 %v5104_v0  ;;  %v7424_v0 = vmov 2102212464  }
   0x2   :  { %7452 = sst [smem:[#allocation13_spill]] %s7393_s2  ;;  %s7456_s23 = sld [smem:[#allocation12_spill]] }
   0x3   :  { %7453 = sst [smem:[#allocation14_spill]] %s7394_s5  ;;  %s7457_s25 = sld [smem:[#allocation13_spill]] }
   0x4   :  { %7454 = sst [smem:[#allocation15_spill]] %s7395_s7  ;;  %s7458_s27 = sld [smem:[#allocation14_spill]] }
   0x5   :  { %7455 = sst [smem:[#allocation16_spill]] %s7396_s6  ;;  %s7481_s6 = sld [smem:[#allocation15_spill]] }
   0x6   :  { %s7483_s21 = sld [smem:[#allocation16_spill]] }
   0x8   :  { %v67_v1 = vld [vmem:[%s7456_s23 + $0x10] sm:$0xff]  ;;  %v65_v2 = vld [vmem:[%s7456_s23] sm:$0xff]  ;;  %v68_v3 = vld [vmem:[%s7456_s23 + $0x18] sm:$0xff] }
   0x9   :  { %86 = vperm.xlu1 %4895, %v67_v1   ;;  %76 = vperm.xlu0 %4894, %v65_v2   ;;  %v66_v4 = vld [vmem:[%s7456_s23 + $0x8] sm:$0xff]  ;;  %v69_v6 = vld [vmem:[%s7456_s23 + $0x20] sm:$0xff]  ;;  %v72_v7 = vld [vmem:[%s7456_s23 + $0x38] sm:$0xff]  ;;  %v7421_v2 = vmov 920167782  }
   0xa   :  { %v70_v5 = vld [vmem:[%s7456_s23 + $0x28] sm:$0xff]  ;;  %v71_v8 = vld [vmem:[%s7456_s23 + $0x30] sm:$0xff]  ;;  %v950_v10 = vld [vmem:[%s7457_s25] sm:$0xff] }
   0xb   :  { %v951_v9 = vld [vmem:[%s7457_s25 + $0x8] sm:$0xff]  ;;  %v953_v11 = vld [vmem:[%s7457_s25 + $0x18] sm:$0xff]  ;;  %v952_v12 = vld [vmem:[%s7457_s25 + $0x10] sm:$0xff] }
   0xc   :  { %v955_v13 = vld [vmem:[%s7457_s25 + $0x28] sm:$0xff]  ;;  %v954_v14 = vld [vmem:[%s7457_s25 + $0x20] sm:$0xff]  ;;  %v957_v15 = vld [vmem:[%s7457_s25 + $0x38] sm:$0xff] }
   0xd   :  { %91 = vperm.xlu1 %4895, %v68_v3   ;;  %81 = vperm.xlu0 %4894, %v66_v4   ;;  %v956_v16 = vld [vmem:[%s7457_s25 + $0x30] sm:$0xff]  ;;  %v5271_v18 = vld [vmem:[%s7458_s27] ss:$0 sm:$0xff] }
  0x11   :  { %101 = vperm.xlu1 %4895, %v70_v5   ;;  %96 = vperm.xlu0 %4894, %v69_v6   ;;  %v7419_v5 = vmov 1326507024  }
  0x15   :  { %111 = vperm.xlu1 %4895, %v72_v7   ;;  %106 = vperm.xlu0 %4894, %v71_v8  }
  0x19   :  { %965 = vperm.xlu1 %4895, %v951_v9   ;;  %960 = vperm.xlu0 %4894, %v950_v10  }
  0x1d   :  { %975 = vperm.xlu1 %4895, %v953_v11   ;;  %970 = vperm.xlu0 %4894, %v952_v12  }
  0x21   :  { %985 = vperm.xlu1 %4895, %v955_v13   ;;  %980 = vperm.xlu0 %4894, %v954_v14  }
  0x25   :  { %995 = vperm.xlu1 %4895, %v957_v15   ;;  %990 = vperm.xlu0 %4894, %v956_v16  }
  0x88   :  { %v77_v17 = vpop.permute.xlu0 %76  ;;  %v87_v19 = vpop.permute.xlu1 %86 }
  0x89   :  { %v5274_v20 = vmul.f32 %v5271_v18, %v87_v19  ;;  %v5281_v25 = vmul.f32 %v5271_v18, %v77_v17 }
  0x8b   :  { %7459 = vst [vmem:[#allocation2_spill] sm:$0xff] %v5274_v20  ;;  %v335_v23 = vand.u32 2139095040, %v5274_v20  ;;  %7461 = vst [vmem:[#allocation4_spill] sm:$0xff] %v5281_v25  ;;  %v129_v29 = vand.u32 2139095040, %v5281_v25  ;;  %v7417_v58 = vand.u32 2147483647, %v5274_v20 }
  0x8c   :  { %v82_v21 = vpop.permute.xlu0 %81  ;;  %v92_v24 = vpop.permute.xlu1 %91 }
  0x8d   :  { %v5277_v22 = vmul.f32 %v5271_v18, %v82_v21  ;;  %v5284_v26 = vmul.f32 %v5271_v18, %v92_v24  ;;  %v336_v28 = vshrl.u32 %v335_v23, 23  ;;  %v130_v33 = vshrl.u32 %v129_v29, 23 }
  0x8e   :  { %v5325_v9 = vand.u32 8388607, %v7417_v58 }
  0x8f   :  { %7460 = vst [vmem:[#allocation3_spill] sm:$0xff] %v5277_v22  ;;  %7462 = vst [vmem:[#allocation5_spill] sm:$0xff] %v5284_v26  ;;  %v232_v27 = vand.u32 2139095040, %v5277_v22  ;;  %v438_v30 = vand.u32 2139095040, %v5284_v26  ;;  %v4046_v32 = vadd.s32 4294967169, %v336_v28  ;;  %v4038_v39 = vadd.s32 4294967169, %v130_v33 }
  0x90   :  { %v102_v37 = vpop.permute.xlu1 %101  ;;  %v97_v38 = vpop.permute.xlu0 %96  ;;  %v7418_v60 = vand.u32 2147483647, %v5277_v22  ;;  %v7423_v8 = vand.u32 2147483647, %v5284_v26 }
  0x91   :  { %v233_v31 = vshrl.u32 %v232_v27, 23  ;;  %v439_v34 = vshrl.u32 %v438_v30, 23  ;;  %v342_v36 = vadd.s32 1, %v4046_v32  ;;  %v5290_v42 = vmul.f32 %v5271_v18, %v102_v37 }
  0x92   :  { %v5293_v43 = vmul.f32 %v5271_v18, %v97_v38  ;;  %v136_v44 = vadd.s32 1, %v4038_v39  ;;  %v5333_v14 = vand.u32 8388607, %v7418_v60  ;;  %v7445_v32 = vmov 2475754826  }
  0x93   :  { %v4042_v35 = vadd.s32 4294967169, %v233_v31  ;;  %v4050_v40 = vadd.s32 4294967169, %v439_v34  ;;  %7463 = vst [vmem:[#allocation6_spill] sm:$0xff] %v5290_v42  ;;  %vm343_vm0 = vcmp.gt.s32.totalorder %v342_v36, 0  ;;  %v644_v47 = vand.u32 2139095040, %v5290_v42 }
  0x94   :  { %v344_v45 = vsel %vm343_vm0, %v342_v36, 0  ;;  %v541_v48 = vand.u32 2139095040, %v5293_v43  ;;  %vm137_vm2 = vcmp.gt.s32.totalorder %v136_v44, 0  ;;  %v112_v13 = vpop.permute.xlu1 %111  ;;  %v107_v28 = vpop.permute.xlu0 %106  ;;  %v7447_v34 = vmov 2131351028  }
  0x95   :  { %v239_v41 = vadd.s32 1, %v4042_v35  ;;  %v445_v46 = vadd.s32 1, %v4050_v40  ;;  %v5297_v49 = vand.u32 31, %v344_v45  ;;  %v645_v51 = vshrl.u32 %v644_v47, 23 }
  0x96   :  { %v542_v52 = vshrl.u32 %v541_v48, 23  ;;  %v138_v55 = vsel %vm137_vm2, %v136_v44, 0  ;;  %v5327_v10 = vshrl.u32 %v344_v45, 5  ;;  %v5356_v31 = vmul.f32 %v5271_v18, %v112_v13 }
  0x97   :  { %vm240_vm1 = vcmp.gt.s32.totalorder %v239_v41, 0  ;;  %vm446_vm3 = vcmp.gt.s32.totalorder %v445_v46, 0  ;;  %v5300_v54 = vsub.s32 32, %v5297_v49  ;;  %v4058_v57 = vadd.s32 4294967169, %v645_v51 }
  0x98   :  { %v241_v50 = vsel %vm240_vm1, %v239_v41, 0  ;;  %v447_v56 = vsel %vm446_vm3, %v445_v46, 0  ;;  %v4054_v59 = vadd.s32 4294967169, %v542_v52  ;;  %v5304_v61 = vand.u32 31, %v138_v55 }
  0x99   :  { %v243_v53 = vand.u32 31, %v241_v50  ;;  %v5306_v62 = vand.u32 31, %v447_v56  ;;  %v358_v1 = vshll.u32 %v7424_v0, %v5297_v49  ;;  %v359_v3 = vshrl.u32 %v7421_v2, %v5300_v54 }
  0x9a   :  { %v5316_v4 = vshll.u32 %v7421_v2, %v5297_v49  ;;  %v5320_v6 = vshrl.u32 %v7419_v5, %v5300_v54  ;;  %v651_v7 = vadd.s32 1, %v4058_v57  ;;  %v5329_v11 = vshrl.u32 %v138_v55, 5 }
  0x9b   :  { %v5308_v63 = vsub.s32 32, %v243_v53  ;;  %v548_v12 = vadd.s32 1, %v4054_v59  ;;  %v5336_v15 = vsub.s32 32, %v5304_v61  ;;  %v5339_v16 = vsub.s32 32, %v5306_v62 }
  0x9c   :  { %7464 = vst [vmem:[#allocation7_spill] sm:$0xff] %v5329_v11  ;;  %v5345_v21 = vor.u32 %v359_v3, %v358_v1  ;;  %v363_v23 = vor.u32 %v5320_v6, %v5316_v4  ;;  %v461_v24 = vshll.u32 %v7424_v0, %v5306_v62  ;;  %v5351_v27 = vshrl.u32 %v241_v50, 5 }
  0x9d   :  { %v256_v17 = vshrl.u32 %v7421_v2, %v5308_v63  ;;  %v259_v19 = vshrl.u32 %v7419_v5, %v5308_v63  ;;  %v255_v29 = vshll.u32 %v7424_v0, %v243_v53  ;;  %v258_v30 = vshll.u32 %v7421_v2, %v243_v53 }
  0x9e   :  { %vm652_vm4 = vcmp.gt.s32.totalorder %v651_v7, 0  ;;  %vm367_vm5 = vcmp.lt.s32.totalorder %v5327_v10, 4  ;;  %vm549_vm6 = vcmp.gt.s32.totalorder %v548_v12, 0  ;;  %v247_v33 = vshrl.u32 %v7445_v32, %v5308_v63 }
  0x9f   :  { %v250_v35 = vshrl.u32 %v7447_v34, %v5308_v63  ;;  %v253_v36 = vshrl.u32 %v7424_v0, %v5308_v63  ;;  %v462_v37 = vshrl.u32 %v7421_v2, %v5339_v16  ;;  %v257_v38 = vor.u32 %v256_v17, %v255_v29 }
  0xa0   :  { %v260_v39 = vor.u32 %v259_v19, %v258_v30  ;;  %v5368_v40 = vmul.f32 %v5271_v18, %v107_v28  ;;  %v465_v41 = vshrl.u32 %v7419_v5, %v5339_v16  ;;  %v7441_v44 = vmov 683565275  }
  0xa1   :  { %v246_v45 = vshll.u32 %v7441_v44, %v243_v53  ;;  %v249_v46 = vshll.u32 %v7445_v32, %v243_v53  ;;  %v252_v47 = vshll.u32 %v7447_v34, %v243_v53  ;;  %v464_v48 = vshll.u32 %v7421_v2, %v5306_v62 }
  0xa2   :  { %7465 = vst [vmem:[#allocation8_spill] sm:$0xff] %v5368_v40  ;;  %v653_v50 = vsel %vm652_vm4, %v651_v7, 0  ;;  %v550_v51 = vsel %vm549_vm6, %v548_v12, 0  ;;  %v850_v18 = vand.u32 2139095040, %v5356_v31  ;;  %vm264_vm7 = vcmp.lt.s32.totalorder %v5351_v27, 4 }
  0xa3   :  { %v248_v52 = vor.u32 %v247_v33, %v246_v45  ;;  %v251_v55 = vor.u32 %v250_v35, %v249_v46  ;;  %v254_v57 = vor.u32 %v253_v36, %v252_v47  ;;  %v5381_v59 = vshrl.u32 %v447_v56, 5 }
  0xa4   :  { %v270_v1 = vsel %vm264_vm7, %v257_v38, 920167782  ;;  %v274_v53 = vsel %vm264_vm7, %v260_v39, 1326507024  ;;  %v747_v3 = vand.u32 2139095040, %v5368_v40  ;;  %v5388_v4 = vor.u32 %v462_v37, %v461_v24 }
  0xa5   :  { %v466_v6 = vor.u32 %v465_v41, %v464_v48  ;;  %v5390_v7 = vand.u32 31, %v653_v50  ;;  %v5392_v12 = vand.u32 31, %v550_v51  ;;  %v851_v13 = vshrl.u32 %v850_v18, 23 }
  0xa6   :  { %v237_v17 = vor.u32 8388608, %v5333_v14  ;;  %vm261_vm8 = vcmp.lt.s32.totalorder %v5351_v27, 1  ;;  %vm263_vm9 = vcmp.lt.s32.totalorder %v5351_v27, 3  ;;  %v5408_v14 = vsel %vm367_vm5, %v5345_v21, 920167782 }
  0xa7   :  { %v269_v56 = vsel %vm261_vm8, %v248_v52, %v251_v55  ;;  %v271_v19 = vsel %vm263_vm9, %v254_v57, %v270_v1  ;;  %v273_v24 = vsel %vm261_vm8, %v251_v55, %v254_v57  ;;  %v275_v28 = vsel %vm263_vm9, %v257_v38, %v274_v53 }
  0xa8   :  { %v5412_v29 = vsel %vm367_vm5, %v363_v23, 1326507024  ;;  %vm470_vm10 = vcmp.lt.s32.totalorder %v5381_v59, 4  ;;  %v748_v30 = vshrl.u32 %v747_v3, 23  ;;  %v5422_v36 = vshrl.u32 %v653_v50, 5 }
  0xa9   :  { %v5418_v33 = vsel %vm470_vm10, %v5388_v4, 920167782  ;;  %v480_v35 = vsel %vm470_vm10, %v466_v6, 1326507024  ;;  %vm262_vm11 = vcmp.lt.s32.totalorder %v5351_v27, 2  ;;  %v5426_v37 = vsub.s32 32, %v5390_v7 }
  0xaa   :  { %v5429_v23 = vsub.s32 32, %v5392_v12  ;;  %v272_v38 = vsel %vm262_vm11, %v269_v56, %v271_v19  ;;  %v276_v39 = vsel %vm262_vm11, %v273_v24, %v275_v28  ;;  %v5435_v41 = vshrl.u32 %v550_v51, 5 }
  0xab   :  { %v4066_v45 = vadd.s32 4294967169, %v851_v13  ;;  %v245_v46 = vshrl.u32 %v7441_v44, %v5308_v63  ;;  %v5439_v47 = vshll.u32 %v237_v17, 8  ;;  %v667_v48 = vshll.u32 %v7424_v0, %v5390_v7 }
  0xac   :  { %v5445_v50 = vshll.u32 %v7421_v2, %v5390_v7  ;;  %v564_v18 = vshll.u32 %v7424_v0, %v5392_v12  ;;  %v4062_v1 = vadd.s32 4294967169, %v748_v30  ;;  %v668_v6 = vshrl.u32 %v7421_v2, %v5426_v37 }
  0xad   :  { %v5450_v51 = vmul.u32.u64.low %v5439_v47, %v276_v39  ;;  %v5451_v53 = vmul.u32.u64.high %v5439_v47, %v276_v39, %v5450_v51  ;;  %v5454_v3 = vmul.u32.u64.low %v5439_v47, %v272_v38  ;;  %v5455_v63 = vmul.u32.u64.high %v5439_v47, %v272_v38, %v5454_v3 }
  0xae   :  { %v5462_v13 = vshrl.u32 %v7419_v5, %v5426_v37  ;;  %v565_v17 = vshrl.u32 %v7421_v2, %v5429_v23  ;;  %v266_v56 = vsel %vm264_vm7, %v254_v57, 2102212464  ;;  %v5470_v19 = vshrl.u32 %v7419_v5, %v5429_v23 }
  0xaf   :  { %7466 = vst [vmem:[#allocation9_spill] sm:$0xff] %v5451_v53  ;;  %7467 = vst [vmem:[#allocation10_spill] sm:$0xff] %v5454_v3  ;;  %v857_v24 = vadd.s32 1, %v4066_v45  ;;  %v456_v28 = vshrl.u32 %v7447_v34, %v5339_v16  ;;  %v459_v30 = vshrl.u32 %v7424_v0, %v5339_v16  ;;  %v5478_v38 = vshll.u32 %v7421_v2, %v5392_v12 }
  0xb0   :  { %v754_v39 = vadd.s32 1, %v4062_v1  ;;  %v442_v51 = vand.u32 8388607, %v7423_v8  ;;  %v453_v57 = vshrl.u32 %v7445_v32, %v5339_v16  ;;  %v265_v45 = vsel %vm261_vm8, %v245_v46, %v248_v52 }
  0xb1   :  { %v267_v58 = vsel %vm263_vm9, %v251_v55, %v266_v56  ;;  %v455_v60 = vshll.u32 %v7445_v32, %v5306_v62  ;;  %v458_v5 = vshll.u32 %v7447_v34, %v5306_v62  ;;  %v5492_v2 = vor.u32 %v668_v6, %v667_v48 }
  0xb2   :  { %v672_v1 = vor.u32 %v5462_v13, %v5445_v50  ;;  %v5496_v8 = vor.u32 %v565_v17, %v564_v18  ;;  %v452_v0 = vshll.u32 %v7441_v44, %v5306_v62  ;;  %v569_v52 = vor.u32 %v5470_v19, %v5478_v38 }
  0xb3   :  { %vm858_vm12 = vcmp.gt.s32.totalorder %v857_v24, 0  ;;  %v457_v55 = vor.u32 %v456_v28, %v455_v60  ;;  %v460_v46 = vor.u32 %v459_v30, %v458_v5  ;;  %vm755_vm13 = vcmp.gt.s32.totalorder %v754_v39, 0 }
  0xb4   :  { %v268_v56 = vsel %vm262_vm11, %v265_v45, %v267_v58  ;;  %v443_v48 = vor.u32 8388608, %v442_v51  ;;  %v454_v6 = vor.u32 %v453_v57, %v452_v0  ;;  %vm286_vm14 = vc.u32 %v5451_v53, %v5454_v3 }
  0xb5   :  { %v287_v50 = vadd.s32 1, %v5455_v63  ;;  %vm467_vm15 = vcmp.lt.s32.totalorder %v5381_v59, 1  ;;  %vm469_vm0 = vcmp.lt.s32.totalorder %v5381_v59, 3  ;;  %v352_v62 = vshll.u32 %v7445_v32, %v5297_v49 }
  0xb6   :  { %v353_v60 = vshrl.u32 %v7447_v34, %v5300_v54  ;;  %v355_v58 = vshll.u32 %v7447_v34, %v5297_v49  ;;  %v7468_v0 = vmov 2102212464   ;;  %vm676_vm1 = vcmp.lt.s32.totalorder %v5422_v36, 4 }
  0xb7   :  { %v356_v5 = vshrl.u32 %v7468_v0, %v5300_v54  ;;  %v479_v27 = vsel %vm467_vm15, %v457_v55, %v460_v46  ;;  %v481_v18 = vsel %vm469_vm0, %v5388_v4, %v480_v35  ;;  %v349_v13 = vshll.u32 %v7441_v44, %v5297_v49 }
  0xb8   :  { %v350_v17 = vshrl.u32 %v7445_v32, %v5300_v54  ;;  %v859_v19 = vsel %vm858_vm12, %v857_v24, 0  ;;  %v5529_v28 = vsel %vm755_vm13, %v754_v39, 0  ;;  %v475_v30 = vsel %vm467_vm15, %v454_v6, %v457_v55 }
  0xb9   :  { %v477_v38 = vsel %vm469_vm0, %v460_v46, %v5418_v33  ;;  %v288_v49 = vsel %vm286_vm14, %v287_v50, %v5455_v63  ;;  %v451_v4 = vshrl.u32 %v7441_v44, %v5339_v16  ;;  %vm468_vm2 = vcmp.lt.s32.totalorder %v5381_v59, 2 }
  0xba   :  { %v472_v35 = vsel %vm470_vm10, %v460_v46, 2102212464  ;;  %v284_v24 = vmul.u32 %v5439_v47, %v268_v56  ;;  %v482_v39 = vsel %vm468_vm2, %v479_v27, %v481_v18  ;;  %v5548_v51 = vor.u32 %v353_v60, %v352_v62 }
  0xbb   :  { %v5550_v33 = vor.u32 %v356_v5, %v355_v58  ;;  %v5552_v57 = vand.u32 31, %v859_v19  ;;  %v478_v63 = vsel %vm468_vm2, %v475_v30, %v477_v38  ;;  %v5556_v16 = vshll.u32 %v443_v48, 8 }
  0xbc   :  { %v5558_v45 = vor.u32 %v350_v17, %v349_v13  ;;  %v5560_v50 = vadd.s32 %v288_v49, %v284_v24  ;;  %v471_v47 = vsel %vm467_vm15, %v451_v4, %v454_v6  ;;  %v473_v46 = vsel %vm469_vm0, %v457_v55, %v472_v35 }
  0xbd   :  { %v340_v56 = vor.u32 8388608, %v5325_v9  ;;  %v5568_v62 = vmul.u32.u64.low %v5556_v16, %v482_v39  ;;  %v5569_v60 = vmul.u32.u64.high %v5556_v16, %v482_v39, %v5568_v62  ;;  %vm364_vm3 = vcmp.lt.s32.totalorder %v5327_v10, 1 }
  0xbe   :  { %vm366_vm4 = vcmp.lt.s32.totalorder %v5327_v10, 3  ;;  %v5574_v48 = vmul.u32.u64.low %v5556_v16, %v478_v63  ;;  %v5575_v58 = vmul.u32.u64.high %v5556_v16, %v478_v63, %v5574_v48  ;;  %v376_v55 = vsel %vm364_vm3, %v5548_v51, %v5550_v33 }
  0xbf   :  { %v378_v9 = vsel %vm366_vm4, %v5345_v21, %v5412_v29  ;;  %vm573_vm6 = vcmp.lt.s32.totalorder %v5435_v41, 4  ;;  %v5588_v6 = vand.u32 31, %v5529_v28  ;;  %v372_v5 = vsel %vm364_vm3, %v5558_v45, %v5548_v51 }
  0xc0   :  { %v374_v27 = vsel %vm366_vm4, %v5550_v33, %v5408_v14  ;;  %v5601_v18 = vsel %vm676_vm1, %v5492_v2, 920167782  ;;  %v5605_v21 = vsel %vm676_vm1, %v672_v1, 1326507024  ;;  %v290_v29 = vadd.s32 536870912, %v5560_v50 }
  0xc1   :  { %vm365_vm7 = vcmp.lt.s32.totalorder %v5327_v10, 2  ;;  %v579_v13 = vsel %vm573_vm6, %v5496_v8, 920167782  ;;  %v5614_v14 = vsel %vm573_vm6, %v569_v52, 1326507024  ;;  %v474_v17 = vsel %vm468_vm2, %v471_v47, %v473_v46 }
  0xc2   :  { %v379_v30 = vsel %vm365_vm7, %v376_v55, %v378_v9  ;;  %v5620_v1 = vshrl.u32 %v859_v19, 5  ;;  %v5623_v38 = vsub.s32 32, %v5552_v57  ;;  %v375_v49 = vsel %vm365_vm7, %v372_v5, %v374_v27 }
  0xc3   :  { %v5627_v4 = vshll.u32 %v340_v56, 8  ;;  %v5631_v52 = vshll.u32 %v7468_v0, %v5552_v57  ;;  %v7469_v59 = vmov 920167782   ;;  %v5638_v24 = vsub.s32 32, %v5588_v6 }
  0xc4   :  { %v5635_v35 = vshll.u32 %v7469_v59, %v5552_v57  ;;  %v348_v19 = vshrl.u32 %v7441_v44, %v5300_v54  ;;  %v5642_v39 = vshrl.u32 %v290_v29, 30  ;;  %v490_v63 = vmul.u32 %v5556_v16, %v474_v17 }
  0xc5   :  { %v5646_v47 = vmul.u32.u64.low %v5627_v4, %v379_v30  ;;  %v5647_v46 = vmul.u32.u64.high %v5627_v4, %v379_v30, %v5646_v47  ;;  %vm492_vm8 = vc.u32 %v5569_v60, %v5574_v48  ;;  %v493_v54 = vadd.s32 1, %v5575_v58 }
  0xc6   :  { %7470 = vst [vmem:[#allocation11_spill] sm:$0xff] %v5642_v39  ;;  %v5652_v56 = vmul.u32.u64.low %v5627_v4, %v375_v49  ;;  %v5653_v62 = vmul.u32.u64.high %v5627_v4, %v375_v49, %v5652_v56  ;;  %v659_v9 = vshrl.u32 %v7445_v32, %v5426_v37  ;;  %v662_v16 = vshrl.u32 %v7447_v34, %v5426_v37 }
  0xc7   :  { %v665_v5 = vshrl.u32 %v7468_v0, %v5426_v37  ;;  %v556_v29 = vshrl.u32 %v7445_v32, %v5429_v23  ;;  %v559_v17 = vshrl.u32 %v7447_v34, %v5429_v23  ;;  %v562_v30 = vshrl.u32 %v7468_v0, %v5429_v23 }
  0xc8   :  { %v292_v49 = vshll.u32 %v5642_v39, 30  ;;  %v658_v47 = vshll.u32 %v7441_v44, %v5390_v7  ;;  %v661_v55 = vshll.u32 %v7445_v32, %v5390_v7  ;;  %v664_v27 = vshll.u32 %v7447_v34, %v5390_v7 }
  0xc9   :  { %v7471_v26 = vand.u32 2147483647, %v5290_v42  ;;  %v555_v25 = vshll.u32 %v7441_v44, %v5392_v12  ;;  %v558_v22 = vshll.u32 %v7445_v32, %v5392_v12  ;;  %v561_v39 = vshll.u32 %v7447_v34, %v5392_v12 }
  0xca   :  { %v494_v3 = vsel %vm492_vm8, %v493_v54, %v5575_v58  ;;  %v5690_v53 = vor.u32 %v659_v9, %v658_v47  ;;  %v5692_v7 = vor.u32 %v662_v16, %v661_v55  ;;  %v666_v42 = vor.u32 %v665_v5, %v664_v27 }
  0xcb   :  { %v648_v20 = vand.u32 8388607, %v7471_v26  ;;  %v7472_v26 = vand.u32 2147483647, %v5293_v43  ;;  %v5696_v44 = vor.u32 %v556_v29, %v555_v25  ;;  %v5698_v40 = vor.u32 %v559_v17, %v558_v22 }
  0xcc   :  { %v563_v32 = vor.u32 %v562_v30, %v561_v39  ;;  %v874_v12 = vshrl.u32 %v7469_v59, %v5623_v38  ;;  %v5703_v34 = vsub.s32 %v5560_v50, %v292_v49  ;;  %v368_v58 = vsel %vm364_vm3, %v348_v19, %v5558_v45 }
  0xcd   :  { %v545_v11 = vand.u32 8388607, %v7472_v26  ;;  %v369_v55 = vsel %vm367_vm5, %v5550_v33, 2102212464  ;;  %v5711_v54 = vadd.s32 %v494_v3, %v490_v63  ;;  %v390_v22 = vadd.s32 1, %v5653_v62 }
  0xce   :  { %v649_v25 = vor.u32 8388608, %v648_v20  ;;  %vm673_vm9 = vcmp.lt.s32.totalorder %v5422_v36, 1  ;;  %vm675_vm10 = vcmp.lt.s32.totalorder %v5422_v36, 3  ;;  %vm570_vm11 = vcmp.lt.s32.totalorder %v5435_v41, 1 }
  0xcf   :  { %v681_v50 = vsel %vm673_vm9, %v5690_v53, %v5692_v7  ;;  %vm572_vm12 = vcmp.lt.s32.totalorder %v5435_v41, 3  ;;  %v683_v3 = vsel %vm675_vm10, %v666_v42, %v5601_v18  ;;  %v546_v33 = vor.u32 8388608, %v545_v11 }
  0xd0   :  { %v578_v20 = vsel %vm570_vm11, %v5696_v44, %v5698_v40  ;;  %v580_v45 = vsel %vm572_vm12, %v563_v32, %v579_v13  ;;  %v685_v19 = vsel %vm673_vm9, %v5692_v7, %v666_v42  ;;  %v687_v39 = vsel %vm675_vm10, %v5492_v2, %v5605_v21 }
  0xd1   :  { %v582_v11 = vsel %vm570_vm11, %v5698_v40, %v563_v32  ;;  %v584_v18 = vsel %vm572_vm12, %v5496_v8, %v5614_v14  ;;  %v370_v13 = vsel %vm366_vm4, %v5548_v51, %v369_v55  ;;  %vm389_vm5 = vc.u32 %v5647_v46, %v5652_v56 }
  0xd2   :  { %vm674_vm13 = vcmp.lt.s32.totalorder %v5422_v36, 2  ;;  %vm571_vm14 = vcmp.lt.s32.totalorder %v5435_v41, 2  ;;  %v7473_v2 = vmov 1326507024   ;;  %v295_v63 = vsub.s32 0, %v5703_v34 }
  0xd3   :  { %v877_v21 = vshrl.u32 %v7473_v2, %v5623_v38  ;;  %v684_v9 = vsel %vm674_vm13, %v681_v50, %v683_v3  ;;  %v581_v8 = vsel %vm571_vm14, %v578_v20, %v580_v45  ;;  %v688_v51 = vsel %vm674_vm13, %v685_v19, %v687_v39 }
  0xd4   :  { %v5761_v14 = vshll.u32 %v649_v25, 8  ;;  %v585_v16 = vsel %vm571_vm14, %v582_v11, %v584_v18  ;;  %v5765_v5 = vshll.u32 %v546_v33, 8  ;;  %v875_v27 = vor.u32 %v874_v12, %v5631_v52 }
  0xd5   :  { %vm882_vm15 = vcmp.lt.s32.totalorder %v5620_v1, 4  ;;  %v496_v29 = vadd.s32 536870912, %v5711_v54  ;;  %v371_v17 = vsel %vm365_vm7, %v368_v58, %v370_v13  ;;  %v391_v30 = vsel %vm389_vm5, %v390_v22, %v5653_v62 }
  0xd6   :  { %v5774_v49 = vmul.u32.u64.low %v5761_v14, %v684_v9  ;;  %v5775_v47 = vmul.u32.u64.high %v5761_v14, %v684_v9, %v5774_v49  ;;  %v5779_v26 = vmul.u32.u64.low %v5765_v5, %v581_v8  ;;  %v5780_v55 = vmul.u32.u64.high %v5765_v5, %v581_v8, %v5779_v26 }
  0xd7   :  { %v5784_v52 = vmul.u32.u64.low %v5761_v14, %v688_v51  ;;  %v5785_v12 = vmul.u32.u64.high %v5761_v14, %v688_v51, %v5784_v52  ;;  %v5788_v25 = vmul.u32.u64.low %v5765_v5, %v585_v16  ;;  %v5789_v10 = vmul.u32.u64.high %v5765_v5, %v585_v16, %v5788_v25 }
  0xd8   :  { %v878_v62 = vor.u32 %v877_v21, %v5635_v35  ;;  %v4043_v58 = vmin.u32 %v295_v63, %v5703_v34  ;;  %v387_v22 = vmul.u32 %v5627_v4, %v371_v17  ;;  %v7449_v50 = vand.u32 2147483647, %v5356_v31 }
  0xd9   :  { %v7474_v3 = vmov 683565275   ;;  %v678_v20 = vsel %vm676_vm1, %v666_v42, 2102212464  ;;  %v7475_v45 = vmov 2475754826   ;;  %vm698_vm0 = vc.u32 %v5785_v12, %v5774_v49 }
  0xda   :  { %v657_v33 = vshrl.u32 %v7474_v3, %v5426_v37  ;;  %v865_v19 = vshrl.u32 %v7475_v45, %v5623_v38  ;;  %v7476_v39 = vmov 2131351028   ;;  %v5803_v18 = vadd.s32 %v391_v30, %v387_v22 }
  0xdb   :  { %v868_v11 = vshrl.u32 %v7476_v39, %v5623_v38  ;;  %v554_v35 = vshrl.u32 %v7474_v3, %v5429_v23  ;;  %v575_v4 = vsel %vm573_vm6, %v563_v32, 2102212464  ;;  %v871_v37 = vshrl.u32 %v7468_v0, %v5623_v38 }
  0xdc   :  { %v5811_v13 = vshrl.u32 %v496_v29, 30  ;;  %v864_v42 = vshll.u32 %v7474_v3, %v5552_v57  ;;  %v867_v21 = vshll.u32 %v7475_v45, %v5552_v57  ;;  %v870_v63 = vshll.u32 %v7476_v39, %v5552_v57 }
  0xdd   :  { %v677_v23 = vsel %vm673_vm9, %v657_v33, %v5690_v53  ;;  %v679_v32 = vsel %vm675_vm10, %v5692_v7, %v678_v20  ;;  %v574_v9 = vsel %vm570_vm11, %v554_v35, %v5696_v44  ;;  %v854_v8 = vand.u32 8388607, %v7449_v50 }
  0xde   :  { %v576_v51 = vsel %vm572_vm12, %v5698_v40, %v575_v4  ;;  %v866_v57 = vor.u32 %v865_v19, %v864_v42  ;;  %v869_v16 = vor.u32 %v868_v11, %v867_v21  ;;  %v872_v29 = vor.u32 %v871_v37, %v870_v63 }
  0xdf   :  { %v888_v53 = vsel %vm882_vm15, %v875_v27, 920167782  ;;  %v393_v17 = vadd.s32 536870912, %v5803_v18  ;;  %v699_v7 = vadd.s32 1, %v5775_v47  ;;  %v596_v30 = vadd.s32 1, %v5780_v55 }
  0xe0   :  { %v892_v44 = vsel %vm882_vm15, %v878_v62, 1326507024  ;;  %v680_v52 = vsel %vm674_vm13, %v677_v23, %v679_v32  ;;  %vm595_vm1 = vc.u32 %v5789_v10, %v5779_v26  ;;  %v577_v40 = vsel %vm571_vm14, %v574_v9, %v576_v51 }
  0xe1   :  { %v855_v25 = vor.u32 8388608, %v854_v8  ;;  %vm879_vm2 = vcmp.lt.s32.totalorder %v5620_v1, 1  ;;  %vm881_vm3 = vcmp.lt.s32.totalorder %v5620_v1, 3  ;;  %v297_v22 = vclz %v4043_v58 }
  0xe2   :  { %v498_v62 = vshll.u32 %v5811_v13, 30  ;;  %v887_v36 = vsel %vm879_vm2, %v866_v57, %v869_v16  ;;  %v889_v33 = vsel %vm881_vm3, %v872_v29, %v888_v53  ;;  %v5855_v20 = vshrl.u32 %v393_v17, 30 }
  0xe3   :  { %v696_v19 = vmul.u32 %v5761_v14, %v680_v52  ;;  %v700_v41 = vsel %vm698_vm0, %v699_v7, %v5775_v47  ;;  %v597_v11 = vsel %vm595_vm1, %v596_v30, %v5780_v55  ;;  %v593_v35 = vmul.u32 %v5765_v5, %v577_v40 }
  0xe4   :  { %vm880_vm4 = vcmp.lt.s32.totalorder %v5620_v1, 2  ;;  %v891_v58 = vsel %vm879_vm2, %v869_v16, %v872_v29  ;;  %v893_v4 = vsel %vm881_vm3, %v875_v27, %v892_v44  ;;  %v884_v37 = vsel %vm882_vm15, %v872_v29, 2102212464 }
  0xe5   :  { %v890_v14 = vsel %vm880_vm4, %v887_v36, %v889_v33  ;;  %v894_v47 = vsel %vm880_vm4, %v891_v58, %v893_v4  ;;  %v895_v55 = vshll.u32 %v855_v25, 8  ;;  %v152_v5 = vshll.u32 %v7468_v0, %v5304_v61 }
  0xe6   :  { %v4044_v42 = vadd.s32 4294967294, %v297_v22  ;;  %v5874_v21 = vadd.s32 %v597_v11, %v593_v35  ;;  %v863_v63 = vshrl.u32 %v7474_v3, %v5623_v38  ;;  %v395_v27 = vshll.u32 %v5855_v20, 30 }
  0xe7   :  { %v5879_v23 = vadd.s32 %v700_v41, %v696_v19  ;;  %v5881_v32 = vmul.u32.u64.low %v895_v55, %v894_v47  ;;  %v5882_v9 = vmul.u32.u64.high %v895_v55, %v894_v47, %v5881_v32  ;;  %v885_v51 = vsel %vm881_vm3, %v869_v16, %v884_v37  ;;  %v7478_v47 = vld [vmem:[#allocation7_spill] sm:$0xff] }
  0xe8   :  { %v883_v8 = vsel %vm879_vm2, %v863_v63, %v866_v57  ;;  %v5888_v29 = vmul.u32.u64.low %v895_v55, %v890_v14  ;;  %v5889_v53 = vmul.u32.u64.high %v895_v55, %v890_v14, %v5888_v29  ;;  %v5894_v38 = vshll.u32 %v7469_v59, %v5304_v61 }
  0xe9   :  { %v771_v17 = vshrl.u32 %v7469_v59, %v5638_v24  ;;  %v774_v7 = vshrl.u32 %v7473_v2, %v5638_v24  ;;  %v5901_v30 = vsub.s32 %v5711_v54, %v498_v62  ;;  %v153_v57 = vshrl.u32 %v7469_v59, %v5336_v15  ;;  %v7477_v62 = vld [vmem:[#allocation8_spill] sm:$0xff] }
  0xea   :  { %v5906_v16 = vshrl.u32 %v5529_v28, 5  ;;  %vm4045_vm6 = vcmp.lt.s32.totalorder %v4044_v42, 0  ;;  %v599_v44 = vadd.s32 536870912, %v5874_v21  ;;  %v770_v52 = vshll.u32 %v7468_v0, %v5588_v6 }
  0xeb   :  { %v773_v40 = vshll.u32 %v7469_v59, %v5588_v6  ;;  %v886_v25 = vsel %vm880_vm4, %v883_v8, %v885_v51  ;;  %vm904_vm7 = vc.u32 %v5882_v9, %v5888_v29  ;;  %v5918_v54 = vsub.s32 %v5803_v18, %v395_v27 }
  0xec   :  { %v702_v28 = vadd.s32 536870912, %v5879_v23  ;;  %v905_v22 = vadd.s32 1, %v5889_v53  ;;  %v7450_v36 = vand.u32 2147483647, %v7477_v62  ;;  %v772_v33 = vor.u32 %v771_v17, %v770_v52 }
  0xed   :  { %v775_v19 = vor.u32 %v774_v7, %v773_v40  ;;  %v5923_v41 = vsel %vm4045_vm6, 0, %v4044_v42  ;;  %v501_v59 = vsub.s32 0, %v5901_v30  ;;  %v5926_v1 = vshrl.u32 %v599_v44, 30 }
  0xee   :  { %v902_v11 = vmul.u32 %v895_v55, %v886_v25  ;;  %v906_v35 = vsel %vm904_vm7, %v905_v22, %v5889_v53  ;;  %v765_v18 = vshrl.u32 %v7476_v39, %v5638_v24  ;;  %v762_v58 = vshrl.u32 %v7475_v45, %v5638_v24 }
  0xef   :  { %v764_v4 = vshll.u32 %v7475_v45, %v5588_v6  ;;  %v767_v37 = vshll.u32 %v7476_v39, %v5588_v6  ;;  %v768_v14 = vshrl.u32 %v7468_v0, %v5638_v24  ;;  %vm161_vm8 = vcmp.lt.s32.totalorder %v7478_v47, 4 }
  0xf0   :  { %v305_v55 = vsub.s32 4294967266, %v5923_v41  ;;  %v398_v42 = vsub.s32 0, %v5918_v54  ;;  %v5942_v63 = vshrl.u32 %v702_v28, 30  ;;  %v751_v27 = vand.u32 8388607, %v7450_v36 }
  0xf1   :  { %v5946_v32 = vadd.s32 %v906_v35, %v902_v11  ;;  %v761_v8 = vshll.u32 %v7474_v3, %v5588_v6  ;;  %v766_v51 = vor.u32 %v765_v18, %v764_v4  ;;  %v769_v53 = vor.u32 %v768_v14, %v767_v37 }
  0xf2   :  { %v5950_v17 = vor.u32 %v153_v57, %v152_v5  ;;  %v156_v7 = vshrl.u32 %v7473_v2, %v5336_v15  ;;  %vm779_vm9 = vcmp.lt.s32.totalorder %v5906_v16, 4  ;;  %v4051_v44 = vmin.u32 %v501_v59, %v5901_v30 }
  0xf3   :  { %v785_v52 = vsel %vm779_vm9, %v772_v33, 920167782  ;;  %v789_v40 = vsel %vm779_vm9, %v775_v19, 1326507024  ;;  %v601_v25 = vshll.u32 %v5926_v1, 30  ;;  %v763_v6 = vor.u32 %v762_v58, %v761_v8 }
  0xf4   :  { %v4047_v28 = vmin.u32 %v398_v42, %v5918_v54  ;;  %v704_v5 = vshll.u32 %v5942_v63, 30  ;;  %v752_v57 = vor.u32 8388608, %v751_v27  ;;  %vm776_vm10 = vcmp.lt.s32.totalorder %v5906_v16, 1  ;;  %v7480_v27 = vld [vmem:[#allocation10_spill] sm:$0xff] }
  0xf5   :  { %v306_v2 = vadd.s32 127, %v305_v55  ;;  %v908_v22 = vadd.s32 536870912, %v5946_v32  ;;  %vm778_vm11 = vcmp.lt.s32.totalorder %v5906_v16, 3  ;;  %v788_v59 = vsel %vm776_vm10, %v766_v51, %v769_v53 }
  0xf6   :  { %v157_v19 = vor.u32 %v156_v7, %v5894_v38  ;;  %v503_v11 = vclz %v4051_v44  ;;  %vm777_vm12 = vcmp.lt.s32.totalorder %v5906_v16, 2  ;;  %v790_v35 = vsel %vm778_vm11, %v772_v33, %v789_v40  ;;  %v7479_v33 = vld [vmem:[#allocation9_spill] sm:$0xff] }
  0xf7   :  { %v5973_v18 = vsub.s32 %v5874_v21, %v601_v25  ;;  %v784_v58 = vsel %vm776_vm10, %v763_v6, %v766_v51  ;;  %v786_v4 = vsel %vm778_vm11, %v769_v53, %v785_v52  ;;  %v791_v37 = vsel %vm777_vm12, %v788_v59, %v790_v35  ;;  %v1015_v52 = vld [vmem:[%s7481_s6] sm:$0xff] }
  0xf8   :  { %v301_v38 = vsub.s32 32, %v5923_v41  ;;  %v400_v14 = vclz %v4047_v28  ;;  %v5983_v55 = vsub.s32 %v5879_v23, %v704_v5  ;;  %v792_v42 = vshll.u32 %v752_v57, 8  ;;  %v1016_v23 = vld [vmem:[%s7481_s6 + $0x8] sm:$0xff] }
  0xf9   :  { %v5988_v21 = vsel %vm161_vm8, %v5950_v17, 920167782  ;;  %v285_v8 = vadd.s32 %v7480_v27, %v7479_v33  ;;  %v307_v7 = vshll.u32 %v306_v2, 23  ;;  %v5992_v44 = vshrl.u32 %v908_v22, 30  ;;  %v7482_v57 = vld [vmem:[#allocation11_spill] sm:$0xff] }
  0xfa   :  { %v781_v40 = vsel %vm779_vm9, %v769_v53, 2102212464  ;;  %v787_v25 = vsel %vm777_vm12, %v784_v58, %v786_v4  ;;  %v6004_v28 = vmul.u32.u64.low %v792_v42, %v791_v37  ;;  %v6005_v5 = vmul.u32.u64.high %v792_v42, %v791_v37, %v6004_v28 }
  0xfb   :  { %v315_v2 = vsub.s32 4, %v7482_v57  ;;  %v4052_v22 = vadd.s32 4294967294, %v503_v11  ;;  %v604_v59 = vsub.s32 0, %v5973_v18  ;;  %v760_v35 = vshrl.u32 %v7474_v3, %v5638_v24  ;;  %v6023_v11 = vld [vmem:[%s7483_s21] sm:$0xff]  ;;  %s5114_s21 = smov 96  }
  0xfc   :  { %v303_v33 = vshrl.u32 %v285_v8, %v301_v38  ;;  %v4048_v27 = vadd.s32 4294967294, %v400_v14  ;;  %v707_v50 = vsub.s32 0, %v5983_v55  ;;  %v4678_v36 = vpack.c.bf16 %v1016_v23, %v1015_v52  ;;  %v7484_v38 = vld [vmem:[#allocation3_spill] sm:$0xff]  ;;  %v7485_v52 = vld [vmem:[#allocation4_spill] sm:$0xff] }
  0xfd   :  { %v780_v53 = vsel %vm776_vm10, %v760_v35, %v763_v6  ;;  %v782_v58 = vsel %vm778_vm11, %v766_v51, %v781_v40  ;;  %v6016_v4 = vmul.u32.u64.low %v792_v42, %v787_v25  ;;  %v6017_v37 = vmul.u32.u64.high %v792_v42, %v787_v25, %v6016_v4 }
  0xfe   :  { %v171_v24 = vsel %vm161_vm8, %v157_v19, 1326507024  ;;  %vm231_vm5 = vcmp.lt.s32.totalorder %v7484_v38, 0  ;;  %v308_v14 = vor.u32 4788187, %v307_v7  ;;  %v910_v6 = vshll.u32 %v5992_v44, 30  ;;  %4679 = vmatprep.subr.bf16.mxu0 %v4678_v36 }
  0xff   :  { %v302_v51 = vshll.u32 %v5703_v34, %v5923_v41  ;;  %vm4053_vm13 = vcmp.lt.s32.totalorder %v4052_v22, 0  ;;  %v4055_v8 = vmin.u32 %v604_v59, %v5973_v18  ;;  %v126_v23 = vand.u32 2147483647, %v7485_v52  ;;  %4681 = vmatpush3.bf16.msra.mxu0 %v4678_v36 }
 0x100   :  { %v6036_v40 = vsel %vm231_vm5, %v315_v2, %v7482_v57  ;;  %v6040_v19 = vadd.s32 %v5652_v56, %v5647_v46  ;;  %vm4049_vm14 = vcmp.lt.s32.totalorder %v4048_v27, 0  ;;  %v783_v7 = vsel %vm777_vm12, %v780_v53, %v782_v58  ;;  %4388 = vmatprep.subr.mxu0 %v6023_v11 }
 0x101   :  { %v304_v34 = vor.u32 %v303_v33, %v302_v51  ;;  %v4059_v41 = vmin.u32 %v707_v50, %v5983_v55  ;;  %vm801_vm15 = vc.u32 %v6005_v5, %v6016_v4  ;;  %v802_v36 = vadd.s32 1, %v6017_v37 }
 0x102   :  { %v309_v25 = vand.u32 2147483647, %v308_v14  ;;  %v6049_v28 = vsel %vm4053_vm13, 0, %v4052_v22  ;;  %v6052_v46 = vsub.s32 %v5946_v32, %v910_v6  ;;  %v144_v56 = vshrl.u32 %v7475_v45, %v5336_v15 }
 0x103   :  { %v6056_v16 = vsel %vm4049_vm14, 0, %v4048_v27  ;;  %v606_v57 = vclz %v4055_v8  ;;  %v799_v2 = vmul.u32 %v792_v42, %v783_v7  ;;  %v133_v50 = vand.u32 8388607, %v126_v23 }
 0x104   :  { %v803_v59 = vsel %vm801_vm15, %v802_v36, %v6017_v37  ;;  %v143_v35 = vshll.u32 %v7474_v3, %v5304_v61  ;;  %v146_v22 = vshll.u32 %v7475_v45, %v5304_v61  ;;  %v147_v32 = vshrl.u32 %v7476_v39, %v5336_v15 }
 0x105   :  { %v709_v33 = vclz %v4059_v41  ;;  %v804_v53 = vadd.s32 %v803_v59, %v799_v2  ;;  %v149_v27 = vshll.u32 %v7476_v39, %v5304_v61  ;;  %v150_v42 = vshrl.u32 %v7468_v0, %v5336_v15 }
 0x106   :  { %v311_v58 = vcvt.s32.f32 %v304_v34  ;;  %v913_v37 = vsub.s32 0, %v6052_v46  ;;  %v145_v14 = vor.u32 %v144_v56, %v143_v35  ;;  %v148_v6 = vor.u32 %v147_v32, %v146_v22 }
 0x107   :  { %v511_v51 = vsub.s32 4294967266, %v6049_v28  ;;  %v408_v45 = vsub.s32 4294967266, %v6056_v16  ;;  %v805_v8 = vadd.s32 536870912, %v804_v53  ;;  %v151_v7 = vor.u32 %v150_v42, %v149_v27 }
 0x108   :  { %v7486_v41 = vand.u32 2147483647, %v7484_v38  ;;  %v312_v61 = vmul.f32 %v311_v58, %v309_v25  ;;  %v4056_v39 = vadd.s32 4294967294, %v606_v57  ;;  %v134_v0 = vor.u32 8388608, %v133_v50 }
 0x109   :  { %vm160_vm1 = vcmp.lt.s32.totalorder %v7478_v47, 3  ;;  %v4060_v34 = vadd.s32 4294967294, %v709_v33  ;;  %v6081_v56 = vshrl.u32 %v805_v8, 30  ;;  %vm158_vm2 = vcmp.lt.s32.totalorder %v7478_v47, 1 }
 0x10a   :  { %vm6076_vm0 = vcmp.le.f32.partialorder %v7486_v41, 0.7853982  ;;  %v172_v2 = vsel %vm160_vm1, %v5950_v17, %v171_v24  ;;  %v4067_v59 = vmin.u32 %v913_v37, %v6052_v46  ;;  %v166_v35 = vsel %vm158_vm2, %v145_v14, %v148_v6 }
 0x10b   :  { %v168_v25 = vsel %vm160_vm1, %v151_v7, %v5988_v21  ;;  %v170_v57 = vsel %vm158_vm2, %v148_v6, %v151_v7  ;;  %v512_v50 = vadd.s32 127, %v511_v51  ;;  %v409_v22 = vadd.s32 127, %v408_v45 }
 0x10c   :  { %v807_v32 = vshll.u32 %v6081_v56, 30  ;;  %vm159_vm3 = vcmp.lt.s32.totalorder %v7478_v47, 2  ;;  %vm4057_vm4 = vcmp.lt.s32.totalorder %v4056_v39, 0  ;;  %v163_v17 = vsel %vm161_vm8, %v151_v7, 2102212464 }
 0x10d   :  { %v173_v24 = vsel %vm159_vm3, %v170_v57, %v172_v2  ;;  %v174_v33 = vshll.u32 %v134_v0, 8  ;;  %v404_v27 = vsub.s32 32, %v6056_v16  ;;  %v142_v42 = vshrl.u32 %v7474_v3, %v5336_v15 }
 0x10e   :  { %v6102_v21 = vsub.s32 %v804_v53, %v807_v32  ;;  %v169_v58 = vsel %vm159_vm3, %v166_v35, %v168_v25  ;;  %vm4061_vm6 = vcmp.lt.s32.totalorder %v4060_v34, 0  ;;  %v915_v37 = vclz %v4067_v59 }
 0x10f   :  { %v6108_v51 = vmul.u32.u64.low %v174_v33, %v173_v24  ;;  %v6109_v45 = vmul.u32.u64.high %v174_v33, %v173_v24, %v6108_v51  ;;  %v6111_v8 = vsel %vm4057_vm4, 0, %v4056_v39  ;;  %v162_v41 = vsel %vm158_vm2, %v142_v42, %v145_v14 }
 0x110   :  { %v810_v7 = vsub.s32 0, %v6102_v21  ;;  %v164_v53 = vsel %vm160_vm1, %v148_v6, %v163_v17  ;;  %v491_v15 = vadd.s32 %v5574_v48, %v5569_v60  ;;  %v410_v3 = vshll.u32 %v409_v22, 23 }
 0x111   :  { %v6120_v0 = vmul.u32.u64.low %v174_v33, %v169_v58  ;;  %v6121_v2 = vmul.u32.u64.high %v174_v33, %v169_v58, %v6120_v0  ;;  %v318_v39 = vsel %vm6076_vm0, 0, %v6036_v40  ;;  %v507_v59 = vsub.s32 32, %v6049_v28 }
 0x112   :  { %v406_v35 = vshrl.u32 %v6040_v19, %v404_v27  ;;  %v4063_v14 = vmin.u32 %v810_v7, %v6102_v21  ;;  %v6130_v25 = vsel %vm4061_vm6, 0, %v4060_v34  ;;  %v614_v6 = vsub.s32 4294967266, %v6111_v8 }
 0x113   :  { %v4068_v60 = vadd.s32 4294967294, %v915_v37  ;;  %v165_v48 = vsel %vm159_vm3, %v162_v41, %v164_v53  ;;  %v313_v57 = vxor.u32 2147483648, %v312_v61  ;;  %v513_v22 = vshll.u32 %v512_v50, 23 }
 0x114   :  { %v521_v32 = vsub.s32 4, %v5811_v13  ;;  %v812_v17 = vclz %v4063_v14  ;;  %v405_v24 = vshll.u32 %v5918_v54, %v6056_v16  ;;  %v411_v42 = vor.u32 4788187, %v410_v3 }
 0x115   :  { %vm183_vm7 = vc.u32 %v6109_v45, %v6120_v0  ;;  %v184_v19 = vadd.s32 1, %v6121_v2  ;;  %v509_v34 = vshrl.u32 %v491_v15, %v507_v59  ;;  %v717_v27 = vsub.s32 4294967266, %v6130_v25 }
 0x116   :  { %v4064_v58 = vadd.s32 4294967294, %v812_v17  ;;  %v181_v47 = vmul.u32 %v174_v33, %v165_v48  ;;  %v407_v37 = vor.u32 %v406_v35, %v405_v24  ;;  %v615_v51 = vadd.s32 127, %v614_v6 }
 0x117   :  { %vm4069_vm8 = vcmp.lt.s32.totalorder %v4068_v60, 0  ;;  %v185_v50 = vsel %vm183_vm7, %v184_v19, %v6121_v2  ;;  %v314_v7 = vsel %vm231_vm5, %v313_v57, %v312_v61  ;;  %v508_v54 = vshll.u32 %v5901_v30, %v6049_v28  ;;  %v7489_v28 = vld [vmem:[#allocation2_spill] sm:$0xff] }
 0x118   :  { %vm4065_vm9 = vcmp.lt.s32.totalorder %v4064_v58, 0  ;;  %v186_v16 = vadd.s32 %v185_v50, %v181_v47  ;;  %v514_v41 = vor.u32 4788187, %v513_v22  ;;  %v412_v53 = vand.u32 2147483647, %v411_v42 }
 0x119   :  { %v610_v15 = vsub.s32 32, %v6111_v8  ;;  %v815_v3 = vsel %vm4065_vm9, 0, %v4064_v58  ;;  %v718_v59 = vadd.s32 127, %v717_v27  ;;  %v6148_v33 = vsel %vm4069_vm8, 0, %v4068_v60 }
 0x11a   :  { %v820_v35 = vsub.s32 4294967266, %v815_v3  ;;  %v187_v14 = vadd.s32 536870912, %v186_v16  ;;  %v510_v6 = vor.u32 %v509_v34, %v508_v54  ;;  %v414_v2 = vcvt.s32.f32 %v407_v37 }
 0x11b   :  { %v594_v61 = vadd.s32 %v5779_v26, %v5789_v10  ;;  %v616_v48 = vshll.u32 %v615_v51, 23  ;;  %v317_v30 = vsel %vm6076_vm0, %v7484_v38, %v314_v7  ;;  %vm334_vm10 = vcmp.lt.s32.totalorder %v7489_v28, 0 }
 0x11c   :  { %v713_v57 = vsub.s32 32, %v6130_v25  ;;  %v821_v22 = vadd.s32 127, %v820_v35  ;;  %v6157_v17 = vshrl.u32 %v187_v14, 30  ;;  %v515_v60 = vand.u32 2147483647, %v514_v41 }
 0x11d   :  { %v415_v24 = vmul.f32 %v414_v2, %v412_v53  ;;  %v612_v42 = vshrl.u32 %v594_v61, %v610_v15  ;;  %v923_v19 = vsub.s32 4294967266, %v6148_v33  ;;  %v697_v26 = vadd.s32 %v5774_v49, %v5785_v12 }
 0x11e   :  { %v719_v10 = vshll.u32 %v718_v59, 23  ;;  %v816_v34 = vsub.s32 32, %v815_v3  ;;  %v189_v27 = vshll.u32 %v6157_v17, 30  ;;  %4896 = vcosq.f32 %v317_v30 }
 0x11f   :  { %v517_v58 = vcvt.s32.f32 %v510_v6  ;;  %v7490_v47 = vand.u32 2147483647, %v7489_v28  ;;  %v611_v51 = vshll.u32 %v5973_v18, %v6111_v8  ;;  %v617_v50 = vor.u32 4788187, %v616_v48 }
 0x120   :  { %v715_v7 = vshrl.u32 %v697_v26, %v713_v57  ;;  %v800_v49 = vadd.s32 %v6016_v4, %v6005_v5  ;;  %v822_v12 = vshll.u32 %v821_v22, 23  ;;  %v6173_v54 = vsub.s32 %v186_v16, %v189_v27  ;;  %v7493_v4 = vld [vmem:[#allocation5_spill] sm:$0xff] }
 0x121   :  { %vm6165_vm11 = vcmp.le.f32.partialorder %v7490_v47, 0.7853982  ;;  %v518_v41 = vmul.f32 %v517_v58, %v515_v60  ;;  %v416_v53 = vxor.u32 2147483648, %v415_v24  ;;  %v613_v15 = vor.u32 %v612_v42, %v611_v51 }
 0x122   :  { %v924_v59 = vadd.s32 127, %v923_v19  ;;  %v714_v35 = vshll.u32 %v5983_v55, %v6130_v25  ;;  %v720_v14 = vor.u32 4788187, %v719_v10  ;;  %v818_v6 = vshrl.u32 %v800_v49, %v816_v34 }
 0x123   :  { %v192_v2 = vsub.s32 0, %v6173_v54  ;;  %4898 = vsinq.f32 %v317_v30  ;;  %v418_v18 = vsub.s32 4, %v5855_v20  ;;  %v618_v8 = vand.u32 2147483647, %v617_v50 }
 0x124   :  { %v919_v5 = vsub.s32 32, %v6148_v33  ;;  %v7494_v16 = vand.u32 2147483647, %v7493_v4  ;;  %v716_v48 = vor.u32 %v715_v7, %v714_v35  ;;  %v817_v57 = vshll.u32 %v6102_v21, %v815_v3 }
 0x125   :  { %v823_v55 = vor.u32 4788187, %v822_v12  ;;  %v4039_v25 = vmin.u32 %v192_v2, %v6173_v54  ;;  %v417_v30 = vsel %vm334_vm10, %v416_v53, %v415_v24  ;;  %v620_v22 = vcvt.s32.f32 %v613_v15  ;;  %v7497_v2 = vld [vmem:[#allocation6_spill] sm:$0xff] }
 0x126   :  { %vm6182_vm12 = vcmp.le.f32.partialorder %v7494_v16, 0.7853982  ;;  %v903_v60 = vadd.s32 %v5888_v29, %v5882_v9  ;;  %v925_v42 = vshll.u32 %v924_v59, 23  ;;  %v519_v19 = vxor.u32 2147483648, %v518_v41 }
 0x127   :  { %v721_v26 = vand.u32 2147483647, %v720_v14  ;;  %v819_v10 = vor.u32 %v818_v6, %v817_v57  ;;  %v194_v34 = vclz %v4039_v25  ;;  %v6196_v21 = vand.u32 3, %v318_v39 }
 0x128   :  { %vm437_vm5 = vcmp.lt.s32.totalorder %v7493_v4, 0  ;;  %v621_v3 = vmul.f32 %v620_v22, %v618_v8  ;;  %v921_v27 = vshrl.u32 %v903_v60, %v919_v5  ;;  %v420_v24 = vsel %vm6165_vm11, %v7489_v28, %v417_v30  ;;  %v6202_v47 = vpop.eup %4896 }
 0x129   :  { %v723_v9 = vcvt.s32.f32 %v716_v48  ;;  %v824_v29 = vand.u32 2147483647, %v823_v55  ;;  %v4040_v58 = vadd.s32 4294967294, %v194_v34  ;;  %v522_v36 = vsel %vm437_vm5, %v521_v32, %v5811_v13 }
 0x12a   :  { %v419_v40 = vsel %vm334_vm10, %v418_v18, %v5855_v20  ;;  %v920_v39 = vshll.u32 %v6052_v46, %v6148_v33  ;;  %v926_v51 = vor.u32 4788187, %v925_v42  ;;  %v520_v50 = vsel %vm437_vm5, %v519_v19, %v518_v41 }
 0x12b   :  { %v724_v7 = vmul.f32 %v723_v9, %v721_v26  ;;  %v826_v49 = vcvt.s32.f32 %v819_v10  ;;  %vm4041_vm13 = vcmp.lt.s32.totalorder %v4040_v58, 0  ;;  %4900 = vcosq.f32 %v420_v24 }
 0x12c   :  { %v622_v12 = vxor.u32 2147483648, %v621_v3  ;;  %v922_v53 = vor.u32 %v921_v27, %v920_v39  ;;  %v197_v15 = vsel %vm4041_vm13, 0, %v4040_v58  ;;  %v182_v13 = vadd.s32 %v6120_v0, %v6109_v45 }
 0x12d   :  { %v827_v59 = vmul.f32 %v826_v49, %v824_v29  ;;  %v198_v32 = vsub.s32 32, %v197_v15  ;;  %v202_v35 = vsub.s32 4294967266, %v197_v15  ;;  %v4899_v14 = vpop.eup %4898  ;;  %vm327_vm14 = vcmp.eq.s32.totalorder %v6196_v21, 2 }
 0x12e   :  { %v523_v20 = vsel %vm6182_vm12, %v7493_v4, %v520_v50  ;;  %4902 = vsinq.f32 %v420_v24  ;;  %vm540_vm15 = vcmp.lt.s32.totalorder %v5293_v43, 0  ;;  %v927_v46 = vand.u32 2147483647, %v926_v51 }
 0x12f   :  { %vm324_vm0 = vcmp.eq.s32.totalorder %v6196_v21, 0  ;;  %v725_v33 = vxor.u32 2147483648, %v724_v7  ;;  %v199_v41 = vshll.u32 %v6173_v54, %v197_v15  ;;  %v200_v6 = vshrl.u32 %v182_v13, %v198_v32 }
 0x130   :  { %v203_v45 = vadd.s32 127, %v202_v35  ;;  %v524_v0 = vsel %vm6182_vm12, 0, %v522_v36  ;;  %vm643_vm1 = vcmp.lt.s32.totalorder %v7497_v2, 0  ;;  %v623_v18 = vsel %vm540_vm15, %v622_v12, %v621_v3 }
 0x131   :  { %v929_v8 = vcvt.s32.f32 %v922_v53  ;;  %4904 = vcosq.f32 %v523_v20  ;;  %v828_v5 = vxor.u32 2147483648, %v827_v59  ;;  %v201_v16 = vor.u32 %v200_v6, %v199_v41 }
 0x132   :  { %v204_v48 = vshll.u32 %v203_v45, 23  ;;  %4906 = vsinq.f32 %v523_v20  ;;  %v421_v57 = vsel %vm6165_vm11, 0, %v419_v40  ;;  %v7498_v54 = vand.u32 2147483647, %v5293_v43 }
 0x133   :  { %v930_v61 = vmul.f32 %v929_v8, %v927_v46  ;;  %v328_v25 = vxor.u32 2147483648, %v6202_v47  ;;  %v726_v30 = vsel %vm643_vm1, %v725_v33, %v724_v7  ;;  %v325_v42 = vxor.u32 2147483648, %v4899_v14 }
 0x134   :  { %vm6230_vm2 = vcmp.le.f32.partialorder %v7498_v54, 0.7853982  ;;  %v205_v60 = vor.u32 4788187, %v204_v48  ;;  %v7501_v37 = vand.u32 2147483647, %v7497_v2  ;;  %v208_v27 = vcvt.s32.f32 %v201_v16 }
 0x135   :  { %v626_v22 = vsel %vm6230_vm2, %v5293_v43, %v623_v18  ;;  %v727_v26 = vsub.s32 4, %v5942_v63  ;;  %vm746_vm4 = vcmp.lt.s32.totalorder %v7477_v62, 0  ;;  %vm323_vm6 = vcmp.lt.s32.totalorder %v6196_v21, 2  ;;  %v4901_v24 = vpop.eup %4900 }
 0x136   :  { %vm6242_vm3 = vcmp.le.f32.partialorder %v7501_v37, 0.7853982  ;;  %v6249_v10 = vand.u32 3, %v524_v0  ;;  %v829_v34 = vsel %vm746_vm4, %v828_v5, %v827_v59  ;;  %v206_v3 = vand.u32 2147483647, %v205_v60 }
 0x137   :  { %v6253_v9 = vand.u32 3, %v421_v57  ;;  %v729_v29 = vsel %vm6242_vm3, %v7497_v2, %v726_v30  ;;  %4908 = vcosq.f32 %v626_v22  ;;  %v931_v58 = vxor.u32 2147483648, %v930_v61 }
 0x138   :  { %v329_v36 = vsel %vm327_vm14, %v328_v25, %v4899_v14  ;;  %4910 = vsinq.f32 %v626_v22  ;;  %v7504_v40 = vand.u32 2147483647, %v7477_v62  ;;  %v209_v51 = vmul.f32 %v208_v27, %v206_v3  ;;  %v4903_v50 = vpop.eup %4902 }
 0x139   :  { %v326_v7 = vsel %vm324_vm0, %v6202_v47, %v325_v42  ;;  %v728_v49 = vsel %vm643_vm1, %v727_v26, %v5942_v63  ;;  %v624_v12 = vsub.s32 4, %v5926_v1  ;;  %vm321_vm8 = vweird.f32 %v7484_v38  ;;  %v961_v42 = vpop.permute.xlu0 %960  ;;  %v966_v38 = vpop.permute.xlu1 %965 }
 0x13a   :  { %vm6262_vm7 = vcmp.le.f32.partialorder %v7504_v40, 0.7853982  ;;  %4912 = vcosq.f32 %v729_v29  ;;  %v7507_v15 = vand.u32 2147483647, %v5356_v31  ;;  %vm849_vm10 = vcmp.lt.s32.totalorder %v5356_v31, 0 }
 0x13b   :  { %v832_v53 = vsel %vm6262_vm7, %v7477_v62, %v829_v34  ;;  %v210_v47 = vxor.u32 2147483648, %v209_v51  ;;  %vm530_vm11 = vcmp.eq.s32.totalorder %v6249_v10, 0  ;;  %v431_v63 = vxor.u32 2147483648, %v4901_v24  ;;  %v4905_v32 = vpop.eup %4904 }
 0x13c   :  { %vm6279_vm9 = vcmp.le.f32.partialorder %v7507_v15, 0.7853982  ;;  %4914 = vsinq.f32 %v729_v29  ;;  %v932_v13 = vsel %vm849_vm10, %v931_v58, %v930_v61  ;;  %vm128_vm12 = vcmp.lt.s32.totalorder %v7485_v52, 0  ;;  %v4907_v46 = vpop.eup %4906 }
 0x13d   :  { %4916 = vcosq.f32 %v832_v53  ;;  %vm6290_vm5 = vcmp.le.f32.partialorder %v126_v23, 0.7853982  ;;  %v211_v14 = vsel %vm128_vm12, %v210_v47, %v209_v51  ;;  %v212_v20 = vsub.s32 4, %v6157_v17 }
 0x13e   :  { %v428_v33 = vxor.u32 2147483648, %v4903_v50  ;;  %v625_v41 = vsel %vm540_vm15, %v624_v12, %v5926_v1  ;;  %4918 = vsinq.f32 %v832_v53  ;;  %v214_v6 = vsel %vm6290_vm5, %v7485_v52, %v211_v14  ;;  %v971_v53 = vpop.permute.xlu0 %970 }
 0x13f   :  { %vm427_vm13 = vcmp.eq.s32.totalorder %v6253_v9, 0  ;;  %vm430_vm14 = vcmp.eq.s32.totalorder %v6253_v9, 2  ;;  %v935_v23 = vsel %vm6279_vm9, %v5356_v31, %v932_v13  ;;  %4920 = vcosq.f32 %v214_v6 }
 0x140   :  { %v330_v45 = vsel %vm323_vm6, %v326_v7, %v329_v36  ;;  %v730_v1 = vsel %vm6242_vm3, 0, %v728_v49  ;;  %v830_v0 = vsub.s32 4, %v6081_v56  ;;  %4922 = vsinq.f32 %v214_v6 }
 0x141   :  { %v531_v18 = vxor.u32 2147483648, %v4907_v46  ;;  %v534_v8 = vxor.u32 2147483648, %v4905_v32  ;;  %v627_v5 = vsel %vm6230_vm2, 0, %v625_v41  ;;  %v213_v16 = vsel %vm128_vm12, %v212_v20, %v6157_v17  ;;  %v4909_v48 = vpop.eup %4908 }
 0x142   :  { %v429_v57 = vsel %vm427_vm13, %v4901_v24, %v428_v33  ;;  %v432_v54 = vsel %vm430_vm14, %v431_v63, %v4903_v50  ;;  %v933_v21 = vsub.s32 4, %v5992_v44  ;;  %4924 = vcosq.f32 %v935_v23  ;;  %v4911_v61 = vpop.eup %4910 }
 0x143   :  { %vm533_vm15 = vcmp.eq.s32.totalorder %v6249_v10, 2  ;;  %vm426_vm0 = vcmp.lt.s32.totalorder %v6253_v9, 2  ;;  %v6321_v25 = vand.u32 3, %v730_v1  ;;  %4926 = vsinq.f32 %v935_v23  ;;  %v976_v1 = vpop.permute.xlu1 %975 }
 0x144   :  { %v331_v55 = vsel %vm321_vm8, nan, %v330_v45  ;;  %v631_v30 = vand.u32 3, %v627_v5  ;;  %v831_v17 = vsel %vm746_vm4, %v830_v0, %v6081_v56  ;;  %v215_v22 = vsel %vm6290_vm5, 0, %v213_v16  ;;  %v4913_v60 = vpop.eup %4912  ;;  %v981_v16 = vpop.permute.xlu0 %980 }
 0x145   :  { %v532_v37 = vsel %vm530_vm11, %v4905_v32, %v531_v18  ;;  %v535_v19 = vsel %vm533_vm15, %v534_v8, %v4907_v46  ;;  %vm424_vm1 = vweird.f32 %v7489_v28  ;;  %v433_v26 = vsel %vm426_vm0, %v429_v57, %v432_v54 }
 0x146   :  { %v4915_v34 = vpop.eup %4914  ;;  %vm529_vm2 = vcmp.lt.s32.totalorder %v6249_v10, 2  ;;  %v634_v3 = vxor.u32 2147483648, %v4911_v61  ;;  %v637_v27 = vxor.u32 2147483648, %v4909_v48  ;;  %v934_v56 = vsel %vm849_vm10, %v933_v21, %v5992_v44 }
 0x147   :  { %v4917_v24 = vpop.eup %4916  ;;  %v999_v9 = vmul.f32 %v966_v38, %v331_v55  ;;  %vm736_vm3 = vcmp.eq.s32.totalorder %v6321_v25, 0  ;;  %v833_v29 = vsel %vm6262_vm7, 0, %v831_v17  ;;  %v219_v58 = vand.u32 3, %v215_v22  ;;  %v986_v17 = vpop.permute.xlu1 %985  ;;  %v1010_v38 = vld [vmem:[%s7397_s0 + $0x20] sm:$0xff] }
 0x148   :  { %v4919_v28 = vpop.eup %4918  ;;  %v536_v36 = vsel %vm529_vm2, %v532_v37, %v535_v19  ;;  %v434_v40 = vsel %vm424_vm1, nan, %v433_v26  ;;  %vm739_vm4 = vcmp.eq.s32.totalorder %v6321_v25, 2  ;;  %vm630_vm6 = vweird.f32 %v5293_v43  ;;  %v1006_v19 = vld [vmem:[%s7397_s0] sm:$0xff]  ;;  %v1008_v26 = vld [vmem:[%s7397_s0 + $0x10] sm:$0xff] }
 0x149   :  { %vm632_vm8 = vcmp.lt.s32.totalorder %v631_v30, 2  ;;  %v4921_v10 = vpop.eup %4920  ;;  %v740_v51 = vxor.u32 2147483648, %v4913_v60  ;;  %vm633_vm11 = vcmp.eq.s32.totalorder %v631_v30, 0  ;;  %vm636_vm10 = vcmp.eq.s32.totalorder %v631_v30, 2 }
 0x14a   :  { %v936_v44 = vsel %vm6279_vm9, 0, %v934_v56  ;;  %v4923_v50 = vpop.eup %4922  ;;  %v635_v7 = vsel %vm633_vm11, %v4909_v48, %v634_v3  ;;  %v638_v39 = vsel %vm636_vm10, %v637_v27, %v4911_v61  ;;  %v837_v49 = vand.u32 3, %v833_v29  ;;  %v1011_v3 = vld [vmem:[%s7397_s0 + $0x28] sm:$0xff]  ;;  %v1012_v27 = vld [vmem:[%s7397_s0 + $0x30] sm:$0xff]  ;;  %v1013_v56 = vld [vmem:[%s7397_s0 + $0x38] sm:$0xff] }
 0x14b   :  { %v225_v12 = vxor.u32 2147483648, %v4921_v10  ;;  %v840_v15 = vxor.u32 2147483648, %v4919_v28  ;;  %v843_v47 = vxor.u32 2147483648, %v4917_v24  ;;  %v222_v63 = vxor.u32 2147483648, %v4923_v50 }
 0x14c   :  { %vm224_vm7 = vcmp.eq.s32.totalorder %v219_v58, 2  ;;  %v4925_v13 = vpop.eup %4924  ;;  %v737_v32 = vxor.u32 2147483648, %v4915_v34  ;;  %v940_v35 = vand.u32 3, %v936_v44  ;;  %vm221_vm12 = vcmp.eq.s32.totalorder %v219_v58, 0 }
 0x14d   :  { %v226_v14 = vsel %vm224_vm7, %v225_v12, %v4923_v50  ;;  %v4927_v20 = vpop.eup %4926  ;;  %v741_v59 = vsel %vm739_vm4, %v740_v51, %v4915_v34  ;;  %vm218_vm9 = vweird.f32 %v7485_v52  ;;  %vm220_vm5 = vcmp.lt.s32.totalorder %v219_v58, 2  ;;  %v1009_v34 = vld [vmem:[%s7397_s0 + $0x18] sm:$0xff] }
 0x14e   :  { %v223_v46 = vsel %vm221_vm12, %v4921_v10, %v222_v63  ;;  %v639_v33 = vsel %vm632_vm8, %v635_v7, %v638_v39  ;;  %vm839_vm13 = vcmp.eq.s32.totalorder %v837_v49, 0  ;;  %vm842_vm14 = vcmp.eq.s32.totalorder %v837_v49, 2 }
 0x14f   :  { %v227_v41 = vsel %vm220_vm5, %v223_v46, %v226_v14  ;;  %v841_v6 = vsel %vm839_vm13, %v4917_v24, %v840_v15  ;;  %v844_v23 = vsel %vm842_vm14, %v843_v47, %v4919_v28  ;;  %vm1017_vm15 = vcmask 130048   ;;  %v4086_v24 = vld [vmem:[%s7458_s27 + $0x1] ss:$0 sm:$0xff] }
 0x150   :  { %v228_v45 = vsel %vm218_vm9, nan, %v227_v41  ;;  %v738_v0 = vsel %vm736_vm3, %v4913_v60, %v737_v32  ;;  %v943_v18 = vxor.u32 2147483648, %v4927_v20  ;;  %v946_v8 = vxor.u32 2147483648, %v4925_v13  ;;  %v991_v60 = vpop.permute.xlu0 %990 }
 0x151   :  { %v998_v5 = vmul.f32 %v961_v42, %v228_v45  ;;  %vm527_vm0 = vweird.f32 %v7493_v4  ;;  %v640_v52 = vsel %vm630_vm6, nan, %v639_v33  ;;  %vm838_vm1 = vcmp.lt.s32.totalorder %v837_v49, 2 }
 0x152   :  { %v537_v48 = vsel %vm527_vm0, nan, %v536_v36  ;;  %v1000_v57 = vmul.f32 %v971_v53, %v434_v40  ;;  %vm735_vm2 = vcmp.lt.s32.totalorder %v6321_v25, 2  ;;  %v845_v54 = vsel %vm838_vm1, %v841_v6, %v844_v23 }
 0x153   :  { %4376 = vmatprep.mubr.msk.f32.mxu0 %vm1017_vm15, %v998_v5  ;;  %v742_v21 = vsel %vm735_vm2, %v738_v0, %v741_v59  ;;  %vm942_vm4 = vcmp.eq.s32.totalorder %v940_v35, 0  ;;  %vm945_vm3 = vcmp.eq.s32.totalorder %v940_v35, 2  ;;  %v1002_v61 = vmul.f32 %v981_v16, %v640_v52 }
 0x154   :  { %4377 = vmatmul.mubr.msk.f32.vlgmr.msra.gmra.mrb[0].mxu0 %vm1017_vm15, %v999_v9  ;;  %v944_v55 = vsel %vm942_vm4, %v4925_v13, %v943_v18  ;;  %v947_v4 = vsel %vm945_vm3, %v946_v8, %v4927_v20  ;;  %vm836_vm8 = vweird.f32 %v7477_v62  ;;  %v1001_v43 = vmul.f32 %v976_v1, %v537_v48 }
 0x155   :  { %4379 = vmatprep.mubr.msk.f32.mxu0 %vm1017_vm15, %v1000_v57  ;;  %4389 = vmatpush3.msra.mxu0 %v6023_v11  ;;  %vm733_vm6 = vweird.f32 %v7497_v2  ;;  %v846_v25 = vsel %vm836_vm8, nan, %v845_v54  ;;  %vm941_vm11 = vcmp.lt.s32.totalorder %v940_v35, 2  ;;  %vm939_vm10 = vweird.f32 %v5356_v31  ;;  %v996_v11 = vpop.permute.xlu1 %995  ;;  %v1007_v31 = vld [vmem:[%s7397_s0 + $0x8] sm:$0xff] }
 0x156   :  { %v743_v30 = vsel %vm733_vm6, nan, %v742_v21  ;;  %v948_v22 = vsel %vm941_vm11, %v944_v55, %v947_v4  ;;  %v1004_v42 = vmul.f32 %v991_v60, %v846_v25  ;;  %vm1147_vm7 = vcmask 64512  }
 0x157   :  { %v1003_v37 = vmul.f32 %v986_v17, %v743_v30  ;;  %v949_v62 = vsel %vm939_vm10, nan, %v948_v22  ;;  %vm1292_vm12 = vcmask 261120   ;;  %vm1450_vm9 = vcmask 523264  }
 0x158   :  { %4380 = vmatmul.mubr.msk.f32.gmra.mrb[2].mxu0 %vm1017_vm15, %v1001_v43  ;;  %v1005_v2 = vmul.f32 %v996_v11, %v949_v62  ;;  %vm5112_vm5 = vmmov 0   ;;  %vm4028_vm14 = vcmask 7168  }
 0x159   :  { %4382 = vmatprep.mubr.msk.f32.mxu0 %vm1017_vm15, %v1002_v61 }
 0x15c   :  { %4383 = vmatmul.mubr.msk.f32.gmra.mrb[4].mxu0 %vm1017_vm15, %v1003_v37 }
 0x15d   :  { %4385 = vmatprep.mubr.msk.f32.mxu0 %vm1017_vm15, %v1004_v42 }
 0x160   :  { %4386 = vmatmul.mubr.msk.f32.gmra.mrb[6].mxu0 %vm1017_vm15, %v1005_v2 }
 0x161   :  { %4390 = vmatprep.mubr.msk.f32.mxu0 %vm1147_vm7, %v1006_v19 }
 0x164   :  { %4391 = vmatmul.mubr.msk.f32.vlgmr.msra.gmra.mrb[0].mxu0 %vm1147_vm7, %v1007_v31 }
 0x165   :  { %4393 = vmatprep.mubr.msk.f32.mxu0 %vm1147_vm7, %v1008_v26 }
 0x168   :  { %4394 = vmatmul.mubr.msk.f32.gmra.mrb[2].mxu0 %vm1147_vm7, %v1009_v34 }
 0x169   :  { %4396 = vmatprep.mubr.msk.f32.mxu0 %vm1147_vm7, %v1010_v38 }
 0x16c   :  { %4397 = vmatmul.mubr.msk.f32.gmra.mrb[4].mxu0 %vm1147_vm7, %v1011_v3 }
 0x16d   :  { %4399 = vmatprep.mubr.msk.f32.mxu0 %vm1147_vm7, %v1012_v27 }
 0x170   :  { %4400 = vmatmul.mubr.msk.f32.gmra.mrb[6].mxu0 %vm1147_vm7, %v1013_v56 }
 0x237   :  { %v4392_v9 = vpop.f32.mrb[0].mxu0 }
 0x238   :  { %v6401_v29 = vadd.f32 %v4392_v9, %v4086_v24  ;;  %v1238_v58 = vpop.f32.mrb[1].mxu0  ;;  %v1426_v9 = vld [vmem:[%s7398_s10] sm:$0xff] }
 0x239   :  { %v6403_v28 = vadd.f32 %v4086_v24, %v1238_v58  ;;  %v1428_v58 = vld [vmem:[%s7398_s10 + $0x10] sm:$0xff] }
 0x23a   :  { %v1296_v36 = vsel %vm1292_vm12, %v6401_v29, 0.0 }
 0x23b   :  { %1297 = vadd.xlane.f32.xlu1 %v1296_v36  ;;  %v4395_v40 = vpop.f32.mrb[2].mxu0  ;;  %v1293_v10 = vsel %vm1292_vm12, %v6403_v28, 0.0  ;;  %v1427_v36 = vld [vmem:[%s7398_s10 + $0x8] sm:$0xff] }
 0x23c   :  { %v6409_v51 = vadd.f32 %v4395_v40, %v4086_v24  ;;  %1294 = vadd.xlane.f32.xlu0 %v1293_v10  ;;  %v1248_v44 = vpop.f32.mrb[3].mxu0  ;;  %v1429_v40 = vld [vmem:[%s7398_s10 + $0x18] sm:$0xff]  ;;  %v1729_v10 = vld [vmem:[%s7399_s11] sm:$0xff] }
 0x23d   :  { %v6413_v7 = vadd.f32 %v4086_v24, %v1248_v44  ;;  %v1730_v44 = vld [vmem:[%s7399_s11 + $0x8] sm:$0xff] }
 0x23e   :  { %v1302_v50 = vsel %vm1292_vm12, %v6409_v51, 0.0 }
 0x23f   :  { %v4398_v39 = vpop.f32.mrb[4].mxu0  ;;  %v1299_v47 = vsel %vm1292_vm12, %v6413_v7, 0.0 }
 0x240   :  { %1303 = vadd.xlane.f32.xlu0 %v1302_v50  ;;  %v1258_v49 = vpop.f32.mrb[5].mxu0  ;;  %v6417_v53 = vadd.f32 %v4398_v39, %v4086_v24  ;;  %v1731_v50 = vld [vmem:[%s7399_s11 + $0x10] sm:$0xff]  ;;  %v1732_v39 = vld [vmem:[%s7399_s11 + $0x18] sm:$0xff] }
 0x241   :  { %v6415_v12 = vadd.f32 %v4086_v24, %v1258_v49  ;;  %v1733_v49 = vld [vmem:[%s7399_s11 + $0x20] sm:$0xff] }
 0x242   :  { %v1308_v14 = vsel %vm1292_vm12, %v6417_v53, 0.0 }
 0x243   :  { %v4401_v15 = vpop.f32.mrb[6].mxu0  ;;  %v1305_v63 = vsel %vm1292_vm12, %v6415_v12, 0.0 }
 0x244   :  { %1300 = vadd.xlane.f32.xlu0 %v1299_v47  ;;  %1306 = vadd.xlane.f32.xlu1 %v1305_v63  ;;  %v1268_v13 = vpop.f32.mrb[7].mxu0  ;;  %v6425_v35 = vadd.f32 %v4401_v15, %v4086_v24  ;;  %v1734_v15 = vld [vmem:[%s7399_s11 + $0x28] sm:$0xff]  ;;  %v1735_v47 = vld [vmem:[%s7399_s11 + $0x30] sm:$0xff]  ;;  %v1736_v63 = vld [vmem:[%s7399_s11 + $0x38] sm:$0xff] }
 0x245   :  { %v6423_v32 = vadd.f32 %v4086_v24, %v1268_v13  ;;  %v1422_v13 = vld [vmem:[%s7400_s8] sm:$0xff] }
 0x246   :  { %v1314_v59 = vsel %vm1292_vm12, %v6425_v35, 0.0  ;;  %4418 = vmatprep.mubr.msk.f32.mxu1 %vm1450_vm9, %v1422_v13 }
 0x247   :  { %v1311_v20 = vsel %vm1292_vm12, %v6423_v32, 0.0 }
 0x248   :  { %1309 = vadd.xlane.f32.xlu0 %v1308_v14  ;;  %1312 = vadd.xlane.f32.xlu1 %v1311_v20 }
 0x24c   :  { %1315 = vadd.xlane.f32.xlu0 %v1314_v59 }
 0x2c8   :  { %v1298_v46 = vpop.xlane.xlu1 %1297 }
 0x2c9   :  { %v1319_v33 = vmul.f32 0.03125, %v1298_v46  ;;  %v1295_v41 = vpop.xlane.xlu0 %1294 }
 0x2ca   :  { %v1318_v6 = vmul.f32 0.03125, %v1295_v41 }
 0x2cb   :  { %v6434_v23 = vsub.f32 %v6401_v29, %v1319_v33 }
 0x2cc   :  { %v6437_v45 = vsub.f32 %v6403_v28, %v1318_v6 }
 0x2cd   :  { %v1304_v1 = vpop.xlane.xlu0 %1303  ;;  %v1335_v0 = vmul.f32 %v6434_v23, %v6434_v23 }
 0x2ce   :  { %v1321_v18 = vmul.f32 0.03125, %v1304_v1  ;;  %v1334_v8 = vmul.f32 %v6437_v45, %v6437_v45 }
 0x2cf   :  { %v1345_v5 = vsel %vm1292_vm12, %v1335_v0, 0.0 }
 0x2d0   :  { %v6445_v52 = vsub.f32 %v6409_v51, %v1321_v18  ;;  %1346 = vadd.xlane.f32.xlu0 %v1345_v5  ;;  %v1342_v16 = vsel %vm1292_vm12, %v1334_v8, 0.0 }
 0x2d1   :  { %v1301_v48 = vpop.xlane.xlu0 %1300  ;;  %v1307_v57 = vpop.xlane.xlu1 %1306  ;;  %1343 = vadd.xlane.f32.xlu1 %v1342_v16 }
 0x2d2   :  { %v1320_v54 = vmul.f32 0.03125, %v1301_v48  ;;  %v1322_v21 = vmul.f32 0.03125, %v1307_v57  ;;  %v1337_v61 = vmul.f32 %v6445_v52, %v6445_v52 }
 0x2d4   :  { %v6451_v55 = vsub.f32 %v6413_v7, %v1320_v54  ;;  %v6454_v4 = vsub.f32 %v6415_v12, %v1322_v21  ;;  %v1351_v43 = vsel %vm1292_vm12, %v1337_v61, 0.0  ;;  %v4087_v61 = vld [vmem:[%s7458_s27 + $0x8] ss:$0 sm:$0xff] }
 0x2d5   :  { %v1310_v25 = vpop.xlane.xlu0 %1309  ;;  %1352 = vadd.xlane.f32.xlu0 %v1351_v43  ;;  %v1313_v30 = vpop.xlane.xlu1 %1312 }
 0x2d6   :  { %v1323_v17 = vmul.f32 0.03125, %v1310_v25  ;;  %v1324_v22 = vmul.f32 0.03125, %v1313_v30  ;;  %v1336_v60 = vmul.f32 %v6451_v55, %v6451_v55  ;;  %v1338_v11 = vmul.f32 %v6454_v4, %v6454_v4 }
 0x2d8   :  { %v6460_v42 = vsub.f32 %v6417_v53, %v1323_v17  ;;  %v6463_v37 = vsub.f32 %v6423_v32, %v1324_v22  ;;  %v1348_v62 = vsel %vm1292_vm12, %v1336_v60, 0.0  ;;  %v1354_v38 = vsel %vm1292_vm12, %v1338_v11, 0.0 }
 0x2d9   :  { %v1316_v2 = vpop.xlane.xlu0 %1315  ;;  %1349 = vadd.xlane.f32.xlu1 %v1348_v62  ;;  %v4088_v62 = vld [vmem:[%s7458_s27 + $0x9] ss:$0 sm:$0xff] }
 0x2da   :  { %v1325_v19 = vmul.f32 0.03125, %v1316_v2  ;;  %v1339_v31 = vmul.f32 %v6460_v42, %v6460_v42  ;;  %v1340_v3 = vmul.f32 %v6463_v37, %v6463_v37 }
 0x2dc   :  { %v6471_v26 = vsub.f32 %v6425_v35, %v1325_v19  ;;  %v1357_v34 = vsel %vm1292_vm12, %v1339_v31, 0.0  ;;  %v1360_v24 = vsel %vm1292_vm12, %v1340_v3, 0.0 }
 0x2dd   :  { %1358 = vadd.xlane.f32.xlu0 %v1357_v34  ;;  %1355 = vadd.xlane.f32.xlu1 %v1354_v38 }
 0x2de   :  { %v1341_v27 = vmul.f32 %v6471_v26, %v6471_v26 }
 0x2e0   :  { %v1363_v56 = vsel %vm1292_vm12, %v1341_v27, 0.0 }
 0x2e1   :  { %1364 = vadd.xlane.f32.xlu0 %v1363_v56  ;;  %1361 = vadd.xlane.f32.xlu1 %v1360_v24 }
 0x2f2   :  { %1432 = vperm.xlu1 %4895, %v1426_v9  }
 0x2f6   :  { %1442 = vperm.xlu1 %4895, %v1428_v58  }
 0x2f7   :  { %1437 = vperm.xlu0 %4894, %v1427_v36  }
 0x2fa   :  { %1447 = vperm.xlu1 %4895, %v1429_v40  }
 0x2fb   :  { %1739 = vperm.xlu0 %4894, %v1729_v10  }
 0x2fe   :  { %1744 = vperm.xlu1 %4895, %v1730_v44  }
 0x2ff   :  { %1749 = vperm.xlu0 %4894, %v1731_v50  }
 0x302   :  { %1754 = vperm.xlu1 %4895, %v1732_v39  }
 0x303   :  { %1759 = vperm.xlu0 %4894, %v1733_v49  }
 0x306   :  { %1764 = vperm.xlu1 %4895, %v1734_v15  }
 0x307   :  { %1769 = vperm.xlu0 %4894, %v1735_v47  }
 0x30a   :  { %1774 = vperm.xlu1 %4895, %v1736_v63  }
 0x35d   :  { %v1347_v14 = vpop.xlane.xlu0 %1346 }
 0x35e   :  { %v1367_v20 = vmul.f32 0.03125, %v1347_v14  ;;  %v1344_v59 = vpop.xlane.xlu1 %1343 }
 0x35f   :  { %v1366_v46 = vmul.f32 0.03125, %v1344_v59 }
 0x360   :  { %v1375_v33 = vadd.f32 1e-05, %v1367_v20 }
 0x361   :  { %v1374_v41 = vadd.f32 1e-05, %v1366_v46 }
 0x362   :  { %4928 = vrsqrt.f32 %v1375_v33  ;;  %v1353_v6 = vpop.xlane.xlu0 %1352 }
 0x363   :  { %4930 = vrsqrt.f32 %v1374_v41  ;;  %v1369_v1 = vmul.f32 0.03125, %v1353_v6 }
 0x365   :  { %v1377_v0 = vadd.f32 1e-05, %v1369_v1 }
 0x366   :  { %v1350_v18 = vpop.xlane.xlu1 %1349 }
 0x367   :  { %4932 = vrsqrt.f32 %v1377_v0  ;;  %v1368_v8 = vmul.f32 0.03125, %v1350_v18  ;;  %v1423_v0 = vld [vmem:[%s7400_s8 + $0x8] sm:$0xff]  ;;  %v1584_v18 = vld [vmem:[%s7401_s9] sm:$0xff] }
 0x369   :  { %v1376_v5 = vadd.f32 1e-05, %v1368_v8 }
 0x36a   :  { %v1359_v16 = vpop.xlane.xlu0 %1358  ;;  %v1356_v48 = vpop.xlane.xlu1 %1355 }
 0x36b   :  { %4934 = vrsqrt.f32 %v1376_v5  ;;  %v1371_v57 = vmul.f32 0.03125, %v1359_v16  ;;  %v1370_v54 = vmul.f32 0.03125, %v1356_v48 }
 0x36c   :  { %v4929_v21 = vpop.eup %4928 }
 0x36d   :  { %v4931_v43 = vpop.eup %4930  ;;  %v1379_v25 = vadd.f32 1e-05, %v1371_v57  ;;  %v1378_v30 = vadd.f32 1e-05, %v1370_v54  ;;  %v1391_v17 = vmul.f32 %v4929_v21, %v6434_v23 }
 0x36e   :  { %v1365_v22 = vpop.xlane.xlu0 %1364  ;;  %v1362_v60 = vpop.xlane.xlu1 %1361  ;;  %v1390_v11 = vmul.f32 %v4931_v43, %v6437_v45 }
 0x36f   :  { %4936 = vrsqrt.f32 %v1379_v25  ;;  %v1373_v2 = vmul.f32 0.03125, %v1365_v22  ;;  %v1372_v19 = vmul.f32 0.03125, %v1362_v60  ;;  %v1403_v31 = vmul.f32 %v4087_v61, %v1391_v17 }
 0x370   :  { %4938 = vrsqrt.f32 %v1378_v30  ;;  %v1402_v34 = vmul.f32 %v4087_v61, %v1390_v11 }
 0x371   :  { %v4933_v38 = vpop.eup %4932  ;;  %v1381_v3 = vadd.f32 1e-05, %v1373_v2  ;;  %v1380_v27 = vadd.f32 1e-05, %v1372_v19  ;;  %v1415_v56 = vadd.f32 %v4088_v62, %v1403_v31 }
 0x372   :  { %v1414_v24 = vadd.f32 %v4088_v62, %v1402_v34  ;;  %v1393_v23 = vmul.f32 %v4933_v38, %v6445_v52  ;;  %v1433_v8 = vpop.permute.xlu1 %1432 }
 0x373   :  { %4940 = vrsqrt.f32 %v1381_v3 }
 0x374   :  { %4942 = vrsqrt.f32 %v1380_v27  ;;  %v4682_v9 = vpack.c.bf16 %v1415_v56, %v1414_v24  ;;  %v1405_v36 = vmul.f32 %v4087_v61, %v1393_v23 }
 0x375   :  { %v4935_v58 = vpop.eup %4934 }
 0x376   :  { %4683 = vmatprep.subr.bf16.mxu1 %v4682_v9  ;;  %v1392_v45 = vmul.f32 %v4935_v58, %v6451_v55  ;;  %v1417_v39 = vadd.f32 %v4088_v62, %v1405_v36  ;;  %v1443_v5 = vpop.permute.xlu1 %1442  ;;  %v1438_v16 = vpop.permute.xlu0 %1437 }
 0x377   :  { %4685 = vmatpush3.bf16.msra.mxu1 %v4682_v9 }
 0x378   :  { %v1404_v40 = vmul.f32 %v4087_v61, %v1392_v45 }
 0x379   :  { %v4937_v10 = vpop.eup %4936 }
 0x37a   :  { %v4939_v44 = vpop.eup %4938  ;;  %v1416_v50 = vadd.f32 %v4088_v62, %v1404_v40  ;;  %v1395_v49 = vmul.f32 %v4937_v10, %v6460_v42  ;;  %v1448_v43 = vpop.permute.xlu1 %1447 }
 0x37b   :  { %v1394_v15 = vmul.f32 %v4939_v44, %v6454_v4 }
 0x37c   :  { %v4686_v47 = vpack.c.bf16 %v1417_v39, %v1416_v50  ;;  %v1407_v52 = vmul.f32 %v4087_v61, %v1395_v49 }
 0x37d   :  { %v4941_v63 = vpop.eup %4940  ;;  %v1406_v13 = vmul.f32 %v4087_v61, %v1394_v15 }
 0x37e   :  { %v4943_v14 = vpop.eup %4942  ;;  %4687 = vmatprep.subr.bf16.mxu1 %v4686_v47  ;;  %v1419_v20 = vadd.f32 %v4088_v62, %v1407_v52  ;;  %v1397_v55 = vmul.f32 %v4941_v63, %v6471_v26  ;;  %v1424_v26 = vld [vmem:[%s7400_s8 + $0x10] sm:$0xff] }
 0x37f   :  { %4689 = vmatpush3.bf16.msra.mxu1 %v4686_v47  ;;  %v1418_v59 = vadd.f32 %v4088_v62, %v1406_v13  ;;  %v1396_v46 = vmul.f32 %v4943_v14, %v6463_v37  ;;  %v1425_v37 = vld [vmem:[%s7400_s8 + $0x18] sm:$0xff] }
 0x380   :  { %v1409_v33 = vmul.f32 %v4087_v61, %v1397_v55 }
 0x381   :  { %v4690_v41 = vpack.c.bf16 %v1419_v20, %v1418_v59  ;;  %v1408_v6 = vmul.f32 %v4087_v61, %v1396_v46 }
 0x382   :  { %v1421_v1 = vadd.f32 %v4088_v62, %v1409_v33 }
 0x383   :  { %4691 = vmatprep.subr.bf16.mxu1 %v4690_v41  ;;  %v1420_v42 = vadd.f32 %v4088_v62, %v1408_v6 }
 0x384   :  { %4693 = vmatpush3.bf16.msra.mxu1 %v4690_v41 }
 0x385   :  { %v4694_v4 = vpack.c.bf16 %v1421_v1, %v1420_v42  ;;  %v1585_v42 = vld [vmem:[%s7401_s9 + $0x8] sm:$0xff] }
 0x387   :  { %4695 = vmatprep.subr.bf16.mxu1 %v4694_v4 }
 0x388   :  { %4697 = vmatpush3.bf16.msra.mxu1 %v4694_v4  ;;  %v1586_v4 = vld [vmem:[%s7401_s9 + $0x10] sm:$0xff] }
 0x38b   :  { %4419 = vmatmul.mubr.msk.f32.vlgmr.msra.gmra.mrb[0].mxu1 %vm1450_vm9, %v1423_v0  ;;  %v1587_v0 = vld [vmem:[%s7401_s9 + $0x18] sm:$0xff] }
 0x38c   :  { %4421 = vmatprep.mubr.msk.f32.mxu1 %vm1450_vm9, %v1424_v26  ;;  %v1588_v26 = vld [vmem:[%s7401_s9 + $0x20] sm:$0xff] }
 0x38f   :  { %4422 = vmatmul.mubr.msk.f32.gmra.mrb[2].mxu1 %vm1450_vm9, %v1425_v37  ;;  %v1589_v37 = vld [vmem:[%s7401_s9 + $0x28] sm:$0xff] }
 0x390   :  { %4432 = vmatprep.mubr.msk.f32.mxu1 %vm1292_vm12, %v1584_v18  ;;  %v1590_v18 = vld [vmem:[%s7401_s9 + $0x30] sm:$0xff] }
 0x45e   :  { %v4420_v48 = vpop.f32.mrb[0].mxu1 }
 0x45f   :  { %v1535_v57 = vadd.f32 %v4420_v48, %v1438_v16  ;;  %v1529_v54 = vpop.f32.mrb[1].mxu1  ;;  %v1745_v16 = vpop.permute.xlu1 %1744 }
 0x460   :  { %v1530_v21 = vadd.f32 %v1529_v54, %v1433_v8  ;;  %v1591_v8 = vld [vmem:[%s7401_s9 + $0x38] sm:$0xff] }
 0x461   :  { %v1553_v61 = vmul.f32 0.044715, %v1535_v57  ;;  %v1549_v39 = vmul.f32 0.5, %v1535_v57 }
 0x462   :  { %v1552_v25 = vmul.f32 0.044715, %v1530_v21  ;;  %v4423_v30 = vpop.f32.mrb[2].mxu1  ;;  %v1548_v15 = vmul.f32 0.5, %v1530_v21 }
 0x463   :  { %v1557_v17 = vmul.f32 %v1553_v61, %v1535_v57  ;;  %v1545_v22 = vadd.f32 %v4423_v30, %v1448_v43  ;;  %v1539_v60 = vpop.f32.mrb[3].mxu1 }
 0x464   :  { %v1556_v62 = vmul.f32 %v1552_v25, %v1530_v21  ;;  %v1540_v11 = vadd.f32 %v1539_v60, %v1443_v5  ;;  %v1740_v5 = vpop.permute.xlu0 %1739 }
 0x465   :  { %v1561_v2 = vmul.f32 %v1557_v17, %v1535_v57  ;;  %v1555_v19 = vmul.f32 0.044715, %v1545_v22  ;;  %v1551_v20 = vmul.f32 0.5, %v1545_v22  ;;  %v1755_v17 = vpop.permute.xlu1 %1754 }
 0x466   :  { %v1560_v31 = vmul.f32 %v1556_v62, %v1530_v21  ;;  %v1554_v34 = vmul.f32 0.044715, %v1540_v11  ;;  %v1550_v46 = vmul.f32 0.5, %v1540_v11 }
 0x467   :  { %v1559_v38 = vmul.f32 %v1555_v19, %v1545_v22  ;;  %v1565_v3 = vadd.f32 %v1561_v2, %v1535_v57 }
 0x468   :  { %v1558_v27 = vmul.f32 %v1554_v34, %v1540_v11  ;;  %v1564_v56 = vadd.f32 %v1560_v31, %v1530_v21  ;;  %v1750_v61 = vpop.permute.xlu0 %1749 }
 0x469   :  { %v1563_v24 = vmul.f32 %v1559_v38, %v1545_v22  ;;  %v1569_v23 = vmul.f32 0.7978846, %v1565_v3 }
 0x46a   :  { %v1562_v9 = vmul.f32 %v1558_v27, %v1540_v11  ;;  %v1568_v58 = vmul.f32 0.7978846, %v1564_v56 }
 0x46b   :  { %4944 = vtanh.f32 %v1569_v23  ;;  %v1567_v45 = vadd.f32 %v1563_v24, %v1545_v22 }
 0x46c   :  { %4946 = vtanh.f32 %v1568_v58  ;;  %v1566_v36 = vadd.f32 %v1562_v9, %v1540_v11  ;;  %v1760_v19 = vpop.permute.xlu0 %1759 }
 0x46d   :  { %v1571_v40 = vmul.f32 0.7978846, %v1567_v45 }
 0x46e   :  { %v1570_v10 = vmul.f32 0.7978846, %v1566_v36 }
 0x46f   :  { %4948 = vtanh.f32 %v1571_v40 }
 0x470   :  { %4950 = vtanh.f32 %v1570_v10  ;;  %v1770_v45 = vpop.permute.xlu0 %1769 }
 0x475   :  { %v4945_v44 = vpop.eup %4944 }
 0x476   :  { %v4947_v50 = vpop.eup %4946  ;;  %v1577_v49 = vadd.f32 1.0, %v4945_v44 }
 0x477   :  { %v1576_v47 = vadd.f32 1.0, %v4947_v50 }
 0x478   :  { %v1581_v52 = vmul.f32 %v1577_v49, %v1549_v39 }
 0x479   :  { %v4949_v63 = vpop.eup %4948  ;;  %v1580_v13 = vmul.f32 %v1576_v47, %v1548_v15 }
 0x47a   :  { %v4951_v14 = vpop.eup %4950  ;;  %v1579_v55 = vadd.f32 1.0, %v4949_v63 }
 0x47b   :  { %v4698_v59 = vpack.c.bf16 %v1581_v52, %v1580_v13  ;;  %v1578_v33 = vadd.f32 1.0, %v4951_v14 }
 0x47c   :  { %v1583_v41 = vmul.f32 %v1579_v55, %v1551_v20 }
 0x47d   :  { %4699 = vmatprep.subr.bf16.mxu1 %v4698_v59  ;;  %v1582_v6 = vmul.f32 %v1578_v33, %v1550_v46 }
 0x47e   :  { %4701 = vmatpush3.bf16.msra.mxu1 %v4698_v59 }
 0x47f   :  { %v4702_v1 = vpack.c.bf16 %v1583_v41, %v1582_v6 }
 0x481   :  { %4703 = vmatprep.subr.bf16.mxu1 %v4702_v1 }
 0x482   :  { %4705 = vmatpush3.bf16.msra.mxu1 %v4702_v1 }
 0x485   :  { %4433 = vmatmul.mubr.msk.f32.vlgmr.msra.gmra.mrb[4].mxu1 %vm1292_vm12, %v1585_v42 }
 0x486   :  { %4435 = vmatprep.mubr.msk.f32.mxu1 %vm1292_vm12, %v1586_v4 }
 0x489   :  { %4436 = vmatmul.mubr.msk.f32.gmra.mrb[6].mxu1 %vm1292_vm12, %v1587_v0 }
 0x48a   :  { %4438 = vmatprep.mubr.msk.f32.mxu1 %vm1292_vm12, %v1588_v26 }
 0x48d   :  { %4439 = vmatmul.mubr.msk.f32.gmra.mrb[8].mxu1 %vm1292_vm12, %v1589_v37 }
 0x48e   :  { %4441 = vmatprep.mubr.msk.f32.mxu1 %vm1292_vm12, %v1590_v18 }
 0x491   :  { %4442 = vmatmul.mubr.msk.f32.gmra.mrb[10].mxu1 %vm1292_vm12, %v1591_v8 }
 0x558   :  { %v4434_v48 = vpop.f32.mrb[4].mxu1 }
 0x559   :  { %v1722_v57 = vadd.f32 %v4434_v48, %v6401_v29  ;;  %v1682_v54 = vpop.f32.mrb[5].mxu1 }
 0x55a   :  { %v1721_v21 = vadd.f32 %v1682_v54, %v6403_v28 }
 0x55b   :  { %v6581_v43 = vadd.f32 %v1745_v16, %v1722_v57 }
 0x55c   :  { %v6583_v25 = vadd.f32 %v1740_v5, %v1721_v21  ;;  %v4437_v30 = vpop.f32.mrb[6].mxu1 }
 0x55d   :  { %v1724_v22 = vadd.f32 %v4437_v30, %v6409_v51  ;;  %v1692_v60 = vpop.f32.mrb[7].mxu1  ;;  %v1790_v62 = vsel %vm1292_vm12, %v6581_v43, 0.0 }
 0x55e   :  { %v1723_v11 = vadd.f32 %v1692_v60, %v6413_v7  ;;  %1791 = vadd.xlane.f32.xlu1 %v1790_v62  ;;  %v1787_v29 = vsel %vm1292_vm12, %v6583_v25, 0.0  ;;  %v1765_v7 = vpop.permute.xlu1 %1764 }
 0x55f   :  { %1788 = vadd.xlane.f32.xlu0 %v1787_v29  ;;  %v6593_v31 = vadd.f32 %v1755_v17, %v1724_v22 }
 0x560   :  { %v6591_v28 = vadd.f32 %v1750_v61, %v1723_v11  ;;  %v4440_v2 = vpop.f32.mrb[8].mxu1 }
 0x561   :  { %v1702_v34 = vpop.f32.mrb[9].mxu1  ;;  %v1726_v51 = vadd.f32 %v4440_v2, %v6417_v53  ;;  %v1796_v23 = vsel %vm1292_vm12, %v6593_v31, 0.0 }
 0x562   :  { %v1725_v38 = vadd.f32 %v1702_v34, %v6415_v12  ;;  %v1793_v3 = vsel %vm1292_vm12, %v6591_v28, 0.0  ;;  %v1775_v40 = vpop.permute.xlu1 %1774  ;;  %v1915_v34 = vld [vmem:[%s7402_s12] sm:$0xff] }
 0x563   :  { %1794 = vadd.xlane.f32.xlu0 %v1793_v3  ;;  %v6603_v9 = vadd.f32 %v1765_v7, %v1726_v51  ;;  %v1916_v51 = vld [vmem:[%s7402_s12 + $0x8] sm:$0xff]  ;;  %v1917_v3 = vld [vmem:[%s7402_s12 + $0x10] sm:$0xff]  ;;  %v1918_v7 = vld [vmem:[%s7402_s12 + $0x18] sm:$0xff] }
 0x564   :  { %v6599_v27 = vadd.f32 %v1760_v19, %v1725_v38  ;;  %v4443_v56 = vpop.f32.mrb[10].mxu1  ;;  %v4706_v38 = vpack.c.bf16 %v1916_v51, %v1915_v34 }
 0x565   :  { %v1712_v24 = vpop.f32.mrb[11].mxu1  ;;  %v1728_v58 = vadd.f32 %v4443_v56, %v6425_v35  ;;  %v1802_v50 = vsel %vm1292_vm12, %v6603_v9, 0.0  ;;  %v4710_v56 = vpack.c.bf16 %v1918_v7, %v1917_v3 }
 0x566   :  { %v1727_v53 = vadd.f32 %v1712_v24, %v6423_v32  ;;  %v1799_v12 = vsel %vm1292_vm12, %v6599_v27, 0.0  ;;  %4707 = vmatprep.subr.bf16.mxu0 %v4706_v38  ;;  %v2125_v24 = vld [vmem:[%s7403_s13] sm:$0xff] }
 0x567   :  { %1800 = vadd.xlane.f32.xlu1 %v1799_v12  ;;  %1797 = vadd.xlane.f32.xlu0 %v1796_v23  ;;  %v6611_v10 = vadd.f32 %v1775_v40, %v1728_v58  ;;  %v2126_v23 = vld [vmem:[%s7403_s13 + $0x8] sm:$0xff] }
 0x568   :  { %v6609_v36 = vadd.f32 %v1770_v45, %v1727_v53  ;;  %4709 = vmatpush3.bf16.msra.mxu0 %v4706_v38  ;;  %v4714_v58 = vpack.c.bf16 %v2126_v23, %v2125_v24 }
 0x569   :  { %v1808_v32 = vsel %vm1292_vm12, %v6611_v10, 0.0  ;;  %4711 = vmatprep.subr.bf16.mxu0 %v4710_v56 }
 0x56a   :  { %v1805_v44 = vsel %vm1292_vm12, %v6609_v36, 0.0  ;;  %4715 = vmatprep.subr.bf16.mxu1 %v4714_v58 }
 0x56b   :  { %1806 = vadd.xlane.f32.xlu1 %v1805_v44  ;;  %1803 = vadd.xlane.f32.xlu0 %v1802_v50 }
 0x56c   :  { %4713 = vmatpush3.bf16.msra.mxu0 %v4710_v56  ;;  %4717 = vmatpush3.bf16.msra.mxu1 %v4714_v58 }
 0x56f   :  { %1809 = vadd.xlane.f32.xlu0 %v1808_v32 }
 0x5eb   :  { %v1792_v35 = vpop.xlane.xlu1 %1791 }
 0x5ec   :  { %v1812_v39 = vmul.f32 0.03125, %v1792_v35  ;;  %v1789_v49 = vpop.xlane.xlu0 %1788 }
 0x5ed   :  { %v1811_v15 = vmul.f32 0.03125, %v1789_v49 }
 0x5ee   :  { %v6620_v47 = vsub.f32 %v6581_v43, %v1812_v39 }
 0x5ef   :  { %v6623_v52 = vsub.f32 %v6583_v25, %v1811_v15 }
 0x5f0   :  { %v1795_v63 = vpop.xlane.xlu0 %1794  ;;  %v1828_v13 = vmul.f32 %v6620_v47, %v6620_v47 }
 0x5f1   :  { %v1813_v14 = vmul.f32 0.03125, %v1795_v63  ;;  %v1827_v20 = vmul.f32 %v6623_v52, %v6623_v52 }
 0x5f2   :  { %v1838_v55 = vsel %vm1292_vm12, %v1828_v13, 0.0 }
 0x5f3   :  { %v6631_v59 = vsub.f32 %v6591_v28, %v1813_v14  ;;  %1839 = vadd.xlane.f32.xlu0 %v1838_v55  ;;  %v1835_v46 = vsel %vm1292_vm12, %v1827_v20, 0.0 }
 0x5f4   :  { %1836 = vadd.xlane.f32.xlu1 %v1835_v46  ;;  %v1798_v33 = vpop.xlane.xlu0 %1797  ;;  %v1801_v41 = vpop.xlane.xlu1 %1800 }
 0x5f5   :  { %v1814_v6 = vmul.f32 0.03125, %v1798_v33  ;;  %v1815_v1 = vmul.f32 0.03125, %v1801_v41  ;;  %v1829_v42 = vmul.f32 %v6631_v59, %v6631_v59 }
 0x5f7   :  { %v6637_v4 = vsub.f32 %v6593_v31, %v1814_v6  ;;  %v6640_v0 = vsub.f32 %v6599_v27, %v1815_v1  ;;  %v1841_v26 = vsel %vm1292_vm12, %v1829_v42, 0.0  ;;  %v4101_v1 = vld [vmem:[%s7458_s27 + $0xa] ss:$0 sm:$0xff] }
 0x5f8   :  { %1842 = vadd.xlane.f32.xlu1 %v1841_v26  ;;  %v1804_v37 = vpop.xlane.xlu0 %1803  ;;  %v1807_v18 = vpop.xlane.xlu1 %1806 }
 0x5f9   :  { %v1816_v8 = vmul.f32 0.03125, %v1804_v37  ;;  %v1817_v5 = vmul.f32 0.03125, %v1807_v18  ;;  %v1830_v16 = vmul.f32 %v6637_v4, %v6637_v4  ;;  %v1831_v48 = vmul.f32 %v6640_v0, %v6640_v0 }
 0x5fb   :  { %v6648_v57 = vsub.f32 %v6603_v9, %v1816_v8  ;;  %v6651_v54 = vsub.f32 %v6609_v36, %v1817_v5  ;;  %v1844_v21 = vsel %vm1292_vm12, %v1830_v16, 0.0  ;;  %v1847_v61 = vsel %vm1292_vm12, %v1831_v48, 0.0  ;;  %v4102_v16 = vld [vmem:[%s7458_s27 + $0xb] ss:$0 sm:$0xff] }
 0x5fc   :  { %v1810_v30 = vpop.xlane.xlu0 %1809  ;;  %1845 = vadd.xlane.f32.xlu0 %v1844_v21  ;;  %1848 = vadd.xlane.f32.xlu1 %v1847_v61 }
 0x5fd   :  { %v1818_v17 = vmul.f32 0.03125, %v1810_v30  ;;  %v1832_v22 = vmul.f32 %v6648_v57, %v6648_v57  ;;  %v1833_v60 = vmul.f32 %v6651_v54, %v6651_v54 }
 0x5ff   :  { %v6660_v62 = vsub.f32 %v6611_v10, %v1818_v17  ;;  %v1850_v11 = vsel %vm1292_vm12, %v1832_v22, 0.0  ;;  %v1853_v29 = vsel %vm1292_vm12, %v1833_v60, 0.0 }
 0x600   :  { %1851 = vadd.xlane.f32.xlu0 %v1850_v11  ;;  %1854 = vadd.xlane.f32.xlu1 %v1853_v29 }
 0x601   :  { %v1834_v2 = vmul.f32 %v6660_v62, %v6660_v62 }
 0x603   :  { %v1856_v19 = vsel %vm1292_vm12, %v1834_v2, 0.0 }
 0x604   :  { %1857 = vadd.xlane.f32.xlu0 %v1856_v19 }
 0x680   :  { %v1840_v53 = vpop.xlane.xlu0 %1839 }
 0x681   :  { %v1860_v12 = vmul.f32 0.03125, %v1840_v53  ;;  %v1837_v45 = vpop.xlane.xlu1 %1836 }
 0x682   :  { %v1859_v40 = vmul.f32 0.03125, %v1837_v45 }
 0x683   :  { %v1868_v44 = vadd.f32 1e-05, %v1860_v12 }
 0x684   :  { %v1867_v50 = vadd.f32 1e-05, %v1859_v40 }
 0x685   :  { %4952 = vrsqrt.f32 %v1868_v44  ;;  %v1843_v32 = vpop.xlane.xlu1 %1842  ;;  %v2128_v44 = vld [vmem:[%s7403_s13 + $0x18] sm:$0xff] }
 0x686   :  { %4954 = vrsqrt.f32 %v1867_v50  ;;  %v1861_v35 = vmul.f32 0.03125, %v1843_v32  ;;  %v2130_v32 = vld [vmem:[%s7403_s13 + $0x28] sm:$0xff] }
 0x688   :  { %v1869_v39 = vadd.f32 1e-05, %v1861_v35 }
 0x689   :  { %v1846_v49 = vpop.xlane.xlu0 %1845  ;;  %v1849_v15 = vpop.xlane.xlu1 %1848 }
 0x68a   :  { %4956 = vrsqrt.f32 %v1869_v39  ;;  %v1862_v63 = vmul.f32 0.03125, %v1846_v49  ;;  %v1863_v13 = vmul.f32 0.03125, %v1849_v15  ;;  %v2131_v39 = vld [vmem:[%s7403_s13 + $0x30] sm:$0xff]  ;;  %v2132_v49 = vld [vmem:[%s7403_s13 + $0x38] sm:$0xff] }
 0x68b   :  { %v4726_v15 = vpack.c.bf16 %v2132_v49, %v2131_v39 }
 0x68c   :  { %v1870_v14 = vadd.f32 1e-05, %v1862_v63  ;;  %v1871_v20 = vadd.f32 1e-05, %v1863_v13  ;;  %v2133_v63 = vld [vmem:[%s7403_s13 + $0x40] sm:$0xff]  ;;  %v2134_v13 = vld [vmem:[%s7403_s13 + $0x48] sm:$0xff] }
 0x68d   :  { %v1852_v55 = vpop.xlane.xlu0 %1851  ;;  %v1855_v46 = vpop.xlane.xlu1 %1854 }
 0x68e   :  { %4958 = vrsqrt.f32 %v1870_v14  ;;  %v1864_v33 = vmul.f32 0.03125, %v1852_v55  ;;  %v1865_v41 = vmul.f32 0.03125, %v1855_v46  ;;  %v4730_v14 = vpack.c.bf16 %v2134_v13, %v2133_v63  ;;  %v2136_v55 = vld [vmem:[%s7403_s13 + $0x58] sm:$0xff] }
 0x68f   :  { %v4953_v6 = vpop.eup %4952  ;;  %4960 = vrsqrt.f32 %v1871_v20  ;;  %v2135_v20 = vld [vmem:[%s7403_s13 + $0x50] sm:$0xff] }
 0x690   :  { %v4955_v42 = vpop.eup %4954  ;;  %v1884_v26 = vmul.f32 %v4953_v6, %v6620_v47  ;;  %v1872_v37 = vadd.f32 1e-05, %v1864_v33  ;;  %v1873_v18 = vadd.f32 1e-05, %v1865_v41  ;;  %v4734_v46 = vpack.c.bf16 %v2136_v55, %v2135_v20  ;;  %v2137_v33 = vld [vmem:[%s7403_s13 + $0x60] sm:$0xff]  ;;  %v2138_v41 = vld [vmem:[%s7403_s13 + $0x68] sm:$0xff] }
 0x691   :  { %v1858_v8 = vpop.xlane.xlu0 %1857  ;;  %v1883_v5 = vmul.f32 %v4955_v42, %v6623_v52  ;;  %v4738_v6 = vpack.c.bf16 %v2138_v41, %v2137_v33  ;;  %v2140_v42 = vld [vmem:[%s7403_s13 + $0x78] sm:$0xff] }
 0x692   :  { %v1896_v48 = vmul.f32 %v4101_v1, %v1884_v26  ;;  %4962 = vrsqrt.f32 %v1872_v37  ;;  %v1866_v21 = vmul.f32 0.03125, %v1858_v8  ;;  %v4103_v37 = vld [vmem:[%s7458_s27 + $0xc] ss:$0 sm:$0xff] }
 0x693   :  { %4964 = vrsqrt.f32 %v1873_v18  ;;  %v1895_v61 = vmul.f32 %v4101_v1, %v1883_v5 }
 0x694   :  { %v4957_v30 = vpop.eup %4956  ;;  %v1874_v17 = vadd.f32 1e-05, %v1866_v21  ;;  %v1908_v47 = vadd.f32 %v4102_v16, %v1896_v48 }
 0x695   :  { %v1907_v22 = vadd.f32 %v4102_v16, %v1895_v61  ;;  %v1885_v60 = vmul.f32 %v4957_v30, %v6631_v59 }
 0x696   :  { %4966 = vrsqrt.f32 %v1874_v17 }
 0x697   :  { %4452 = vmatprep.mubr.msk.f32.mxu0 %vm1292_vm12, %v1907_v22  ;;  %v1897_v11 = vmul.f32 %v4101_v1, %v1885_v60 }
 0x698   :  { %v4959_v52 = vpop.eup %4958  ;;  %4453 = vmatmul.mubr.msk.f32.vlgmr.msra.gmra.mrb[8].mxu0 %vm1292_vm12, %v1908_v47 }
 0x699   :  { %v4961_v29 = vpop.eup %4960  ;;  %v1909_v2 = vadd.f32 %v4102_v16, %v1897_v11  ;;  %v1886_v19 = vmul.f32 %v4959_v52, %v6637_v4 }
 0x69a   :  { %v1887_v34 = vmul.f32 %v4961_v29, %v6640_v0 }
 0x69b   :  { %4455 = vmatprep.mubr.msk.f32.mxu0 %vm1292_vm12, %v1909_v2  ;;  %v1898_v51 = vmul.f32 %v4101_v1, %v1886_v19 }
 0x69c   :  { %v4963_v38 = vpop.eup %4962  ;;  %v1899_v3 = vmul.f32 %v4101_v1, %v1887_v34 }
 0x69d   :  { %v4965_v59 = vpop.eup %4964  ;;  %v1910_v7 = vadd.f32 %v4102_v16, %v1898_v51  ;;  %v1888_v56 = vmul.f32 %v4963_v38, %v6648_v57 }
 0x69e   :  { %v1911_v24 = vadd.f32 %v4102_v16, %v1899_v3  ;;  %v1889_v23 = vmul.f32 %v4965_v59, %v6651_v54  ;;  %v2127_v54 = vld [vmem:[%s7403_s13 + $0x10] sm:$0xff] }
 0x69f   :  { %4456 = vmatmul.mubr.msk.f32.gmra.mrb[10].mxu0 %vm1292_vm12, %v1910_v7  ;;  %v1900_v58 = vmul.f32 %v4101_v1, %v1888_v56  ;;  %v4718_v50 = vpack.c.bf16 %v2128_v44, %v2127_v54 }
 0x6a0   :  { %v4967_v53 = vpop.eup %4966  ;;  %4458 = vmatprep.mubr.msk.f32.mxu0 %vm1292_vm12, %v1911_v24  ;;  %v1901_v4 = vmul.f32 %v4101_v1, %v1889_v23 }
 0x6a1   :  { %v1912_v0 = vadd.f32 %v4102_v16, %v1900_v58  ;;  %v1890_v12 = vmul.f32 %v4967_v53, %v6660_v62  ;;  %v2129_v62 = vld [vmem:[%s7403_s13 + $0x20] sm:$0xff]  ;;  %4719 = vmatprep.subr.bf16.mxu1 %v4718_v50 }
 0x6a2   :  { %v1913_v45 = vadd.f32 %v4102_v16, %v1901_v4  ;;  %v4722_v35 = vpack.c.bf16 %v2130_v32, %v2129_v62  ;;  %4721 = vmatpush3.bf16.msra.mxu1 %v4718_v50 }
 0x6a3   :  { %4459 = vmatmul.mubr.msk.f32.gmra.mrb[12].mxu0 %vm1292_vm12, %v1912_v0  ;;  %v1902_v40 = vmul.f32 %v4101_v1, %v1890_v12  ;;  %v2139_v1 = vld [vmem:[%s7403_s13 + $0x70] sm:$0xff] }
 0x6a4   :  { %4461 = vmatprep.mubr.msk.f32.mxu0 %vm1292_vm12, %v1913_v45  ;;  %4723 = vmatprep.subr.bf16.mxu1 %v4722_v35  ;;  %v4742_v26 = vpack.c.bf16 %v2140_v42, %v2139_v1 }
 0x6a5   :  { %v1914_v57 = vadd.f32 %v4102_v16, %v1902_v40 }
 0x6a6   :  { %4725 = vmatpush3.bf16.msra.mxu1 %v4722_v35 }
 0x6a7   :  { %4462 = vmatmul.mubr.msk.f32.gmra.mrb[14].mxu0 %vm1292_vm12, %v1914_v57  ;;  %4727 = vmatprep.subr.bf16.mxu1 %v4726_v15 }
 0x6aa   :  { %4729 = vmatpush3.bf16.msra.mxu1 %v4726_v15 }
 0x6ab   :  { %4731 = vmatprep.subr.bf16.mxu1 %v4730_v14 }
 0x6ae   :  { %4733 = vmatpush3.bf16.msra.mxu1 %v4730_v14 }
 0x6af   :  { %4735 = vmatprep.subr.bf16.mxu1 %v4734_v46 }
 0x6b2   :  { %4737 = vmatpush3.bf16.msra.mxu1 %v4734_v46 }
 0x6b3   :  { %4739 = vmatprep.subr.bf16.mxu1 %v4738_v6 }
 0x6b6   :  { %4741 = vmatpush3.bf16.msra.mxu1 %v4738_v6 }
 0x6b7   :  { %4743 = vmatprep.subr.bf16.mxu1 %v4742_v26 }
 0x6ba   :  { %4745 = vmatpush3.bf16.msra.mxu1 %v4742_v26 }
 0x76b   :  { %v4454_v18 = vpop.f32.mrb[8].mxu0 }
 0x76c   :  { %v6752_v8 = vadd.f32 %v4454_v18, %v4103_v37  ;;  %v2014_v5 = vpop.f32.mrb[9].mxu0 }
 0x76d   :  { %v2015_v16 = vadd.f32 %v4103_v37, %v2014_v5 }
 0x76e   :  { %v2062_v48 = vmul.f32 0.044715, %v6752_v8 }
 0x76f   :  { %v2061_v21 = vmul.f32 0.044715, %v2015_v16  ;;  %v2053_v18 = vmul.f32 0.5, %v2015_v16 }
 0x770   :  { %v2070_v61 = vmul.f32 %v2062_v48, %v6752_v8 }
 0x771   :  { %v2069_v30 = vmul.f32 %v2061_v21, %v2015_v16  ;;  %v2054_v21 = vmul.f32 0.5, %v6752_v8 }
 0x772   :  { %v2078_v17 = vmul.f32 %v2070_v61, %v6752_v8  ;;  %v4457_v22 = vpop.f32.mrb[10].mxu0 }
 0x773   :  { %v6757_v60 = vadd.f32 %v4457_v22, %v4103_v37  ;;  %v2024_v47 = vpop.f32.mrb[11].mxu0  ;;  %v2077_v11 = vmul.f32 %v2069_v30, %v2015_v16 }
 0x774   :  { %v2086_v52 = vadd.f32 %v2078_v17, %v6752_v8  ;;  %v2025_v29 = vadd.f32 %v4103_v37, %v2024_v47 }
 0x775   :  { %v2064_v2 = vmul.f32 0.044715, %v6757_v60  ;;  %v2085_v19 = vadd.f32 %v2077_v11, %v2015_v16  ;;  %v2056_v16 = vmul.f32 0.5, %v6757_v60 }
 0x776   :  { %v2094_v34 = vmul.f32 0.7978846, %v2086_v52  ;;  %v2063_v51 = vmul.f32 0.044715, %v2025_v29  ;;  %v4460_v38 = vpop.f32.mrb[12].mxu0 }
 0x777   :  { %v2072_v3 = vmul.f32 %v2064_v2, %v6757_v60  ;;  %v6762_v59 = vadd.f32 %v4460_v38, %v4103_v37  ;;  %v2034_v7 = vpop.f32.mrb[13].mxu0  ;;  %v2093_v56 = vmul.f32 0.7978846, %v2085_v19  ;;  %v2055_v2 = vmul.f32 0.5, %v2025_v29 }
 0x778   :  { %4968 = vtanh.f32 %v2094_v34  ;;  %v2071_v24 = vmul.f32 %v2063_v51, %v2025_v29  ;;  %v2035_v23 = vadd.f32 %v4103_v37, %v2034_v7 }
 0x779   :  { %v2066_v58 = vmul.f32 0.044715, %v6762_v59  ;;  %4970 = vtanh.f32 %v2093_v56  ;;  %v2080_v53 = vmul.f32 %v2072_v3, %v6757_v60 }
 0x77a   :  { %v2065_v4 = vmul.f32 0.044715, %v2035_v23  ;;  %v4463_v0 = vpop.f32.mrb[14].mxu0  ;;  %v2079_v12 = vmul.f32 %v2071_v24, %v2025_v29  ;;  %v2057_v7 = vmul.f32 0.5, %v2035_v23  ;;  %v2058_v24 = vmul.f32 0.5, %v6762_v59 }
 0x77b   :  { %v2074_v45 = vmul.f32 %v2066_v58, %v6762_v59  ;;  %v6767_v40 = vadd.f32 %v4463_v0, %v4103_v37  ;;  %v2044_v57 = vpop.f32.mrb[15].mxu0  ;;  %v2088_v54 = vadd.f32 %v2080_v53, %v6757_v60 }
 0x77c   :  { %v2073_v44 = vmul.f32 %v2065_v4, %v2035_v23  ;;  %v2045_v62 = vadd.f32 %v4103_v37, %v2044_v57  ;;  %v2087_v50 = vadd.f32 %v2079_v12, %v2025_v29 }
 0x77d   :  { %v2068_v32 = vmul.f32 0.044715, %v6767_v40  ;;  %v2096_v35 = vmul.f32 0.7978846, %v2088_v54  ;;  %v2082_v39 = vmul.f32 %v2074_v45, %v6762_v59  ;;  %v2060_v60 = vmul.f32 0.5, %v6767_v40 }
 0x77e   :  { %v2067_v49 = vmul.f32 0.044715, %v2045_v62  ;;  %v2095_v15 = vmul.f32 0.7978846, %v2087_v50  ;;  %v2081_v63 = vmul.f32 %v2073_v44, %v2035_v23  ;;  %v2059_v29 = vmul.f32 0.5, %v2045_v62 }
 0x77f   :  { %v2076_v13 = vmul.f32 %v2068_v32, %v6767_v40  ;;  %4972 = vtanh.f32 %v2096_v35  ;;  %v2090_v14 = vadd.f32 %v2082_v39, %v6762_v59  ;;  %v4112_v59 = vld [vmem:[%s7458_s27 + $0xd] ss:$0 sm:$0xff] }
 0x780   :  { %v2075_v20 = vmul.f32 %v2067_v49, %v2045_v62  ;;  %4974 = vtanh.f32 %v2095_v15  ;;  %v2089_v55 = vadd.f32 %v2081_v63, %v2035_v23 }
 0x781   :  { %v2098_v46 = vmul.f32 0.7978846, %v2090_v14  ;;  %v2084_v33 = vmul.f32 %v2076_v13, %v6767_v40 }
 0x782   :  { %v4969_v41 = vpop.eup %4968  ;;  %v2097_v6 = vmul.f32 0.7978846, %v2089_v55  ;;  %v2083_v1 = vmul.f32 %v2075_v20, %v2045_v62 }
 0x783   :  { %v4971_v42 = vpop.eup %4970  ;;  %v2110_v26 = vadd.f32 1.0, %v4969_v41  ;;  %4976 = vtanh.f32 %v2098_v46  ;;  %v2092_v37 = vadd.f32 %v2084_v33, %v6767_v40 }
 0x784   :  { %v2109_v5 = vadd.f32 1.0, %v4971_v42  ;;  %4978 = vtanh.f32 %v2097_v6  ;;  %v2091_v48 = vadd.f32 %v2083_v1, %v2045_v62 }
 0x785   :  { %v2100_v61 = vmul.f32 0.7978846, %v2092_v37  ;;  %v2118_v22 = vmul.f32 %v2110_v26, %v2054_v21 }
 0x786   :  { %v2117_v30 = vmul.f32 %v2109_v5, %v2053_v18  ;;  %v2099_v17 = vmul.f32 0.7978846, %v2091_v48 }
 0x787   :  { %4980 = vtanh.f32 %v2100_v61 }
 0x788   :  { %4496 = vmatprep.mubr.f32.mxu1 %v2117_v30  ;;  %4982 = vtanh.f32 %v2099_v17 }
 0x789   :  { %v4973_v47 = vpop.eup %4972  ;;  %4497 = vmatmul.mubr.f32.vlgmr.msra.gmra.mrb[12].mxu1 %v2118_v22 }
 0x78a   :  { %v4975_v11 = vpop.eup %4974  ;;  %v2112_v52 = vadd.f32 1.0, %v4973_v47 }
 0x78b   :  { %v2111_v19 = vadd.f32 1.0, %v4975_v11 }
 0x78c   :  { %v2120_v3 = vmul.f32 %v2112_v52, %v2056_v16 }
 0x78d   :  { %v4977_v34 = vpop.eup %4976  ;;  %v2119_v51 = vmul.f32 %v2111_v19, %v2055_v2 }
 0x78e   :  { %v4979_v38 = vpop.eup %4978  ;;  %v2114_v8 = vadd.f32 1.0, %v4977_v34 }
 0x78f   :  { %4499 = vmatprep.mubr.f32.mxu1 %v2119_v51  ;;  %v2113_v56 = vadd.f32 1.0, %v4979_v38 }
 0x790   :  { %4500 = vmatmul.mubr.f32.gmra.mrb[14].mxu1 %v2120_v3  ;;  %v2122_v0 = vmul.f32 %v2114_v8, %v2058_v24 }
 0x791   :  { %v4981_v58 = vpop.eup %4980  ;;  %v2121_v53 = vmul.f32 %v2113_v56, %v2057_v7 }
 0x792   :  { %v4983_v4 = vpop.eup %4982  ;;  %v2116_v12 = vadd.f32 1.0, %v4981_v58 }
 0x793   :  { %4502 = vmatprep.mubr.f32.mxu1 %v2121_v53  ;;  %v2115_v45 = vadd.f32 1.0, %v4983_v4 }
 0x794   :  { %4503 = vmatmul.mubr.f32.gmra.mrb[16].mxu1 %v2122_v0  ;;  %v2124_v54 = vmul.f32 %v2116_v12, %v2060_v60 }
 0x795   :  { %v2123_v57 = vmul.f32 %v2115_v45, %v2059_v29 }
 0x797   :  { %4505 = vmatprep.mubr.f32.mxu1 %v2123_v57 }
 0x798   :  { %4506 = vmatmul.mubr.f32.gmra.mrb[18].mxu1 %v2124_v54 }
 0x85c   :  { %v4498_v23 = vpop.f32.mrb[12].mxu1 }
 0x85d   :  { %v2247_v44 = vadd.f32 %v4498_v23, %v6581_v43  ;;  %v2207_v50 = vpop.f32.mrb[13].mxu1 }
 0x85e   :  { %v2246_v32 = vadd.f32 %v2207_v50, %v6583_v25 }
 0x85f   :  { %v6785_v35 = vadd.f32 %v4112_v59, %v2247_v44 }
 0x860   :  { %v6787_v62 = vadd.f32 %v4112_v59, %v2246_v32 }
 0x861   :  { %v2272_v40 = vsel %vm1292_vm12, %v6785_v35, 0.0 }
 0x862   :  { %2273 = vadd.xlane.f32.xlu0 %v2272_v40  ;;  %v2269_v39 = vsel %vm1292_vm12, %v6787_v62, 0.0 }
 0x863   :  { %2270 = vadd.xlane.f32.xlu1 %v2269_v39  ;;  %v4501_v49 = vpop.f32.mrb[14].mxu1 }
 0x864   :  { %v2249_v15 = vadd.f32 %v4501_v49, %v6593_v31  ;;  %v2217_v63 = vpop.f32.mrb[15].mxu1 }
 0x865   :  { %v2248_v43 = vadd.f32 %v2217_v63, %v6591_v28  ;;  %v4119_v63 = vld [vmem:[%s7398_s10 + $0x20] sm:$0xff] }
 0x866   :  { %v6795_v13 = vadd.f32 %v4112_v59, %v2249_v15 }
 0x867   :  { %v6797_v25 = vadd.f32 %v4112_v59, %v2248_v43  ;;  %v4504_v14 = vpop.f32.mrb[16].mxu1  ;;  %v4120_v43 = vld [vmem:[%s7398_s10 + $0x28] sm:$0xff] }
 0x868   :  { %v2251_v20 = vadd.f32 %v4504_v14, %v6603_v9  ;;  %v2227_v55 = vpop.f32.mrb[17].mxu1  ;;  %v2278_v46 = vsel %vm1292_vm12, %v6795_v13, 0.0  ;;  %v4121_v14 = vld [vmem:[%s7398_s10 + $0x30] sm:$0xff] }
 0x869   :  { %v2250_v33 = vadd.f32 %v2227_v55, %v6599_v27  ;;  %2279 = vadd.xlane.f32.xlu0 %v2278_v46  ;;  %v2275_v31 = vsel %vm1292_vm12, %v6797_v25, 0.0  ;;  %v4122_v55 = vld [vmem:[%s7398_s10 + $0x38] sm:$0xff]  ;;  %v4145_v46 = vld [vmem:[%s7399_s11 + $0x50] sm:$0xff] }
 0x86a   :  { %v6805_v41 = vadd.f32 %v4112_v59, %v2251_v20  ;;  %2276 = vadd.xlane.f32.xlu1 %v2275_v31  ;;  %v4143_v20 = vld [vmem:[%s7399_s11 + $0x40] sm:$0xff] }
 0x86b   :  { %v6807_v28 = vadd.f32 %v4112_v59, %v2250_v33  ;;  %v4507_v6 = vpop.f32.mrb[18].mxu1  ;;  %v4144_v33 = vld [vmem:[%s7399_s11 + $0x48] sm:$0xff]  ;;  %v4147_v31 = vld [vmem:[%s7399_s11 + $0x60] sm:$0xff] }
 0x86c   :  { %v2253_v1 = vadd.f32 %v4507_v6, %v6611_v10  ;;  %v2237_v42 = vpop.f32.mrb[19].mxu1  ;;  %v2284_v9 = vsel %vm1292_vm12, %v6805_v41, 0.0  ;;  %v4146_v6 = vld [vmem:[%s7399_s11 + $0x58] sm:$0xff] }
 0x86d   :  { %v2252_v26 = vadd.f32 %v2237_v42, %v6609_v36  ;;  %2285 = vadd.xlane.f32.xlu0 %v2284_v9  ;;  %v2281_v27 = vsel %vm1292_vm12, %v6807_v28, 0.0  ;;  %v4148_v42 = vld [vmem:[%s7399_s11 + $0x68] sm:$0xff]  ;;  %v4150_v9 = vld [vmem:[%s7399_s11 + $0x78] sm:$0xff] }
 0x86e   :  { %v6815_v37 = vadd.f32 %v4112_v59, %v2253_v1  ;;  %2282 = vadd.xlane.f32.xlu1 %v2281_v27  ;;  %v4149_v1 = vld [vmem:[%s7399_s11 + $0x70] sm:$0xff] }
 0x86f   :  { %v6817_v18 = vadd.f32 %v4112_v59, %v2252_v26  ;;  %v4115_v26 = vld [vmem:[%s7400_s8 + $0x20] sm:$0xff] }
 0x870   :  { %v2290_v5 = vsel %vm1292_vm12, %v6815_v37, 0.0  ;;  %4524 = vmatprep.mubr.msk.f32.mxu0 %vm1450_vm9, %v4115_v26 }
 0x871   :  { %2291 = vadd.xlane.f32.xlu0 %v2290_v5  ;;  %v2287_v10 = vsel %vm1292_vm12, %v6817_v18, 0.0 }
 0x872   :  { %2288 = vadd.xlane.f32.xlu1 %v2287_v10 }
 0x8ef   :  { %v2274_v48 = vpop.xlane.xlu0 %2273 }
 0x8f0   :  { %v2294_v21 = vmul.f32 0.03125, %v2274_v48  ;;  %v2271_v36 = vpop.xlane.xlu1 %2270 }
 0x8f1   :  { %v2293_v61 = vmul.f32 0.03125, %v2271_v36 }
 0x8f2   :  { %v6824_v30 = vsub.f32 %v6785_v35, %v2294_v21 }
 0x8f3   :  { %v6827_v17 = vsub.f32 %v6787_v62, %v2293_v61 }
 0x8f4   :  { %v2310_v22 = vmul.f32 %v6824_v30, %v6824_v30 }
 0x8f5   :  { %v2309_v47 = vmul.f32 %v6827_v17, %v6827_v17 }
 0x8f6   :  { %v2280_v11 = vpop.xlane.xlu0 %2279  ;;  %v2320_v52 = vsel %vm1292_vm12, %v2310_v22, 0.0 }
 0x8f7   :  { %v2296_v2 = vmul.f32 0.03125, %v2280_v11  ;;  %2321 = vadd.xlane.f32.xlu0 %v2320_v52  ;;  %v2277_v19 = vpop.xlane.xlu1 %2276  ;;  %v2317_v16 = vsel %vm1292_vm12, %v2309_v47, 0.0 }
 0x8f8   :  { %v2295_v34 = vmul.f32 0.03125, %v2277_v19  ;;  %2318 = vadd.xlane.f32.xlu1 %v2317_v16 }
 0x8f9   :  { %v6836_v51 = vsub.f32 %v6795_v13, %v2296_v2 }
 0x8fa   :  { %v6839_v38 = vsub.f32 %v6797_v25, %v2295_v34  ;;  %v2286_v3 = vpop.xlane.xlu0 %2285 }
 0x8fb   :  { %v2298_v8 = vmul.f32 0.03125, %v2286_v3  ;;  %v2283_v7 = vpop.xlane.xlu1 %2282  ;;  %v2312_v56 = vmul.f32 %v6836_v51, %v6836_v51 }
 0x8fc   :  { %v2297_v24 = vmul.f32 0.03125, %v2283_v7  ;;  %v2311_v58 = vmul.f32 %v6839_v38, %v6839_v38 }
 0x8fd   :  { %v6846_v53 = vsub.f32 %v6805_v41, %v2298_v8  ;;  %v2326_v4 = vsel %vm1292_vm12, %v2312_v56, 0.0 }
 0x8fe   :  { %v6850_v0 = vsub.f32 %v6807_v28, %v2297_v24  ;;  %2327 = vadd.xlane.f32.xlu0 %v2326_v4  ;;  %v2292_v12 = vpop.xlane.xlu0 %2291  ;;  %v2323_v29 = vsel %vm1292_vm12, %v2311_v58, 0.0  ;;  %v4113_v58 = vld [vmem:[%s7458_s27 + $0xe] ss:$0 sm:$0xff] }
 0x8ff   :  { %v2300_v45 = vmul.f32 0.03125, %v2292_v12  ;;  %2324 = vadd.xlane.f32.xlu1 %v2323_v29  ;;  %v2289_v60 = vpop.xlane.xlu1 %2288  ;;  %v2314_v57 = vmul.f32 %v6846_v53, %v6846_v53 }
 0x900   :  { %v2299_v54 = vmul.f32 0.03125, %v2289_v60  ;;  %v2313_v23 = vmul.f32 %v6850_v0, %v6850_v0 }
 0x901   :  { %v6858_v59 = vsub.f32 %v6815_v37, %v2300_v45  ;;  %v2332_v44 = vsel %vm1292_vm12, %v2314_v57, 0.0  ;;  %v4114_v57 = vld [vmem:[%s7458_s27 + $0xf] ss:$0 sm:$0xff] }
 0x902   :  { %v6862_v50 = vsub.f32 %v6817_v18, %v2299_v54  ;;  %2333 = vadd.xlane.f32.xlu0 %v2332_v44  ;;  %v2329_v32 = vsel %vm1292_vm12, %v2313_v23, 0.0 }
 0x903   :  { %2330 = vadd.xlane.f32.xlu1 %v2329_v32  ;;  %v2316_v40 = vmul.f32 %v6858_v59, %v6858_v59 }
 0x904   :  { %v2315_v39 = vmul.f32 %v6862_v50, %v6862_v50 }
 0x905   :  { %v2338_v49 = vsel %vm1292_vm12, %v2316_v40, 0.0 }
 0x906   :  { %2339 = vadd.xlane.f32.xlu0 %v2338_v49  ;;  %v2335_v15 = vsel %vm1292_vm12, %v2315_v39, 0.0 }
 0x907   :  { %2336 = vadd.xlane.f32.xlu1 %v2335_v15 }
 0x918   :  { %2409 = vperm.xlu1 %4895, %v4119_v63  }
 0x91c   :  { %2414 = vperm.xlu0 %4894, %v4120_v43   ;;  %2419 = vperm.xlu1 %4895, %v4121_v14  }
 0x920   :  { %2717 = vperm.xlu0 %4894, %v4143_v20   ;;  %2424 = vperm.xlu1 %4895, %v4122_v55  }
 0x924   :  { %2727 = vperm.xlu0 %4894, %v4145_v46   ;;  %2722 = vperm.xlu1 %4895, %v4144_v33  }
 0x928   :  { %2737 = vperm.xlu0 %4894, %v4147_v31   ;;  %2732 = vperm.xlu1 %4895, %v4146_v6  }
 0x92c   :  { %2747 = vperm.xlu0 %4894, %v4149_v1   ;;  %2742 = vperm.xlu1 %4895, %v4148_v42  }
 0x930   :  { %2752 = vperm.xlu1 %4895, %v4150_v9  }
 0x984   :  { %v2322_v27 = vpop.xlane.xlu0 %2321 }
 0x985   :  { %v2342_v5 = vmul.f32 0.03125, %v2322_v27  ;;  %v2319_v10 = vpop.xlane.xlu1 %2318 }
 0x986   :  { %v2341_v48 = vmul.f32 0.03125, %v2319_v10 }
 0x987   :  { %v2350_v21 = vadd.f32 1e-05, %v2342_v5 }
 0x988   :  { %v2349_v36 = vadd.f32 1e-05, %v2341_v48 }
 0x989   :  { %4984 = vrsqrt.f32 %v2350_v21 }
 0x98a   :  { %4986 = vrsqrt.f32 %v2349_v36 }
 0x98b   :  { %v2328_v61 = vpop.xlane.xlu0 %2327 }
 0x98c   :  { %v2344_v22 = vmul.f32 0.03125, %v2328_v61  ;;  %v2325_v47 = vpop.xlane.xlu1 %2324 }
 0x98d   :  { %v2343_v11 = vmul.f32 0.03125, %v2325_v47  ;;  %v4116_v47 = vld [vmem:[%s7400_s8 + $0x28] sm:$0xff] }
 0x98e   :  { %v2352_v52 = vadd.f32 1e-05, %v2344_v22 }
 0x98f   :  { %v2351_v2 = vadd.f32 1e-05, %v2343_v11  ;;  %v2334_v19 = vpop.xlane.xlu0 %2333  ;;  %v4127_v11 = vld [vmem:[%s7401_s9 + $0x40] sm:$0xff] }
 0x990   :  { %4988 = vrsqrt.f32 %v2352_v52  ;;  %v2346_v16 = vmul.f32 0.03125, %v2334_v19  ;;  %v2331_v34 = vpop.xlane.xlu1 %2330 }
 0x991   :  { %4990 = vrsqrt.f32 %v2351_v2  ;;  %v2345_v3 = vmul.f32 0.03125, %v2331_v34 }
 0x992   :  { %v2354_v8 = vadd.f32 1e-05, %v2346_v16 }
 0x993   :  { %v4985_v7 = vpop.eup %4984  ;;  %v2353_v56 = vadd.f32 1e-05, %v2345_v3  ;;  %v2340_v24 = vpop.xlane.xlu0 %2339 }
 0x994   :  { %v4987_v4 = vpop.eup %4986  ;;  %4992 = vrsqrt.f32 %v2354_v8  ;;  %v2348_v12 = vmul.f32 0.03125, %v2340_v24  ;;  %v2337_v29 = vpop.xlane.xlu1 %2336  ;;  %v2366_v45 = vmul.f32 %v4985_v7, %v6824_v30 }
 0x995   :  { %4994 = vrsqrt.f32 %v2353_v56  ;;  %v2347_v60 = vmul.f32 0.03125, %v2337_v29  ;;  %v2365_v54 = vmul.f32 %v4987_v4, %v6827_v17 }
 0x996   :  { %v2356_v23 = vadd.f32 1e-05, %v2348_v12  ;;  %v2378_v44 = vmul.f32 %v4113_v58, %v2366_v45 }
 0x997   :  { %v2355_v32 = vadd.f32 1e-05, %v2347_v60  ;;  %v2377_v40 = vmul.f32 %v4113_v58, %v2365_v54 }
 0x998   :  { %4996 = vrsqrt.f32 %v2356_v23  ;;  %v2390_v39 = vadd.f32 %v4114_v57, %v2378_v44  ;;  %v2410_v52 = vpop.permute.xlu1 %2409 }
 0x999   :  { %4998 = vrsqrt.f32 %v2355_v32  ;;  %v2389_v49 = vadd.f32 %v4114_v57, %v2377_v40 }
 0x99a   :  { %v4989_v15 = vpop.eup %4988 }
 0x99b   :  { %v4991_v63 = vpop.eup %4990  ;;  %v4746_v43 = vpack.c.bf16 %v2390_v39, %v2389_v49  ;;  %v2368_v30 = vmul.f32 %v4989_v15, %v6836_v51  ;;  %v2415_v19 = vpop.permute.xlu0 %2414 }
 0x99c   :  { %v2367_v14 = vmul.f32 %v4991_v63, %v6839_v38  ;;  %v2420_v2 = vpop.permute.xlu1 %2419 }
 0x99d   :  { %4747 = vmatprep.subr.bf16.mxu0 %v4746_v43  ;;  %v2380_v20 = vmul.f32 %v4113_v58, %v2368_v30 }
 0x99e   :  { %v4993_v55 = vpop.eup %4992  ;;  %4749 = vmatpush3.bf16.msra.mxu0 %v4746_v43  ;;  %v2379_v17 = vmul.f32 %v4113_v58, %v2367_v14 }
 0x99f   :  { %v4995_v46 = vpop.eup %4994  ;;  %v2392_v33 = vadd.f32 %v4114_v57, %v2380_v20  ;;  %v2370_v31 = vmul.f32 %v4993_v55, %v6846_v53 }
 0x9a0   :  { %v2391_v6 = vadd.f32 %v4114_v57, %v2379_v17  ;;  %v2369_v1 = vmul.f32 %v4995_v46, %v6850_v0  ;;  %v2425_v56 = vpop.permute.xlu1 %2424 }
 0x9a1   :  { %v2382_v42 = vmul.f32 %v4113_v58, %v2370_v31 }
 0x9a2   :  { %v4997_v9 = vpop.eup %4996  ;;  %v4750_v26 = vpack.c.bf16 %v2392_v33, %v2391_v6  ;;  %v2381_v27 = vmul.f32 %v4113_v58, %v2369_v1 }
 0x9a3   :  { %v4999_v5 = vpop.eup %4998  ;;  %v2394_v51 = vadd.f32 %v4114_v57, %v2382_v42  ;;  %v2372_v38 = vmul.f32 %v4997_v9, %v6858_v59  ;;  %v4117_v59 = vld [vmem:[%s7400_s8 + $0x30] sm:$0xff] }
 0x9a4   :  { %4751 = vmatprep.subr.bf16.mxu0 %v4750_v26  ;;  %v2393_v10 = vadd.f32 %v4114_v57, %v2381_v27  ;;  %v2371_v48 = vmul.f32 %v4999_v5, %v6862_v50  ;;  %v4118_v50 = vld [vmem:[%s7400_s8 + $0x38] sm:$0xff] }
 0x9a5   :  { %4753 = vmatpush3.bf16.msra.mxu0 %v4750_v26  ;;  %v2384_v21 = vmul.f32 %v4113_v58, %v2372_v38 }
 0x9a6   :  { %v4754_v36 = vpack.c.bf16 %v2394_v51, %v2393_v10  ;;  %v2383_v61 = vmul.f32 %v4113_v58, %v2371_v48 }
 0x9a7   :  { %v2396_v53 = vadd.f32 %v4114_v57, %v2384_v21 }
 0x9a8   :  { %4755 = vmatprep.subr.bf16.mxu0 %v4754_v36  ;;  %v2395_v22 = vadd.f32 %v4114_v57, %v2383_v61 }
 0x9a9   :  { %4757 = vmatpush3.bf16.msra.mxu0 %v4754_v36 }
 0x9aa   :  { %v4758_v0 = vpack.c.bf16 %v2396_v53, %v2395_v22  ;;  %v4128_v22 = vld [vmem:[%s7401_s9 + $0x48] sm:$0xff] }
 0x9ac   :  { %4759 = vmatprep.subr.bf16.mxu0 %v4758_v0 }
 0x9ad   :  { %4761 = vmatpush3.bf16.msra.mxu0 %v4758_v0  ;;  %v4129_v0 = vld [vmem:[%s7401_s9 + $0x50] sm:$0xff] }
 0x9b0   :  { %4525 = vmatmul.mubr.msk.f32.vlgmr.msra.gmra.mrb[16].mxu0 %vm1450_vm9, %v4116_v47  ;;  %v4130_v47 = vld [vmem:[%s7401_s9 + $0x58] sm:$0xff] }
 0x9b1   :  { %4527 = vmatprep.mubr.msk.f32.mxu0 %vm1450_vm9, %v4117_v59  ;;  %v4131_v59 = vld [vmem:[%s7401_s9 + $0x60] sm:$0xff] }
 0x9b4   :  { %4528 = vmatmul.mubr.msk.f32.gmra.mrb[18].mxu0 %vm1450_vm9, %v4118_v50  ;;  %v4132_v50 = vld [vmem:[%s7401_s9 + $0x68] sm:$0xff] }
 0x9b5   :  { %4538 = vmatprep.mubr.msk.f32.mxu0 %vm1292_vm12, %v4127_v11  ;;  %v4133_v11 = vld [vmem:[%s7401_s9 + $0x70] sm:$0xff] }
 0xa83   :  { %v4526_v16 = vpop.f32.mrb[16].mxu0 }
 0xa84   :  { %v2511_v34 = vadd.f32 %v4526_v16, %v2415_v19  ;;  %v2505_v3 = vpop.f32.mrb[17].mxu0  ;;  %v2723_v19 = vpop.permute.xlu1 %2722 }
 0xa85   :  { %v2506_v8 = vadd.f32 %v2505_v3, %v2410_v52  ;;  %v4134_v52 = vld [vmem:[%s7401_s9 + $0x78] sm:$0xff] }
 0xa86   :  { %v2529_v7 = vmul.f32 0.044715, %v2511_v34  ;;  %v2525_v31 = vmul.f32 0.5, %v2511_v34 }
 0xa87   :  { %v2528_v24 = vmul.f32 0.044715, %v2506_v8  ;;  %v4529_v58 = vpop.f32.mrb[18].mxu0  ;;  %v2524_v1 = vmul.f32 0.5, %v2506_v8 }
 0xa88   :  { %v2533_v4 = vmul.f32 %v2529_v7, %v2511_v34  ;;  %v2521_v12 = vadd.f32 %v4529_v58, %v2425_v56  ;;  %v2515_v29 = vpop.f32.mrb[19].mxu0 }
 0xa89   :  { %v2532_v45 = vmul.f32 %v2528_v24, %v2506_v8  ;;  %v2516_v60 = vadd.f32 %v2515_v29, %v2420_v2  ;;  %v2718_v2 = vpop.permute.xlu0 %2717 }
 0xa8a   :  { %v2537_v57 = vmul.f32 %v2533_v4, %v2511_v34  ;;  %v2531_v54 = vmul.f32 0.044715, %v2521_v12  ;;  %v2527_v51 = vmul.f32 0.5, %v2521_v12  ;;  %v2733_v4 = vpop.permute.xlu1 %2732 }
 0xa8b   :  { %v2536_v23 = vmul.f32 %v2532_v45, %v2506_v8  ;;  %v2530_v44 = vmul.f32 0.044715, %v2516_v60  ;;  %v2526_v48 = vmul.f32 0.5, %v2516_v60 }
 0xa8c   :  { %v2535_v32 = vmul.f32 %v2531_v54, %v2521_v12  ;;  %v2541_v40 = vadd.f32 %v2537_v57, %v2511_v34 }
 0xa8d   :  { %v2534_v39 = vmul.f32 %v2530_v44, %v2516_v60  ;;  %v2540_v49 = vadd.f32 %v2536_v23, %v2506_v8  ;;  %v2728_v7 = vpop.permute.xlu0 %2727 }
 0xa8e   :  { %v2539_v15 = vmul.f32 %v2535_v32, %v2521_v12  ;;  %v2545_v63 = vmul.f32 0.7978846, %v2541_v40 }
 0xa8f   :  { %v2538_v43 = vmul.f32 %v2534_v39, %v2516_v60  ;;  %v2544_v30 = vmul.f32 0.7978846, %v2540_v49 }
 0xa90   :  { %5000 = vtanh.f32 %v2545_v63  ;;  %v2543_v14 = vadd.f32 %v2539_v15, %v2521_v12 }
 0xa91   :  { %5002 = vtanh.f32 %v2544_v30  ;;  %v2542_v20 = vadd.f32 %v2538_v43, %v2516_v60  ;;  %v2738_v54 = vpop.permute.xlu0 %2737 }
 0xa92   :  { %v2547_v55 = vmul.f32 0.7978846, %v2543_v14 }
 0xa93   :  { %v2546_v17 = vmul.f32 0.7978846, %v2542_v20 }
 0xa94   :  { %5004 = vtanh.f32 %v2547_v55 }
 0xa95   :  { %5006 = vtanh.f32 %v2546_v17  ;;  %v2748_v14 = vpop.permute.xlu0 %2747 }
 0xa9a   :  { %v5001_v46 = vpop.eup %5000 }
 0xa9b   :  { %v5003_v33 = vpop.eup %5002  ;;  %v2553_v6 = vadd.f32 1.0, %v5001_v46 }
 0xa9c   :  { %v2552_v42 = vadd.f32 1.0, %v5003_v33 }
 0xa9d   :  { %v2557_v9 = vmul.f32 %v2553_v6, %v2525_v31 }
 0xa9e   :  { %v5005_v26 = vpop.eup %5004  ;;  %v2556_v27 = vmul.f32 %v2552_v42, %v2524_v1 }
 0xa9f   :  { %v5007_v5 = vpop.eup %5006  ;;  %v2555_v38 = vadd.f32 1.0, %v5005_v26 }
 0xaa0   :  { %v4762_v10 = vpack.c.bf16 %v2557_v9, %v2556_v27  ;;  %v2554_v21 = vadd.f32 1.0, %v5007_v5 }
 0xaa1   :  { %v2559_v36 = vmul.f32 %v2555_v38, %v2527_v51 }
 0xaa2   :  { %4763 = vmatprep.subr.bf16.mxu0 %v4762_v10  ;;  %v2558_v61 = vmul.f32 %v2554_v21, %v2526_v48 }
 0xaa3   :  { %4765 = vmatpush3.bf16.msra.mxu0 %v4762_v10 }
 0xaa4   :  { %v4766_v53 = vpack.c.bf16 %v2559_v36, %v2558_v61 }
 0xaa6   :  { %4767 = vmatprep.subr.bf16.mxu0 %v4766_v53 }
 0xaa7   :  { %4769 = vmatpush3.bf16.msra.mxu0 %v4766_v53 }
 0xaaa   :  { %4539 = vmatmul.mubr.msk.f32.vlgmr.msra.gmra.mrb[20].mxu0 %vm1292_vm12, %v4128_v22 }
 0xaab   :  { %4541 = vmatprep.mubr.msk.f32.mxu0 %vm1292_vm12, %v4129_v0 }
 0xaae   :  { %4542 = vmatmul.mubr.msk.f32.gmra.mrb[22].mxu0 %vm1292_vm12, %v4130_v47 }
 0xaaf   :  { %4544 = vmatprep.mubr.msk.f32.mxu0 %vm1292_vm12, %v4131_v59 }
 0xab2   :  { %4545 = vmatmul.mubr.msk.f32.gmra.mrb[24].mxu0 %vm1292_vm12, %v4132_v50 }
 0xab3   :  { %4547 = vmatprep.mubr.msk.f32.mxu0 %vm1292_vm12, %v4133_v11 }
 0xab6   :  { %4548 = vmatmul.mubr.msk.f32.gmra.mrb[26].mxu0 %vm1292_vm12, %v4134_v52 }
 0xb7d   :  { %v4540_v16 = vpop.f32.mrb[20].mxu0 }
 0xb7e   :  { %v2699_v34 = vadd.f32 %v4540_v16, %v6785_v35  ;;  %v2659_v3 = vpop.f32.mrb[21].mxu0 }
 0xb7f   :  { %v2698_v8 = vadd.f32 %v2659_v3, %v6787_v62 }
 0xb80   :  { %v6971_v56 = vadd.f32 %v2723_v19, %v2699_v34 }
 0xb81   :  { %v6973_v24 = vadd.f32 %v2718_v2, %v2698_v8  ;;  %v4543_v58 = vpop.f32.mrb[22].mxu0 }
 0xb82   :  { %v2701_v12 = vadd.f32 %v4543_v58, %v6795_v13  ;;  %v2669_v29 = vpop.f32.mrb[23].mxu0  ;;  %v2768_v45 = vsel %vm1292_vm12, %v6971_v56, 0.0 }
 0xb83   :  { %v2700_v60 = vadd.f32 %v2669_v29, %v6797_v25  ;;  %2769 = vadd.xlane.f32.xlu1 %v2768_v45  ;;  %v2765_v35 = vsel %vm1292_vm12, %v6973_v24, 0.0  ;;  %v2743_v25 = vpop.permute.xlu1 %2742 }
 0xb84   :  { %2766 = vadd.xlane.f32.xlu0 %v2765_v35  ;;  %v6983_v23 = vadd.f32 %v2733_v4, %v2701_v12 }
 0xb85   :  { %v6981_v62 = vadd.f32 %v2728_v7, %v2700_v60  ;;  %v4546_v57 = vpop.f32.mrb[24].mxu0 }
 0xb86   :  { %v2679_v44 = vpop.f32.mrb[25].mxu0  ;;  %v2703_v13 = vadd.f32 %v4546_v57, %v6805_v41  ;;  %v2774_v63 = vsel %vm1292_vm12, %v6983_v23, 0.0 }
 0xb87   :  { %v2702_v32 = vadd.f32 %v2679_v44, %v6807_v28  ;;  %v2771_v40 = vsel %vm1292_vm12, %v6981_v62, 0.0  ;;  %v2753_v55 = vpop.permute.xlu1 %2752  ;;  %v4153_v44 = vld [vmem:[%s7402_s12 + $0x20] sm:$0xff] }
 0xb88   :  { %2772 = vadd.xlane.f32.xlu0 %v2771_v40  ;;  %v6993_v43 = vadd.f32 %v2743_v25, %v2703_v13  ;;  %v4154_v13 = vld [vmem:[%s7402_s12 + $0x28] sm:$0xff]  ;;  %v4155_v40 = vld [vmem:[%s7402_s12 + $0x30] sm:$0xff]  ;;  %v4156_v25 = vld [vmem:[%s7402_s12 + $0x38] sm:$0xff] }
 0xb89   :  { %v6989_v39 = vadd.f32 %v2738_v54, %v2702_v32  ;;  %v4549_v49 = vpop.f32.mrb[26].mxu0  ;;  %v4770_v32 = vpack.c.bf16 %v4154_v13, %v4153_v44 }
 0xb8a   :  { %v2689_v15 = vpop.f32.mrb[27].mxu0  ;;  %v2705_v30 = vadd.f32 %v4549_v49, %v6815_v37  ;;  %v2780_v33 = vsel %vm1292_vm12, %v6993_v43, 0.0  ;;  %v4774_v49 = vpack.c.bf16 %v4156_v25, %v4155_v40 }
 0xb8b   :  { %v2704_v41 = vadd.f32 %v2689_v15, %v6817_v18  ;;  %v2777_v28 = vsel %vm1292_vm12, %v6989_v39, 0.0  ;;  %4771 = vmatprep.subr.bf16.mxu1 %v4770_v32  ;;  %v4166_v15 = vld [vmem:[%s7403_s13 + $0x80] sm:$0xff] }
 0xb8c   :  { %2778 = vadd.xlane.f32.xlu1 %v2777_v28  ;;  %2775 = vadd.xlane.f32.xlu0 %v2774_v63  ;;  %v7001_v17 = vadd.f32 %v2753_v55, %v2705_v30  ;;  %v4167_v63 = vld [vmem:[%s7403_s13 + $0x88] sm:$0xff] }
 0xb8d   :  { %v6999_v20 = vadd.f32 %v2748_v14, %v2704_v41  ;;  %4773 = vmatpush3.bf16.msra.mxu1 %v4770_v32  ;;  %v4778_v30 = vpack.c.bf16 %v4167_v63, %v4166_v15 }
 0xb8e   :  { %v2786_v37 = vsel %vm1292_vm12, %v7001_v17, 0.0  ;;  %4775 = vmatprep.subr.bf16.mxu1 %v4774_v49 }
 0xb8f   :  { %v2783_v46 = vsel %vm1292_vm12, %v6999_v20, 0.0  ;;  %4779 = vmatprep.subr.bf16.mxu0 %v4778_v30 }
 0xb90   :  { %2784 = vadd.xlane.f32.xlu1 %v2783_v46  ;;  %2781 = vadd.xlane.f32.xlu0 %v2780_v33 }
 0xb91   :  { %4777 = vmatpush3.bf16.msra.mxu1 %v4774_v49  ;;  %4781 = vmatpush3.bf16.msra.mxu0 %v4778_v30 }
 0xb94   :  { %2787 = vadd.xlane.f32.xlu0 %v2786_v37 }
 0xc10   :  { %v2770_v18 = vpop.xlane.xlu1 %2769 }
 0xc11   :  { %v2790_v31 = vmul.f32 0.03125, %v2770_v18  ;;  %v2767_v6 = vpop.xlane.xlu0 %2766 }
 0xc12   :  { %v2789_v1 = vmul.f32 0.03125, %v2767_v6 }
 0xc13   :  { %v7010_v42 = vsub.f32 %v6971_v56, %v2790_v31 }
 0xc14   :  { %v7013_v9 = vsub.f32 %v6973_v24, %v2789_v1 }
 0xc15   :  { %v2773_v26 = vpop.xlane.xlu0 %2772  ;;  %v2806_v27 = vmul.f32 %v7010_v42, %v7010_v42 }
 0xc16   :  { %v2791_v5 = vmul.f32 0.03125, %v2773_v26  ;;  %v2805_v51 = vmul.f32 %v7013_v9, %v7013_v9 }
 0xc17   :  { %v2816_v38 = vsel %vm1292_vm12, %v2806_v27, 0.0 }
 0xc18   :  { %v7021_v10 = vsub.f32 %v6981_v62, %v2791_v5  ;;  %2817 = vadd.xlane.f32.xlu0 %v2816_v38  ;;  %v2813_v48 = vsel %vm1292_vm12, %v2805_v51, 0.0 }
 0xc19   :  { %2814 = vadd.xlane.f32.xlu1 %v2813_v48  ;;  %v2776_v21 = vpop.xlane.xlu0 %2775  ;;  %v2779_v36 = vpop.xlane.xlu1 %2778 }
 0xc1a   :  { %v2792_v61 = vmul.f32 0.03125, %v2776_v21  ;;  %v2793_v53 = vmul.f32 0.03125, %v2779_v36  ;;  %v2807_v22 = vmul.f32 %v7021_v10, %v7021_v10 }
 0xc1c   :  { %v7027_v0 = vsub.f32 %v6983_v23, %v2792_v61  ;;  %v7030_v47 = vsub.f32 %v6989_v39, %v2793_v53  ;;  %v2819_v59 = vsel %vm1292_vm12, %v2807_v22, 0.0  ;;  %v4151_v53 = vld [vmem:[%s7458_s27 + $0x10] ss:$0 sm:$0xff] }
 0xc1d   :  { %2820 = vadd.xlane.f32.xlu1 %v2819_v59  ;;  %v2782_v50 = vpop.xlane.xlu0 %2781  ;;  %v2785_v11 = vpop.xlane.xlu1 %2784 }
 0xc1e   :  { %v2794_v52 = vmul.f32 0.03125, %v2782_v50  ;;  %v2795_v2 = vmul.f32 0.03125, %v2785_v11  ;;  %v2808_v19 = vmul.f32 %v7027_v0, %v7027_v0  ;;  %v2809_v16 = vmul.f32 %v7030_v47, %v7030_v47 }
 0xc20   :  { %v7038_v34 = vsub.f32 %v6993_v43, %v2794_v52  ;;  %v7041_v3 = vsub.f32 %v6999_v20, %v2795_v2  ;;  %v2822_v8 = vsel %vm1292_vm12, %v2808_v19, 0.0  ;;  %v2825_v7 = vsel %vm1292_vm12, %v2809_v16, 0.0  ;;  %v4152_v19 = vld [vmem:[%s7458_s27 + $0x11] ss:$0 sm:$0xff] }
 0xc21   :  { %v2788_v58 = vpop.xlane.xlu0 %2787  ;;  %2823 = vadd.xlane.f32.xlu0 %v2822_v8  ;;  %2826 = vadd.xlane.f32.xlu1 %v2825_v7 }
 0xc22   :  { %v2796_v4 = vmul.f32 0.03125, %v2788_v58  ;;  %v2810_v12 = vmul.f32 %v7038_v34, %v7038_v34  ;;  %v2811_v29 = vmul.f32 %v7041_v3, %v7041_v3 }
 0xc24   :  { %v7050_v45 = vsub.f32 %v7001_v17, %v2796_v4  ;;  %v2828_v60 = vsel %vm1292_vm12, %v2810_v12, 0.0  ;;  %v2831_v35 = vsel %vm1292_vm12, %v2811_v29, 0.0 }
 0xc25   :  { %2829 = vadd.xlane.f32.xlu0 %v2828_v60  ;;  %2832 = vadd.xlane.f32.xlu1 %v2831_v35 }
 0xc26   :  { %v2812_v57 = vmul.f32 %v7050_v45, %v7050_v45 }
 0xc28   :  { %v2834_v54 = vsel %vm1292_vm12, %v2812_v57, 0.0 }
 0xc29   :  { %2835 = vadd.xlane.f32.xlu0 %v2834_v54 }
 0xca5   :  { %v2818_v41 = vpop.xlane.xlu0 %2817 }
 0xca6   :  { %v2838_v28 = vmul.f32 0.03125, %v2818_v41  ;;  %v2815_v14 = vpop.xlane.xlu1 %2814 }
 0xca7   :  { %v2837_v55 = vmul.f32 0.03125, %v2815_v14 }
 0xca8   :  { %v2846_v46 = vadd.f32 1e-05, %v2838_v28 }
 0xca9   :  { %v2845_v33 = vadd.f32 1e-05, %v2837_v55 }
 0xcaa   :  { %5008 = vrsqrt.f32 %v2846_v46  ;;  %v2821_v37 = vpop.xlane.xlu1 %2820  ;;  %v4169_v46 = vld [vmem:[%s7403_s13 + $0x98] sm:$0xff] }
 0xcab   :  { %5010 = vrsqrt.f32 %v2845_v33  ;;  %v2839_v18 = vmul.f32 0.03125, %v2821_v37  ;;  %v4171_v37 = vld [vmem:[%s7403_s13 + $0xa8] sm:$0xff] }
 0xcad   :  { %v2847_v31 = vadd.f32 1e-05, %v2839_v18 }
 0xcae   :  { %v2824_v6 = vpop.xlane.xlu0 %2823  ;;  %v2827_v1 = vpop.xlane.xlu1 %2826 }
 0xcaf   :  { %5012 = vrsqrt.f32 %v2847_v31  ;;  %v2840_v26 = vmul.f32 0.03125, %v2824_v6  ;;  %v2841_v27 = vmul.f32 0.03125, %v2827_v1  ;;  %v4172_v31 = vld [vmem:[%s7403_s13 + $0xb0] sm:$0xff]  ;;  %v4173_v6 = vld [vmem:[%s7403_s13 + $0xb8] sm:$0xff] }
 0xcb0   :  { %v4790_v1 = vpack.c.bf16 %v4173_v6, %v4172_v31 }
 0xcb1   :  { %v2848_v5 = vadd.f32 1e-05, %v2840_v26  ;;  %v2849_v51 = vadd.f32 1e-05, %v2841_v27  ;;  %v4174_v26 = vld [vmem:[%s7403_s13 + $0xc0] sm:$0xff]  ;;  %v4175_v27 = vld [vmem:[%s7403_s13 + $0xc8] sm:$0xff] }
 0xcb2   :  { %v2830_v38 = vpop.xlane.xlu0 %2829  ;;  %v2833_v48 = vpop.xlane.xlu1 %2832 }
 0xcb3   :  { %5014 = vrsqrt.f32 %v2848_v5  ;;  %v2842_v21 = vmul.f32 0.03125, %v2830_v38  ;;  %v2843_v36 = vmul.f32 0.03125, %v2833_v48  ;;  %v4794_v5 = vpack.c.bf16 %v4175_v27, %v4174_v26  ;;  %v4177_v38 = vld [vmem:[%s7403_s13 + $0xd8] sm:$0xff] }
 0xcb4   :  { %v5009_v61 = vpop.eup %5008  ;;  %5016 = vrsqrt.f32 %v2849_v51  ;;  %v4176_v51 = vld [vmem:[%s7403_s13 + $0xd0] sm:$0xff] }
 0xcb5   :  { %v5011_v22 = vpop.eup %5010  ;;  %v2862_v59 = vmul.f32 %v5009_v61, %v7010_v42  ;;  %v2850_v50 = vadd.f32 1e-05, %v2842_v21  ;;  %v2851_v11 = vadd.f32 1e-05, %v2843_v36  ;;  %v4798_v48 = vpack.c.bf16 %v4177_v38, %v4176_v51  ;;  %v4178_v21 = vld [vmem:[%s7403_s13 + $0xe0] sm:$0xff]  ;;  %v4179_v36 = vld [vmem:[%s7403_s13 + $0xe8] sm:$0xff] }
 0xcb6   :  { %v2836_v52 = vpop.xlane.xlu0 %2835  ;;  %v2861_v2 = vmul.f32 %v5011_v22, %v7013_v9  ;;  %v4802_v61 = vpack.c.bf16 %v4179_v36, %v4178_v21  ;;  %v4181_v22 = vld [vmem:[%s7403_s13 + $0xf8] sm:$0xff] }
 0xcb7   :  { %v2874_v16 = vmul.f32 %v4151_v53, %v2862_v59  ;;  %5018 = vrsqrt.f32 %v2850_v50  ;;  %v2844_v8 = vmul.f32 0.03125, %v2836_v52  ;;  %v4157_v50 = vld [vmem:[%s7458_s27 + $0x12] ss:$0 sm:$0xff] }
 0xcb8   :  { %5020 = vrsqrt.f32 %v2851_v11  ;;  %v2873_v7 = vmul.f32 %v4151_v53, %v2861_v2 }
 0xcb9   :  { %v5013_v58 = vpop.eup %5012  ;;  %v2852_v4 = vadd.f32 1e-05, %v2844_v8  ;;  %v2886_v42 = vadd.f32 %v4152_v19, %v2874_v16 }
 0xcba   :  { %v2885_v12 = vadd.f32 %v4152_v19, %v2873_v7  ;;  %v2863_v29 = vmul.f32 %v5013_v58, %v7021_v10 }
 0xcbb   :  { %5022 = vrsqrt.f32 %v2852_v4 }
 0xcbc   :  { %4558 = vmatprep.mubr.msk.f32.mxu1 %vm1292_vm12, %v2885_v12  ;;  %v2875_v60 = vmul.f32 %v4151_v53, %v2863_v29 }
 0xcbd   :  { %v5015_v9 = vpop.eup %5014  ;;  %4559 = vmatmul.mubr.msk.f32.vlgmr.msra.gmra.mrb[20].mxu1 %vm1292_vm12, %v2886_v42 }
 0xcbe   :  { %v5017_v35 = vpop.eup %5016  ;;  %v2887_v57 = vadd.f32 %v4152_v19, %v2875_v60  ;;  %v2864_v54 = vmul.f32 %v5015_v9, %v7027_v0 }
 0xcbf   :  { %v2865_v44 = vmul.f32 %v5017_v35, %v7030_v47 }
 0xcc0   :  { %4561 = vmatprep.mubr.msk.f32.mxu1 %vm1292_vm12, %v2887_v57  ;;  %v2876_v13 = vmul.f32 %v4151_v53, %v2864_v54 }
 0xcc1   :  { %v5019_v32 = vpop.eup %5018  ;;  %v2877_v40 = vmul.f32 %v4151_v53, %v2865_v44 }
 0xcc2   :  { %v5021_v10 = vpop.eup %5020  ;;  %v2888_v25 = vadd.f32 %v4152_v19, %v2876_v13  ;;  %v2866_v49 = vmul.f32 %v5019_v32, %v7038_v34 }
 0xcc3   :  { %v2889_v15 = vadd.f32 %v4152_v19, %v2877_v40  ;;  %v2867_v63 = vmul.f32 %v5021_v10, %v7041_v3  ;;  %v4168_v3 = vld [vmem:[%s7403_s13 + $0x90] sm:$0xff] }
 0xcc4   :  { %4562 = vmatmul.mubr.msk.f32.gmra.mrb[22].mxu1 %vm1292_vm12, %v2888_v25  ;;  %v2878_v30 = vmul.f32 %v4151_v53, %v2866_v49  ;;  %v4782_v33 = vpack.c.bf16 %v4169_v46, %v4168_v3 }
 0xcc5   :  { %v5023_v41 = vpop.eup %5022  ;;  %4564 = vmatprep.mubr.msk.f32.mxu1 %vm1292_vm12, %v2889_v15  ;;  %v2879_v0 = vmul.f32 %v4151_v53, %v2867_v63 }
 0xcc6   :  { %v2890_v47 = vadd.f32 %v4152_v19, %v2878_v30  ;;  %v2868_v28 = vmul.f32 %v5023_v41, %v7050_v45  ;;  %v4170_v45 = vld [vmem:[%s7403_s13 + $0xa0] sm:$0xff]  ;;  %4783 = vmatprep.subr.bf16.mxu0 %v4782_v33 }
 0xcc7   :  { %v2891_v14 = vadd.f32 %v4152_v19, %v2879_v0  ;;  %v4786_v18 = vpack.c.bf16 %v4171_v37, %v4170_v45  ;;  %4785 = vmatpush3.bf16.msra.mxu0 %v4782_v33 }
 0xcc8   :  { %4565 = vmatmul.mubr.msk.f32.gmra.mrb[24].mxu1 %vm1292_vm12, %v2890_v47  ;;  %v2880_v55 = vmul.f32 %v4151_v53, %v2868_v28  ;;  %v4180_v53 = vld [vmem:[%s7403_s13 + $0xf0] sm:$0xff] }
 0xcc9   :  { %4567 = vmatprep.mubr.msk.f32.mxu1 %vm1292_vm12, %v2891_v14  ;;  %4787 = vmatprep.subr.bf16.mxu0 %v4786_v18  ;;  %v4806_v59 = vpack.c.bf16 %v4181_v22, %v4180_v53 }
 0xcca   :  { %v2892_v34 = vadd.f32 %v4152_v19, %v2880_v55 }
 0xccb   :  { %4789 = vmatpush3.bf16.msra.mxu0 %v4786_v18 }
 0xccc   :  { %4568 = vmatmul.mubr.msk.f32.gmra.mrb[26].mxu1 %vm1292_vm12, %v2892_v34  ;;  %4791 = vmatprep.subr.bf16.mxu0 %v4790_v1 }
 0xccf   :  { %4793 = vmatpush3.bf16.msra.mxu0 %v4790_v1 }
 0xcd0   :  { %4795 = vmatprep.subr.bf16.mxu0 %v4794_v5 }
 0xcd3   :  { %4797 = vmatpush3.bf16.msra.mxu0 %v4794_v5 }
 0xcd4   :  { %4799 = vmatprep.subr.bf16.mxu0 %v4798_v48 }
 0xcd7   :  { %4801 = vmatpush3.bf16.msra.mxu0 %v4798_v48 }
 0xcd8   :  { %4803 = vmatprep.subr.bf16.mxu0 %v4802_v61 }
 0xcdb   :  { %4805 = vmatpush3.bf16.msra.mxu0 %v4802_v61 }
 0xcdc   :  { %4807 = vmatprep.subr.bf16.mxu0 %v4806_v59 }
 0xcdf   :  { %4809 = vmatpush3.bf16.msra.mxu0 %v4806_v59 }
 0xd90   :  { %v4560_v11 = vpop.f32.mrb[20].mxu1 }
 0xd91   :  { %v7142_v52 = vadd.f32 %v4560_v11, %v4157_v50  ;;  %v2993_v2 = vpop.f32.mrb[21].mxu1 }
 0xd92   :  { %v2994_v19 = vadd.f32 %v4157_v50, %v2993_v2 }
 0xd93   :  { %v3041_v16 = vmul.f32 0.044715, %v7142_v52 }
 0xd94   :  { %v3040_v8 = vmul.f32 0.044715, %v2994_v19  ;;  %v3032_v11 = vmul.f32 0.5, %v2994_v19 }
 0xd95   :  { %v3049_v7 = vmul.f32 %v3041_v16, %v7142_v52 }
 0xd96   :  { %v3048_v58 = vmul.f32 %v3040_v8, %v2994_v19  ;;  %v3033_v8 = vmul.f32 0.5, %v7142_v52 }
 0xd97   :  { %v3057_v4 = vmul.f32 %v3049_v7, %v7142_v52  ;;  %v4563_v12 = vpop.f32.mrb[22].mxu1 }
 0xd98   :  { %v7147_v29 = vadd.f32 %v4563_v12, %v4157_v50  ;;  %v3003_v42 = vpop.f32.mrb[23].mxu1  ;;  %v3056_v60 = vmul.f32 %v3048_v58, %v2994_v19 }
 0xd99   :  { %v3065_v9 = vadd.f32 %v3057_v4, %v7142_v52  ;;  %v3004_v35 = vadd.f32 %v4157_v50, %v3003_v42 }
 0xd9a   :  { %v3043_v57 = vmul.f32 0.044715, %v7147_v29  ;;  %v3064_v54 = vadd.f32 %v3056_v60, %v2994_v19  ;;  %v3035_v19 = vmul.f32 0.5, %v7147_v29 }
 0xd9b   :  { %v3073_v44 = vmul.f32 0.7978846, %v3065_v9  ;;  %v3042_v13 = vmul.f32 0.044715, %v3004_v35  ;;  %v4566_v32 = vpop.f32.mrb[24].mxu1 }
 0xd9c   :  { %v3051_v40 = vmul.f32 %v3043_v57, %v7147_v29  ;;  %v7152_v10 = vadd.f32 %v4566_v32, %v4157_v50  ;;  %v3013_v25 = vpop.f32.mrb[25].mxu1  ;;  %v3072_v49 = vmul.f32 0.7978846, %v3064_v54  ;;  %v3034_v57 = vmul.f32 0.5, %v3004_v35 }
 0xd9d   :  { %5024 = vtanh.f32 %v3073_v44  ;;  %v3050_v15 = vmul.f32 %v3042_v13, %v3004_v35  ;;  %v3014_v63 = vadd.f32 %v4157_v50, %v3013_v25 }
 0xd9e   :  { %v3045_v30 = vmul.f32 0.044715, %v7152_v10  ;;  %5026 = vtanh.f32 %v3072_v49  ;;  %v3059_v41 = vmul.f32 %v3051_v40, %v7147_v29 }
 0xd9f   :  { %v3044_v0 = vmul.f32 0.044715, %v3014_v63  ;;  %v4569_v47 = vpop.f32.mrb[26].mxu1  ;;  %v3058_v28 = vmul.f32 %v3050_v15, %v3004_v35  ;;  %v3036_v25 = vmul.f32 0.5, %v3014_v63  ;;  %v3037_v15 = vmul.f32 0.5, %v7152_v10 }
 0xda0   :  { %v3053_v14 = vmul.f32 %v3045_v30, %v7152_v10  ;;  %v7157_v55 = vadd.f32 %v4569_v47, %v4157_v50  ;;  %v3023_v34 = vpop.f32.mrb[27].mxu1  ;;  %v3067_v3 = vadd.f32 %v3059_v41, %v7147_v29 }
 0xda1   :  { %v3052_v46 = vmul.f32 %v3044_v0, %v3014_v63  ;;  %v3024_v45 = vadd.f32 %v4157_v50, %v3023_v34  ;;  %v3066_v33 = vadd.f32 %v3058_v28, %v3004_v35 }
 0xda2   :  { %v3047_v37 = vmul.f32 0.044715, %v7157_v55  ;;  %v3075_v18 = vmul.f32 0.7978846, %v3067_v3  ;;  %v3061_v31 = vmul.f32 %v3053_v14, %v7152_v10  ;;  %v3039_v29 = vmul.f32 0.5, %v7157_v55 }
 0xda3   :  { %v3046_v6 = vmul.f32 0.044715, %v3024_v45  ;;  %v3074_v1 = vmul.f32 0.7978846, %v3066_v33  ;;  %v3060_v26 = vmul.f32 %v3052_v46, %v3014_v63  ;;  %v3038_v35 = vmul.f32 0.5, %v3024_v45 }
 0xda4   :  { %v3055_v27 = vmul.f32 %v3047_v37, %v7157_v55  ;;  %5028 = vtanh.f32 %v3075_v18  ;;  %v3069_v5 = vadd.f32 %v3061_v31, %v7152_v10  ;;  %v4182_v10 = vld [vmem:[%s7458_s27 + $0x13] ss:$0 sm:$0xff] }
 0xda5   :  { %v3054_v51 = vmul.f32 %v3046_v6, %v3024_v45  ;;  %5030 = vtanh.f32 %v3074_v1  ;;  %v3068_v38 = vadd.f32 %v3060_v26, %v3014_v63 }
 0xda6   :  { %v3077_v48 = vmul.f32 0.7978846, %v3069_v5  ;;  %v3063_v21 = vmul.f32 %v3055_v27, %v7157_v55 }
 0xda7   :  { %v5025_v36 = vpop.eup %5024  ;;  %v3076_v61 = vmul.f32 0.7978846, %v3068_v38  ;;  %v3062_v53 = vmul.f32 %v3054_v51, %v3024_v45 }
 0xda8   :  { %v5027_v22 = vpop.eup %5026  ;;  %v3089_v59 = vadd.f32 1.0, %v5025_v36  ;;  %5032 = vtanh.f32 %v3077_v48  ;;  %v3071_v50 = vadd.f32 %v3063_v21, %v7157_v55 }
 0xda9   :  { %v3088_v2 = vadd.f32 1.0, %v5027_v22  ;;  %5034 = vtanh.f32 %v3076_v61  ;;  %v3070_v16 = vadd.f32 %v3062_v53, %v3024_v45 }
 0xdaa   :  { %v3079_v7 = vmul.f32 0.7978846, %v3071_v50  ;;  %v3097_v12 = vmul.f32 %v3089_v59, %v3033_v8 }
 0xdab   :  { %v3096_v58 = vmul.f32 %v3088_v2, %v3032_v11  ;;  %v3078_v4 = vmul.f32 0.7978846, %v3070_v16 }
 0xdac   :  { %5036 = vtanh.f32 %v3079_v7 }
 0xdad   :  { %4602 = vmatprep.mubr.f32.mxu0 %v3096_v58  ;;  %5038 = vtanh.f32 %v3078_v4 }
 0xdae   :  { %v5029_v42 = vpop.eup %5028  ;;  %4603 = vmatmul.mubr.f32.vlgmr.msra.gmra.mrb[28].mxu0 %v3097_v12 }
 0xdaf   :  { %v5031_v60 = vpop.eup %5030  ;;  %v3091_v9 = vadd.f32 1.0, %v5029_v42 }
 0xdb0   :  { %v3090_v54 = vadd.f32 1.0, %v5031_v60 }
 0xdb1   :  { %v3099_v40 = vmul.f32 %v3091_v9, %v3035_v19 }
 0xdb2   :  { %v5033_v44 = vpop.eup %5032  ;;  %v3098_v13 = vmul.f32 %v3090_v54, %v3034_v57 }
 0xdb3   :  { %v5035_v32 = vpop.eup %5034  ;;  %v3093_v52 = vadd.f32 1.0, %v5033_v44 }
 0xdb4   :  { %4605 = vmatprep.mubr.f32.mxu0 %v3098_v13  ;;  %v3092_v49 = vadd.f32 1.0, %v5035_v32 }
 0xdb5   :  { %4606 = vmatmul.mubr.f32.gmra.mrb[30].mxu0 %v3099_v40  ;;  %v3101_v47 = vmul.f32 %v3093_v52, %v3037_v15 }
 0xdb6   :  { %v5037_v30 = vpop.eup %5036  ;;  %v3100_v41 = vmul.f32 %v3092_v49, %v3036_v25 }
 0xdb7   :  { %v5039_v0 = vpop.eup %5038  ;;  %v3095_v28 = vadd.f32 1.0, %v5037_v30 }
 0xdb8   :  { %4608 = vmatprep.mubr.f32.mxu0 %v3100_v41  ;;  %v3094_v14 = vadd.f32 1.0, %v5039_v0 }
 0xdb9   :  { %4609 = vmatmul.mubr.f32.gmra.mrb[32].mxu0 %v3101_v47  ;;  %v3103_v3 = vmul.f32 %v3095_v28, %v3039_v29 }
 0xdba   :  { %v3102_v34 = vmul.f32 %v3094_v14, %v3038_v35 }
 0xdbc   :  { %4611 = vmatprep.mubr.f32.mxu0 %v3102_v34 }
 0xdbd   :  { %4612 = vmatmul.mubr.f32.gmra.mrb[34].mxu0 %v3103_v3 }
 0xe81   :  { %v4604_v63 = vpop.f32.mrb[28].mxu0 }
 0xe82   :  { %v3227_v46 = vadd.f32 %v4604_v63, %v6971_v56  ;;  %v3187_v33 = vpop.f32.mrb[29].mxu0 }
 0xe83   :  { %v3226_v37 = vadd.f32 %v3187_v33, %v6973_v24 }
 0xe84   :  { %v3240_v18 = vadd.f32 %v4182_v10, %v3227_v46 }
 0xe85   :  { %v3239_v45 = vadd.f32 %v4182_v10, %v3226_v37 }
 0xe86   :  { %v3252_v31 = vsel %vm1292_vm12, %v3240_v18, 0.0 }
 0xe87   :  { %3253 = vadd.xlane.f32.xlu0 %v3252_v31  ;;  %v3249_v55 = vsel %vm1292_vm12, %v3239_v45, 0.0 }
 0xe88   :  { %3250 = vadd.xlane.f32.xlu1 %v3249_v55  ;;  %v4607_v6 = vpop.f32.mrb[30].mxu0 }
 0xe89   :  { %v3229_v1 = vadd.f32 %v4607_v6, %v6983_v23  ;;  %v3197_v26 = vpop.f32.mrb[31].mxu0  ;;  %v5111_v6 = vmov 0.0|0.0  }
 0xe8a   :  { %v3228_v27 = vadd.f32 %v3197_v26, %v6981_v62  ;;  %4810 = vmatprep.subr.bf16.mxu1 %v5111_v6  ;;  %4831 = vmatprep.subr.bf16.mxu0 %v5111_v6 }
 0xe8b   :  { %v3242_v5 = vadd.f32 %v4182_v10, %v3229_v1  ;;  %v5113_v1 = vmov 0.0  }
 0xe8c   :  { %v3241_v51 = vadd.f32 %v4182_v10, %v3228_v27  ;;  %v4610_v56 = vpop.f32.mrb[32].mxu0  ;;  %4630 = vmatprep.mubr.msk.f32.mxu1 %vm5112_vm5, %v5113_v1  ;;  %4659 = vmatprep.mubr.msk.f32.mxu0 %vm5112_vm5, %v5113_v1 }
 0xe8d   :  { %v3231_v38 = vadd.f32 %v4610_v56, %v6993_v43  ;;  %v3207_v24 = vpop.f32.mrb[33].mxu0  ;;  %v3258_v48 = vsel %vm1292_vm12, %v3242_v5, 0.0 }
 0xe8e   :  { %v3230_v21 = vadd.f32 %v3207_v24, %v6989_v39  ;;  %3259 = vadd.xlane.f32.xlu0 %v3258_v48  ;;  %v3255_v36 = vsel %vm1292_vm12, %v3241_v51, 0.0 }
 0xe8f   :  { %v3244_v61 = vadd.f32 %v4182_v10, %v3231_v38  ;;  %3256 = vadd.xlane.f32.xlu1 %v3255_v36 }
 0xe90   :  { %v3243_v53 = vadd.f32 %v4182_v10, %v3230_v21  ;;  %v4613_v23 = vpop.f32.mrb[34].mxu0 }
 0xe91   :  { %v3233_v22 = vadd.f32 %v4613_v23, %v7001_v17  ;;  %v3217_v62 = vpop.f32.mrb[35].mxu0  ;;  %v3264_v59 = vsel %vm1292_vm12, %v3244_v61, 0.0 }
 0xe92   :  { %v3232_v50 = vadd.f32 %v3217_v62, %v6999_v20  ;;  %3265 = vadd.xlane.f32.xlu0 %v3264_v59  ;;  %v3261_v43 = vsel %vm1292_vm12, %v3243_v53, 0.0 }
 0xe93   :  { %v3246_v11 = vadd.f32 %v4182_v10, %v3233_v22  ;;  %3262 = vadd.xlane.f32.xlu1 %v3261_v43 }
 0xe94   :  { %v3245_v39 = vadd.f32 %v4182_v10, %v3232_v50 }
 0xe95   :  { %v3270_v2 = vsel %vm1292_vm12, %v3246_v11, 0.0 }
 0xe96   :  { %3271 = vadd.xlane.f32.xlu0 %v3270_v2  ;;  %v3267_v16 = vsel %vm1292_vm12, %v3245_v39, 0.0  ;;  %v4183_v2 = vld [vmem:[%s7458_s27 + $0x2] ss:$0 sm:$0xff] }
 0xe97   :  { %3268 = vadd.xlane.f32.xlu1 %v3267_v16 }
 0xf14   :  { %v3254_v8 = vpop.xlane.xlu0 %3253 }
 0xf15   :  { %v3274_v7 = vmul.f32 0.03125, %v3254_v8  ;;  %v3251_v17 = vpop.xlane.xlu1 %3250 }
 0xf16   :  { %v3273_v58 = vmul.f32 0.03125, %v3251_v17 }
 0xf17   :  { %v7189_v4 = vsub.f32 %v3240_v18, %v3274_v7 }
 0xf18   :  { %v7191_v12 = vsub.f32 %v3239_v45, %v3273_v58 }
 0xf19   :  { %v3290_v20 = vmul.f32 %v7189_v4, %v7189_v4 }
 0xf1a   :  { %v3289_v42 = vmul.f32 %v7191_v12, %v7191_v12 }
 0xf1b   :  { %v3260_v60 = vpop.xlane.xlu0 %3259  ;;  %v3300_v9 = vsel %vm1292_vm12, %v3290_v20, 0.0 }
 0xf1c   :  { %v3276_v57 = vmul.f32 0.03125, %v3260_v60  ;;  %3301 = vadd.xlane.f32.xlu0 %v3300_v9  ;;  %v3257_v54 = vpop.xlane.xlu1 %3256  ;;  %v3297_v19 = vsel %vm1292_vm12, %v3289_v42, 0.0  ;;  %v4184_v42 = vld [vmem:[%s7458_s27 + $0x3] ss:$0 sm:$0xff] }
 0xf1d   :  { %v3275_v44 = vmul.f32 0.03125, %v3257_v54  ;;  %3298 = vadd.xlane.f32.xlu1 %v3297_v19 }
 0xf1e   :  { %v7199_v13 = vsub.f32 %v3242_v5, %v3276_v57 }
 0xf1f   :  { %v7201_v32 = vsub.f32 %v3241_v51, %v3275_v44  ;;  %v3266_v40 = vpop.xlane.xlu0 %3265 }
 0xf20   :  { %v3278_v52 = vmul.f32 0.03125, %v3266_v40  ;;  %v3263_v25 = vpop.xlane.xlu1 %3262  ;;  %v3292_v49 = vmul.f32 %v7199_v13, %v7199_v13 }
 0xf21   :  { %v3277_v15 = vmul.f32 0.03125, %v3263_v25  ;;  %v3291_v30 = vmul.f32 %v7201_v32, %v7201_v32 }
 0xf22   :  { %v7207_v41 = vsub.f32 %v3244_v61, %v3278_v52  ;;  %v3306_v0 = vsel %vm1292_vm12, %v3292_v49, 0.0 }
 0xf23   :  { %v7210_v47 = vsub.f32 %v3243_v53, %v3277_v15  ;;  %3307 = vadd.xlane.f32.xlu0 %v3306_v0  ;;  %v3272_v28 = vpop.xlane.xlu0 %3271  ;;  %v3303_v35 = vsel %vm1292_vm12, %v3291_v30, 0.0 }
 0xf24   :  { %v3280_v14 = vmul.f32 0.03125, %v3272_v28  ;;  %3304 = vadd.xlane.f32.xlu1 %v3303_v35  ;;  %v3269_v29 = vpop.xlane.xlu1 %3268  ;;  %v3294_v34 = vmul.f32 %v7207_v41, %v7207_v41 }
 0xf25   :  { %v3279_v3 = vmul.f32 0.03125, %v3269_v29  ;;  %v3293_v63 = vmul.f32 %v7210_v47, %v7210_v47 }
 0xf26   :  { %v7217_v10 = vsub.f32 %v3246_v11, %v3280_v14  ;;  %v3312_v46 = vsel %vm1292_vm12, %v3294_v34, 0.0 }
 0xf27   :  { %v7220_v33 = vsub.f32 %v3245_v39, %v3279_v3  ;;  %3313 = vadd.xlane.f32.xlu0 %v3312_v46  ;;  %v3309_v37 = vsel %vm1292_vm12, %v3293_v63, 0.0 }
 0xf28   :  { %3310 = vadd.xlane.f32.xlu1 %v3309_v37  ;;  %v3296_v18 = vmul.f32 %v7217_v10, %v7217_v10 }
 0xf29   :  { %v3295_v45 = vmul.f32 %v7220_v33, %v7220_v33 }
 0xf2a   :  { %v3318_v31 = vsel %vm1292_vm12, %v3296_v18, 0.0 }
 0xf2b   :  { %3319 = vadd.xlane.f32.xlu0 %v3318_v31  ;;  %v3315_v55 = vsel %vm1292_vm12, %v3295_v45, 0.0 }
 0xf2c   :  { %3316 = vadd.xlane.f32.xlu1 %v3315_v55 }
 0xfa9   :  { %v3302_v26 = vpop.xlane.xlu0 %3301 }
 0xfaa   :  { %v3322_v27 = vmul.f32 0.03125, %v3302_v26  ;;  %v3299_v5 = vpop.xlane.xlu1 %3298 }
 0xfab   :  { %v3321_v51 = vmul.f32 0.03125, %v3299_v5  ;;  %v3377_v5 = vld [vmem:[%s7405_s16] sm:$0xff] }
 0xfac   :  { %v3330_v56 = vadd.f32 1e-05, %v3322_v27  ;;  %v3451_v27 = vld [vmem:[%s7404_s14] sm:$0xff] }
 0xfad   :  { %v3329_v38 = vadd.f32 1e-05, %v3321_v51 }
 0xfae   :  { %5040 = vrsqrt.f32 %v3330_v56  ;;  %v3453_v56 = vld [vmem:[%s7404_s14 + $0x10] sm:$0xff] }
 0xfaf   :  { %5042 = vrsqrt.f32 %v3329_v38  ;;  %v3454_v38 = vld [vmem:[%s7404_s14 + $0x18] sm:$0xff] }
 0xfb0   :  { %v3308_v24 = vpop.xlane.xlu0 %3307 }
 0xfb1   :  { %v3324_v48 = vmul.f32 0.03125, %v3308_v24  ;;  %v3305_v21 = vpop.xlane.xlu1 %3304  ;;  %v4826_v24 = vpack.c.bf16 %v3454_v38, %v3453_v56 }
 0xfb2   :  { %v3323_v36 = vmul.f32 0.03125, %v3305_v21  ;;  %v3534_v21 = vld [vmem:[%s7406_s15 + $0x8] sm:$0xff] }
 0xfb3   :  { %v3332_v61 = vadd.f32 1e-05, %v3324_v48  ;;  %v3533_v48 = vld [vmem:[%s7406_s15] sm:$0xff] }
 0xfb4   :  { %v3331_v53 = vadd.f32 1e-05, %v3323_v36  ;;  %v3314_v23 = vpop.xlane.xlu0 %3313  ;;  %v3535_v36 = vld [vmem:[%s7406_s15 + $0x10] sm:$0xff] }
 0xfb5   :  { %5044 = vrsqrt.f32 %v3332_v61  ;;  %v3326_v22 = vmul.f32 0.03125, %v3314_v23  ;;  %v3311_v62 = vpop.xlane.xlu1 %3310  ;;  %v4832_v61 = vpack.c.bf16 %v3534_v21, %v3533_v48 }
 0xfb6   :  { %5046 = vrsqrt.f32 %v3331_v53  ;;  %v3325_v59 = vmul.f32 0.03125, %v3311_v62  ;;  %v3536_v53 = vld [vmem:[%s7406_s15 + $0x18] sm:$0xff]  ;;  %v3539_v62 = vld [vmem:[%s7406_s15 + $0x28] sm:$0xff] }
 0xfb7   :  { %v3334_v50 = vadd.f32 1e-05, %v3326_v22  ;;  %4833 = vmatpush3.bf16.msra.mxu0 %v4832_v61  ;;  %v4835_v23 = vpack.c.bf16 %v3536_v53, %v3535_v36  ;;  %v3538_v22 = vld [vmem:[%s7406_s15 + $0x20] sm:$0xff] }
 0xfb8   :  { %v5041_v43 = vpop.eup %5040  ;;  %v3333_v11 = vadd.f32 1e-05, %v3325_v59  ;;  %v3320_v39 = vpop.xlane.xlu0 %3319  ;;  %4834 = vmatprep.subr.bf16.mxu0 %v5111_v6  ;;  %v4829_v59 = vpack.c.bf16 %v3539_v62, %v3538_v22 }
 0xfb9   :  { %v5043_v16 = vpop.eup %5042  ;;  %v3346_v8 = vmul.f32 %v5041_v43, %v7189_v4  ;;  %5048 = vrsqrt.f32 %v3334_v50  ;;  %v3328_v7 = vmul.f32 0.03125, %v3320_v39  ;;  %v3317_v17 = vpop.xlane.xlu1 %3316 }
 0xfba   :  { %v3345_v58 = vmul.f32 %v5043_v16, %v7191_v12  ;;  %5050 = vrsqrt.f32 %v3333_v11  ;;  %v3327_v20 = vmul.f32 0.03125, %v3317_v17  ;;  %v4186_v11 = vld [vmem:[%s7458_s27 + $0x4] ss:$0 sm:$0xff]  ;;  %v3698_v17 = vld [vmem:[%s7408_s18 + $0x10] sm:$0xff] }
 0xfbb   :  { %v3336_v60 = vadd.f32 1e-05, %v3328_v7  ;;  %v3358_v9 = vmul.f32 %v4183_v2, %v3346_v8  ;;  %4836 = vmatpush3.bf16.msra.mxu0 %v4835_v23  ;;  %v3958_v23 = vld [vmem:[%s7410_s4 + $0x10] sm:$0xff] }
 0xfbc   :  { %v3335_v57 = vadd.f32 1e-05, %v3327_v20  ;;  %v3357_v54 = vmul.f32 %v4183_v2, %v3345_v58  ;;  %v3696_v58 = vld [vmem:[%s7408_s18] sm:$0xff] }
 0xfbd   :  { %5052 = vrsqrt.f32 %v3336_v60  ;;  %v3370_v19 = vadd.f32 %v4184_v42, %v3358_v9 }
 0xfbe   :  { %5054 = vrsqrt.f32 %v3335_v57  ;;  %v3369_v44 = vadd.f32 %v4184_v42, %v3357_v54 }
 0xfbf   :  { %v5045_v4 = vpop.eup %5044 }
 0xfc0   :  { %v5047_v40 = vpop.eup %5046  ;;  %v3348_v52 = vmul.f32 %v5045_v4, %v7199_v13  ;;  %v4811_v25 = vpack.c.bf16 %v3370_v19, %v3369_v44  ;;  %v3699_v19 = vld [vmem:[%s7408_s18 + $0x18] sm:$0xff]  ;;  %v3692_v44 = vld [vmem:[%s7409_s17] sm:$0xff]  ;;  %v3697_v4 = vld [vmem:[%s7408_s18 + $0x8] sm:$0xff] }
 0xfc1   :  { %v3347_v12 = vmul.f32 %v5047_v40, %v7201_v32  ;;  %v3693_v40 = vld [vmem:[%s7409_s17 + $0x8] sm:$0xff] }
 0xfc2   :  { %4812 = vmatpush3.bf16.msra.mxu1 %v4811_v25  ;;  %v3360_v49 = vmul.f32 %v4183_v2, %v3348_v52  ;;  %v3694_v52 = vld [vmem:[%s7409_s17 + $0x10] sm:$0xff]  ;;  %v3695_v25 = vld [vmem:[%s7409_s17 + $0x18] sm:$0xff] }
 0xfc3   :  { %v5049_v15 = vpop.eup %5048  ;;  %4813 = vmatprep.subr.bf16.mxu1 %v5111_v6  ;;  %v3359_v30 = vmul.f32 %v4183_v2, %v3347_v12 }
 0xfc4   :  { %v5051_v0 = vpop.eup %5050  ;;  %v3350_v28 = vmul.f32 %v5049_v15, %v7207_v41  ;;  %v3372_v35 = vadd.f32 %v4184_v42, %v3360_v49 }
 0xfc5   :  { %v3349_v14 = vmul.f32 %v5051_v0, %v7210_v47  ;;  %v3371_v29 = vadd.f32 %v4184_v42, %v3359_v30 }
 0xfc6   :  { %v3362_v34 = vmul.f32 %v4183_v2, %v3350_v28  ;;  %v4199_v28 = vld [vmem:[%s7458_s27 + $0x6] ss:$0 sm:$0xff] }
 0xfc7   :  { %v5053_v3 = vpop.eup %5052  ;;  %v4814_v63 = vpack.c.bf16 %v3372_v35, %v3371_v29  ;;  %v3361_v13 = vmul.f32 %v4183_v2, %v3349_v14 }
 0xfc8   :  { %v5055_v46 = vpop.eup %5054  ;;  %v3352_v32 = vmul.f32 %v5053_v3, %v7217_v10  ;;  %v3374_v37 = vadd.f32 %v4184_v42, %v3362_v34  ;;  %v3452_v10 = vld [vmem:[%s7404_s14 + $0x8] sm:$0xff] }
 0xfc9   :  { %v3351_v18 = vmul.f32 %v5055_v46, %v7220_v33  ;;  %4815 = vmatpush3.bf16.msra.mxu1 %v4814_v63  ;;  %v3373_v45 = vadd.f32 %v4184_v42, %v3361_v13  ;;  %v4823_v51 = vpack.c.bf16 %v3452_v10, %v3451_v27  ;;  %v3957_v10 = vld [vmem:[%s7410_s4 + $0x8] sm:$0xff] }
 0xfca   :  { %4816 = vmatprep.subr.bf16.mxu1 %v5111_v6  ;;  %v3364_v31 = vmul.f32 %v4183_v2, %v3352_v32  ;;  %v3969_v38 = vsub.f32 1.0, %v3957_v10 }
 0xfcb   :  { %v4817_v41 = vpack.c.bf16 %v3374_v37, %v3373_v45  ;;  %v3363_v55 = vmul.f32 %v4183_v2, %v3351_v18 }
 0xfcc   :  { %v3376_v26 = vadd.f32 %v4184_v42, %v3364_v31 }
 0xfcd   :  { %4818 = vmatpush3.bf16.msra.mxu1 %v4817_v41  ;;  %v3375_v47 = vadd.f32 %v4184_v42, %v3363_v55  ;;  %v4190_v42 = vld [vmem:[%s7458_s27 + $0x5] ss:$0 sm:$0xff] }
 0xfce   :  { %4819 = vmatprep.subr.bf16.mxu1 %v5111_v6 }
 0xfcf   :  { %v4820_v33 = vpack.c.bf16 %v3376_v26, %v3375_v47  ;;  %v4200_v26 = vld [vmem:[%s7458_s27 + $0x7] ss:$0 sm:$0xff] }
 0xfd1   :  { %4821 = vmatpush3.bf16.msra.mxu1 %v4820_v33 }
 0xfd2   :  { %4822 = vmatprep.subr.bf16.mxu1 %v5111_v6 }
 0xfd4   :  { %4631 = vmatmul.mubr.msk.f32.vlgmr.msra.gmra.mrb[28].mxu1 %vm1450_vm9, %v3377_v5 }
 0xfd5   :  { %4824 = vmatpush3.bf16.msra.mxu1 %v4823_v51  ;;  %4641 = vmatprep.mubr.msk.f32.mxu1 %vm5112_vm5, %v5113_v1 }
 0xfd6   :  { %4825 = vmatprep.subr.bf16.mxu1 %v5111_v6 }
 0xfd9   :  { %4827 = vmatpush3.bf16.msra.mxu1 %v4826_v24  ;;  %v3956_v24 = vld [vmem:[%s7410_s4] sm:$0xff] }
 0xfda   :  { %4828 = vmatprep.subr.bf16.mxu1 %v5111_v6  ;;  %v3537_v6 = vld [vmem:[%s7407_s3] sm:$0xff]  ;;  %v3968_v53 = vsub.f32 1.0, %v3956_v24 }
0x10a7   :  { %v3447_v50 = vpop.f32.mrb[28].mxu1 }
0x10a8   :  { %v4632_v43 = vpop.f32.mrb[29].mxu1  ;;  %4642 = vmatmul.mubr.msk.f32.vlgmr.msra.gmra.mrb[30].mxu1 %vm1292_vm12, %v3447_v50 }
0x10a9   :  { %4830 = vmatpush3.bf16.msra.mxu1 %v4829_v59  ;;  %4648 = vmatprep.mubr.msk.f32.mxu1 %vm5112_vm5, %v5113_v1  ;;  %v3970_v59 = vsub.f32 1.0, %v3958_v23 }
0x10ac   :  { %4649 = vmatmul.mubr.msk.f32.vlgmr.msra.gmra.mrb[32].mxu1 %vm1017_vm15, %v3537_v6  ;;  %v3959_v6 = vld [vmem:[%s7410_s4 + $0x18] sm:$0xff] }
0x10ad   :  { %4667 = vmatprep.mubr.msk.f32.mxu1 %vm1147_vm7, %v3698_v17 }
0x117b   :  { %v3529_v39 = vpop.f32.mrb[30].mxu1 }
0x117c   :  { %v3530_v2 = vadd.f32 %v4186_v11, %v3529_v39  ;;  %v4643_v16 = vpop.f32.mrb[31].mxu1 }
0x117e   :  { %4660 = vmatmul.mubr.msk.f32.vlgmr.msra.gmra.mrb[36].mxu0 %vm1292_vm12, %v3530_v2 }
0x117f   :  { %v3609_v8 = vpop.f32.mrb[32].mxu1  ;;  %4664 = vmatprep.mubr.msk.f32.mxu0 %vm1147_vm7, %v3696_v58 }
0x1180   :  { %v4650_v7 = vpop.f32.mrb[33].mxu1 }
0x1251   :  { %v3682_v20 = vpop.f32.mrb[36].mxu0 }
0x1252   :  { %v3683_v60 = vadd.f32 %v3682_v20, %v3609_v8  ;;  %v4661_v9 = vpop.f32.mrb[37].mxu0  ;;  %v3971_v8 = vsub.f32 1.0, %v3959_v6 }
0x1254   :  { %v3691_v57 = vadd.f32 %v4190_v42, %v3683_v60 }
0x1256   :  { %3701 = vrot.lane.b32.xlu1 %v3691_v57, %s5114_s21 }
0x12c8   :  { %v3702_v54 = vpop.permute.xlu1 %3701 }
0x12c9   :  { %4662 = vmatprep.subr.mxu0 %v3702_v54  ;;  %4837 = vmatprep.subr.mxu1 %v3702_v54 }
0x12ca   :  { %4663 = vmatpush3.msra.mxu0 %v3702_v54  ;;  %4838 = vmatpush3.msra.mxu1 %v3702_v54 }
0x12cb   :  { %4668 = vmatmul.mubr.msk.f32.vlgmr.msra.gmra.mrb[34].mxu1 %vm1147_vm7, %v3699_v19  ;;  %4670 = vmatprep.subr.mxu1 %v3691_v57 }
0x12cc   :  { %4671 = vmatpush3.msra.mxu1 %v3691_v57  ;;  %4672 = vmatprep.mubr.msk.f32.mxu1 %vm1147_vm7, %v3692_v44 }
0x12cd   :  { %4665 = vmatmul.mubr.msk.f32.vlgmr.msra.gmra.mrb[38].mxu0 %vm1147_vm7, %v3697_v4 }
0x12cf   :  { %4673 = vmatmul.mubr.msk.f32.vlgmr.msra.gmra.mrb[36].mxu1 %vm1147_vm7, %v3693_v40 }
0x12d0   :  { %4675 = vmatprep.mubr.msk.f32.mxu1 %vm1147_vm7, %v3694_v52 }
0x12d3   :  { %4676 = vmatmul.mubr.msk.f32.gmra.mrb[34].mxu1 %vm1147_vm7, %v3695_v25 }
0x13a0   :  { %v4666_v12 = vpop.f32.mrb[38].mxu0 }
0x13a1   :  { %v3782_v49 = vpop.f32.mrb[39].mxu0 }
0x13a2   :  { %v4674_v15 = vpop.f32.mrb[36].mxu1 }
0x13a3   :  { %v3885_v30 = vadd.f32 %v4674_v15, %v4666_v12  ;;  %v3879_v0 = vpop.f32.mrb[37].mxu1 }
0x13a4   :  { %v3880_v35 = vadd.f32 %v3879_v0, %v3782_v49 }
0x13a5   :  { %v3899_v14 = vmax.f32 %v3885_v30, 0.0 }
0x13a6   :  { %v3898_v29 = vmax.f32 %v3880_v35, 0.0  ;;  %v4677_v34 = vpop.f32.mrb[34].mxu1 }
0x13a7   :  { %v3908_v3 = vmul.f32 %v4199_v28, %v3899_v14  ;;  %v3889_v63 = vpop.f32.mrb[35].mxu1  ;;  %v3901_v37 = vmax.f32 %v4677_v34, 0.0 }
0x13a8   :  { %v3907_v13 = vmul.f32 %v4199_v28, %v3898_v29  ;;  %v3900_v46 = vmax.f32 %v3889_v63, 0.0 }
0x13a9   :  { %v3914_v32 = vsel %vm1292_vm12, %v3908_v3, 0.0  ;;  %v3910_v31 = vmul.f32 %v4199_v28, %v3901_v37 }
0x13aa   :  { %3915 = vadd.xlane.f32.xlu0 %v3914_v32  ;;  %v3909_v18 = vmul.f32 %v4199_v28, %v3900_v46  ;;  %v3911_v45 = vsel %vm1292_vm12, %v3907_v13, 0.0 }
0x13ab   :  { %v3920_v55 = vsel %vm1292_vm12, %v3910_v31, 0.0 }
0x13ac   :  { %v3917_v41 = vsel %vm1292_vm12, %v3909_v18, 0.0 }
0x13ae   :  { %3912 = vadd.xlane.f32.xlu0 %v3911_v45 }
0x13b2   :  { %3918 = vadd.xlane.f32.xlu0 %v3917_v41 }
0x13b6   :  { %3921 = vadd.xlane.f32.xlu0 %v3920_v55 }
0x1437   :  { %v3916_v47 = vpop.xlane.xlu0 %3915 }
0x1438   :  { %v3929_v27 = vadd.f32 %v4200_v26, %v3916_v47 }
0x143a   :  { %v3933_v33 = vsub.f32 0.0, %v3929_v27 }
0x143b   :  { %v3913_v5 = vpop.xlane.xlu0 %3912 }
0x143c   :  { %v3938_v51 = vmul.f32 1.442695, %v3933_v33  ;;  %v3928_v56 = vadd.f32 %v4200_v26, %v3913_v5 }
0x143e   :  { %5056 = vpow2.f32 %v3938_v51  ;;  %v3932_v48 = vsub.f32 0.0, %v3928_v56 }
0x143f   :  { %v3919_v21 = vpop.xlane.xlu0 %3918  ;;  %5058 = vlog2.f32 %v3957_v10 }
0x1440   :  { %v3936_v36 = vmul.f32 1.442695, %v3932_v48  ;;  %v3930_v61 = vadd.f32 %v4200_v26, %v3919_v21  ;;  %5060 = vlog2.f32 %v3969_v38 }
0x1442   :  { %5062 = vpow2.f32 %v3936_v36  ;;  %v3934_v22 = vsub.f32 0.0, %v3930_v61 }
0x1443   :  { %v3922_v62 = vpop.xlane.xlu0 %3921  ;;  %5064 = vlog2.f32 %v3956_v24 }
0x1444   :  { %v3940_v50 = vmul.f32 1.442695, %v3934_v22  ;;  %v3931_v43 = vadd.f32 %v4200_v26, %v3922_v62  ;;  %5066 = vlog2.f32 %v3968_v53  ;;  %v4021_v53 = vld [vmem:[%s7411_s19 + $0x8] sm:$0xff] }
0x1446   :  { %5068 = vpow2.f32 %v3940_v50  ;;  %v3935_v11 = vsub.f32 0.0, %v3931_v43  ;;  %v4020_v50 = vld [vmem:[%s7411_s19] sm:$0xff] }
0x1447   :  { %5070 = vlog2.f32 %v3958_v23 }
0x1448   :  { %v5057_v39 = vpop.eup %5056  ;;  %5072 = vlog2.f32 %v3970_v59  ;;  %v3942_v2 = vmul.f32 1.442695, %v3935_v11 }
0x1449   :  { %v3945_v16 = vadd.f32 1.0, %v5057_v39  ;;  %v5059_v7 = vpop.eup %5058  ;;  %v4022_v39 = vld [vmem:[%s7411_s19 + $0x10] sm:$0xff] }
0x144a   :  { %5074 = vpow2.f32 %v3942_v2  ;;  %v5061_v17 = vpop.eup %5060  ;;  %v3963_v60 = vmul.f32 0.6931472, %v5059_v7  ;;  %v4023_v7 = vld [vmem:[%s7411_s19 + $0x18] sm:$0xff] }
0x144b   :  { %5076 = vrcp.f32 %v3945_v16  ;;  %v3975_v9 = vmul.f32 0.6931472, %v5061_v17 }
0x144c   :  { %v5063_v58 = vpop.eup %5062  ;;  %5078 = vlog2.f32 %v3959_v6 }
0x144d   :  { %v3944_v20 = vadd.f32 1.0, %v5063_v58  ;;  %5080 = vlog2.f32 %v3971_v8  ;;  %v5065_v42 = vpop.eup %5064  ;;  %v3981_v40 = vsub.f32 %v3963_v60, %v3975_v9 }
0x144e   :  { %v5067_v57 = vpop.eup %5066  ;;  %v3961_v52 = vmul.f32 0.6931472, %v5065_v42 }
0x144f   :  { %5082 = vrcp.f32 %v3944_v20  ;;  %v3973_v25 = vmul.f32 0.6931472, %v5067_v57 }
0x1450   :  { %v5069_v54 = vpop.eup %5068 }
0x1451   :  { %v5071_v19 = vpop.eup %5070  ;;  %v3946_v44 = vadd.f32 1.0, %v5069_v54  ;;  %v3980_v14 = vsub.f32 %v3961_v52, %v3973_v25 }
0x1452   :  { %v5073_v4 = vpop.eup %5072  ;;  %v3965_v15 = vmul.f32 0.6931472, %v5071_v19 }
0x1453   :  { %5084 = vrcp.f32 %v3946_v44  ;;  %v3977_v30 = vmul.f32 0.6931472, %v5073_v4 }
0x1454   :  { %v5075_v12 = vpop.eup %5074 }
0x1455   :  { %v5077_v49 = vpop.eup %5076  ;;  %v3947_v0 = vadd.f32 1.0, %v5075_v12  ;;  %v3982_v63 = vsub.f32 %v3965_v15, %v3977_v30 }
0x1456   :  { %v5079_v28 = vpop.eup %5078  ;;  %v3985_v35 = vadd.f32 %v5077_v49, %v3981_v40 }
0x1457   :  { %v5081_v29 = vpop.eup %5080  ;;  %5086 = vrcp.f32 %v3947_v0  ;;  %v3967_v32 = vmul.f32 0.6931472, %v5079_v28 }
0x1458   :  { %v3989_v34 = vsub.f32 0.0, %v3985_v35  ;;  %v3979_v37 = vmul.f32 0.6931472, %v5081_v29 }
0x1459   :  { %v5083_v3 = vpop.eup %5082 }
0x145a   :  { %v3994_v13 = vmul.f32 1.442695, %v3989_v34  ;;  %v3984_v46 = vadd.f32 %v5083_v3, %v3980_v14  ;;  %v3983_v55 = vsub.f32 %v3967_v32, %v3979_v37 }
0x145c   :  { %5088 = vpow2.f32 %v3994_v13  ;;  %v3988_v18 = vsub.f32 0.0, %v3984_v46 }
0x145d   :  { %v5085_v45 = vpop.eup %5084 }
0x145e   :  { %v3992_v31 = vmul.f32 1.442695, %v3988_v18  ;;  %v3986_v41 = vadd.f32 %v5085_v45, %v3982_v63 }
0x1460   :  { %5090 = vpow2.f32 %v3992_v31  ;;  %v3990_v26 = vsub.f32 0.0, %v3986_v41 }
0x1461   :  { %v5087_v47 = vpop.eup %5086 }
0x1462   :  { %v3996_v27 = vmul.f32 1.442695, %v3990_v26  ;;  %v3987_v10 = vadd.f32 %v5087_v47, %v3983_v55 }
0x1464   :  { %5092 = vpow2.f32 %v3996_v27  ;;  %v3991_v33 = vsub.f32 0.0, %v3987_v10 }
0x1466   :  { %v5089_v5 = vpop.eup %5088  ;;  %v3998_v51 = vmul.f32 1.442695, %v3991_v33 }
0x1467   :  { %v4001_v56 = vadd.f32 1.0, %v5089_v5 }
0x1468   :  { %5094 = vpow2.f32 %v3998_v51 }
0x1469   :  { %5096 = vrcp.f32 %v4001_v56 }
0x146a   :  { %v5091_v38 = vpop.eup %5090 }
0x146b   :  { %v4000_v24 = vadd.f32 1.0, %v5091_v38 }
0x146d   :  { %5098 = vrcp.f32 %v4000_v24 }
0x146e   :  { %v5093_v48 = vpop.eup %5092 }
0x146f   :  { %v4002_v21 = vadd.f32 1.0, %v5093_v48 }
0x1471   :  { %5100 = vrcp.f32 %v4002_v21 }
0x1472   :  { %v5095_v36 = vpop.eup %5094 }
0x1473   :  { %v5097_v61 = vpop.eup %5096  ;;  %v4003_v23 = vadd.f32 1.0, %v5095_v36 }
0x1474   :  { %vm4013_vm13 = vcmp.gt.f32.partialorder %v5097_v61, 0.5 }
0x1475   :  { %v4017_v22 = vsel %vm4013_vm13, 1.0, %v5113_v1  ;;  %5102 = vrcp.f32 %v4003_v23 }
0x1476   :  { %v4025_v62 = vmul.f32 %v4021_v53, %v4017_v22 }
0x1477   :  { %v5099_v59 = vpop.eup %5098 }
0x1478   :  { %4030 = vst.msk [vmem:[%s7412_s20 + $0x8] sm:$0xff] %vm4028_vm14, %v4025_v62  ;;  %vm4012_vm15 = vcmp.gt.f32.partialorder %v5099_v59, 0.5 }
0x1479   :  { %v4016_v43 = vsel %vm4012_vm15, 1.0, %v5113_v1 }
0x147a   :  { %v4024_v6 = vmul.f32 %v4020_v50, %v4016_v43 }
0x147b   :  { %v5101_v11 = vpop.eup %5100 }
0x147c   :  { %4029 = vst.msk [vmem:[%s7412_s20] sm:$0xff] %vm4028_vm14, %v4024_v6  ;;  %vm4014_vm0 = vcmp.gt.f32.partialorder %v5101_v11, 0.5 }
0x147d   :  { %v4018_v2 = vsel %vm4014_vm0, 1.0, %v5113_v1 }
0x147e   :  { %v4026_v16 = vmul.f32 %v4022_v39, %v4018_v2 }
0x147f   :  { %v5103_v8 = vpop.eup %5102 }
0x1480   :  { %4031 = vst.msk [vmem:[%s7412_s20 + $0x10] sm:$0xff] %vm4028_vm14, %v4026_v16  ;;  %vm4015_vm1 = vcmp.gt.f32.partialorder %v5103_v8, 0.5 }
0x1481   :  { %v4019_v17 = vsel %vm4015_vm1, 1.0, %v5113_v1 }
0x1482   :  { %v4027_v58 = vmul.f32 %v4023_v7, %v4019_v17 }
0x1484   :  { %4032 = vst.msk [vmem:[%s7412_s20 + $0x18] sm:$0xff] %vm4028_vm14, %v4027_v58 }

</bundles_post_ra>
